<compile_context>
chip_gen: v7x
topology: tpu7x:2x2x1
jax: 0.10.0
libtpu: 0.0.40
codegen_flags: <defaults>
</compile_context>

<pallas_src>
import jax
import jax.numpy as jnp
from jax.experimental import pallas as pl
from jax.experimental.pallas import tpu as pltpu


def _round_up(x, m):
    return ((x + m - 1) // m) * m


# --------------------------------------------------------------------------
# Pallas kernel: one (row-tile i, reduction-tile k) step of the fused
# bidirectional SAGE aggregation + output projection.
# --------------------------------------------------------------------------
def conv_module_kernel(h_ref, xi_ref, b_ref, bt_ref, dinv_ref,
                       wagg_ref, wr_ref, bout_ref, out_ref, acc_ref):
    k = pl.program_id(1)

    @pl.when(k == 0)
    def _():
        acc_ref[...] = jnp.zeros_like(acc_ref)

    c = acc_ref.shape[1] // 2

    h = h_ref[...]                                 # (TK, 2C) bf16, precomputed
    b = b_ref[...].astype(jnp.bfloat16)            # int8 -> bf16 on the VPU
    bt = bt_ref[...].astype(jnp.bfloat16)

    # "in"  direction: agg_in[i]  += sum_j B[i, j] * h_in[j]
    agg_in = jnp.dot(b, h[:, :c], preferred_element_type=jnp.float32)
    # "out" direction: agg_out[i] += sum_j B[j, i] * h_out[j]
    # (Bt pre-materialized in the wrapper -> plain dot, no per-step transpose)
    agg_out = jnp.dot(bt, h[:, c:], preferred_element_type=jnp.float32)

    # One fused accumulator -> single full-width VMEM read-modify-write.
    acc_ref[...] += jnp.concatenate([agg_in, agg_out], axis=-1)

    @pl.when(k == pl.num_programs(1) - 1)
    def _():
        # Mean normalization (merged 1/deg stream), then the fused epilogue:
        #   out = [agg_in | agg_out] @ [Wl_in; Wl_out] + x_i @ (Wr_in+Wr_out) + b
        agg = (acc_ref[...] * dinv_ref[...]).astype(jnp.bfloat16)
        out = jnp.dot(agg, wagg_ref[...], preferred_element_type=jnp.float32)
        out += jnp.dot(xi_ref[...], wr_ref[...],
                       preferred_element_type=jnp.float32)
        out_ref[...] = (out + bout_ref[...]).astype(out_ref.dtype)


# --------------------------------------------------------------------------
# Wrapper: build int8 count adjacency (+transpose), O(E) degree inverses,
# precompute projection H, fuse/pre-sum weights, pad, launch pallas_call.
# --------------------------------------------------------------------------
def conv_module_forward(x, ei, params, *, tile=512):
    n, c = x.shape
    cout = params['in']['wl'].shape[1]
    cout_pad = _round_up(cout, 128)            # lane-dense output stores
    n_pad = _round_up(n, tile)

    src, dst = ei[0], ei[1]

    # int8 count adjacency B[i, j] = #edges j->i, and its transpose, built
    # directly in the storage dtype (counts <= 127 assumed).
    b = jnp.zeros((n_pad, n_pad), jnp.int8).at[dst, src].add(1)
    bt = jnp.zeros((n_pad, n_pad), jnp.int8).at[src, dst].add(1)

    # O(E) degree computation (no dense N^2 reductions).
    ones = jnp.ones(src.shape[0], jnp.float32)
    deg_in = jax.ops.segment_sum(ones, dst, num_segments=n_pad)
    deg_out = jax.ops.segment_sum(ones, src, num_segments=n_pad)
    dinv_in = jnp.where(deg_in > 0, 1.0 / jnp.maximum(deg_in, 1.0), 0.0)
    dinv_out = jnp.where(deg_out > 0, 1.0 / jnp.maximum(deg_out, 1.0), 0.0)
    # Merged degree-inverse stream, pre-broadcast over the two lane halves.
    dinv = jnp.concatenate(
        [jnp.broadcast_to(dinv_in[:, None], (n_pad, c)),
         jnp.broadcast_to(dinv_out[:, None], (n_pad, c))], axis=1)  # (n_pad,2C) f32

    p_in, p_out = params['in'], params['out']

    # Projection precomputed ONCE: H = relu(X @ [Wp_in | Wp_out] + [bp|bp]).
    wp = jnp.concatenate([p_in['wp'], p_out['wp']], axis=1)
    bp = jnp.concatenate([p_in['bp'], p_out['bp']], axis=1)
    h = jax.nn.relu(x @ wp + bp)
    h_pad = jnp.zeros((n_pad, 2 * c), jnp.float32).at[:n].set(h).astype(jnp.bfloat16)
    x_pad = jnp.zeros((n_pad, c), jnp.float32).at[:n].set(x).astype(jnp.bfloat16)

    # Fused output weights: [Wl_in; Wl_out], Wr_in + Wr_out, bl_in + bl_out,
    # zero-padded to 128 output lanes.
    w_agg = jnp.concatenate([p_in['wl'], p_out['wl']], axis=0)       # (2C, COUT)
    w_agg = jnp.zeros((2 * c, cout_pad), jnp.float32).at[:, :cout].set(
        w_agg).astype(jnp.bfloat16)
    w_r = jnp.zeros((c, cout_pad), jnp.float32).at[:, :cout].set(
        p_in['wr'] + p_out['wr']).astype(jnp.bfloat16)
    b_out = jnp.zeros((1, cout_pad), jnp.float32).at[:, :cout].set(
        p_in['bl'] + p_out['bl'])                                    # f32

    gi = n_pad // tile
    full = lambda shape: pl.BlockSpec(shape, lambda i, k: (0, 0))

    # Explicit VMEM budget (double-buffered streams + scratch + weights), with
    # headroom; capped at 60 MiB so the configuration also fits v7x (64 MiB).
    budget = (2 * 2 * tile * tile * 1          # B, Bt (int8), 2 buffers each
              + 2 * tile * 2 * c * 2           # H (bf16)
              + 2 * tile * c * 2               # x (bf16)
              + 2 * tile * 2 * c * 4           # dinv (f32)
              + 2 * tile * cout_pad * 4        # out (f32)
              + tile * 2 * c * 4               # accumulator scratch
              + (3 * c) * cout_pad * 2 + cout_pad * 4)     # weights + bias
    vmem_limit = int(min(max(4 * budget, 32 << 20), 60 << 20))

    out = pl.pallas_call(
        conv_module_kernel,
        out_shape=jax.ShapeDtypeStruct((n_pad, cout_pad), jnp.float32),
        grid_spec=pltpu.PrefetchScalarGridSpec(
            num_scalar_prefetch=0,
            grid=(gi, gi),
            in_specs=[
                pl.BlockSpec((tile, 2 * c), lambda i, k: (k, 0)),    # H, k-block
                pl.BlockSpec((tile, c), lambda i, k: (i, 0)),        # x, i-block
                pl.BlockSpec((tile, tile), lambda i, k: (i, k)),     # B[i,k] int8
                pl.BlockSpec((tile, tile), lambda i, k: (i, k)),     # Bt[i,k] int8
                pl.BlockSpec((tile, 2 * c), lambda i, k: (i, 0)),    # 1/deg merged
                full((2 * c, cout_pad)),                             # [Wl_in; Wl_out]
                full((c, cout_pad)),                                 # Wr_in + Wr_out
                full((1, cout_pad)),                                 # bl_in + bl_out
            ],
            out_specs=pl.BlockSpec((tile, cout_pad), lambda i, k: (i, 0)),
            scratch_shapes=[pltpu.VMEM((tile, 2 * c), jnp.float32)]),
        compiler_params=pltpu.CompilerParams(
            # TODO(synk): on v7x the row axis could be pltpu.CORE_PARALLEL to
            # shard row-tiles across the 2 TensorCores; kept "parallel" here
            # for portability across v5e/v6e.
            dimension_semantics=("parallel", "arbitrary"),
            vmem_limit_bytes=vmem_limit),
    )(h_pad, x_pad, b, bt, dinv, w_agg, w_r, b_out)

    return out[:n, :cout]


# --------------------------------------------------------------------------
# Pure-JAX reference (scatter-based, mirrors PyG message passing exactly)
# --------------------------------------------------------------------------
def reference(x, ei, params):
    n = x.shape[0]

    def sage(ei_, p):
        src, dst = ei_[0], ei_[1]
        h = jax.nn.relu(x @ p['wp'] + p['bp'])
        msg_sum = jnp.zeros((n, h.shape[1]), jnp.float32).at[dst].add(h[src])
        deg = jnp.zeros((n, 1), jnp.float32).at[dst].add(1.0)
        agg = jnp.where(deg > 0, msg_sum / jnp.maximum(deg, 1.0), 0.0)
        return agg @ p['wl'] + p['bl'] + x @ p['wr']

    return sage(ei, params['in']) + sage(jnp.flip(ei, axis=0), params['out'])


# --------------------------------------------------------------------------
if __name__ == "__main__":
    key = jax.random.PRNGKey(0)
    # N=600 with tile=512 -> n_pad=1024, 2x2 grid: exercises padding, the
    # reduction-axis accumulation, and multi-row-tile indexing.
    N, CIN, COUT = 600, 32, 32
    keys = iter(jax.random.split(key, 16))

    x = jax.random.normal(next(keys), (N, CIN), jnp.float32)

    # Directed chain graph (sequence-like, matching DirSeq usage) + a few
    # extra deterministic random edges.
    chain_src = jnp.arange(N - 1, dtype=jnp.int32)
    chain_dst = chain_src + 1
    extra_src = jax.random.randint(next(keys), (16,), 0, N, dtype=jnp.int32)
    extra_dst = jax.random.randint(next(keys), (16,), 0, N, dtype=jnp.int32)
    ei = jnp.stack([jnp.concatenate([chain_src, extra_src]),
                    jnp.concatenate([chain_dst, extra_dst])])
    # ea exists in the module signature but is unused for algo='SAGE'.
    ea = jax.random.normal(next(keys), (ei.shape[1], 2), jnp.float32)

    def init_conv(k):
        ks = jax.random.split(k, 5)
        s = 0.1
        return dict(
            wp=jax.random.normal(ks[0], (CIN, CIN), jnp.float32) * s,   # projection lin (bias)
            bp=jax.random.normal(ks[1], (1, CIN), jnp.float32) * s,
            wl=jax.random.normal(ks[2], (CIN, COUT), jnp.float32) * s,  # lin_l (bias)
            bl=jax.random.normal(ks[3], (1, COUT), jnp.float32) * s,
            wr=jax.random.normal(ks[4], (CIN, COUT), jnp.float32) * s,  # lin_r (no bias)
        )

    params = {'in': init_conv(next(keys)), 'out': init_conv(next(keys))}

    out = conv_module_forward(x, ei, params)
    out = jax.block_until_ready(out)

    ref = reference(x, ei, params)
    assert out.shape == (N, COUT)
    # bf16 MXU operands (f32 accumulation) -> slightly looser tolerance.
    assert jnp.allclose(out, ref, atol=5e-2, rtol=5e-2), "mismatch vs reference"

    print("KERNEL_OK")
</pallas_src>

<mosaic_0001>
module attributes {stable_mosaic.version = 11 : i64} {
  func.func @conv_module_kernel(%arg0: i32, %arg1: i32, %arg2: memref<512x64xbf16, #tpu.memory_space<vmem>>, %arg3: memref<512x32xbf16, #tpu.memory_space<vmem>>, %arg4: memref<512x512xi8, #tpu.memory_space<vmem>>, %arg5: memref<512x512xi8, #tpu.memory_space<vmem>>, %arg6: memref<512x64xf32, #tpu.memory_space<vmem>>, %arg7: memref<64x128xbf16, #tpu.memory_space<vmem>>, %arg8: memref<32x128xbf16, #tpu.memory_space<vmem>>, %arg9: memref<1x128xf32, #tpu.memory_space<vmem>>, %arg10: memref<512x128xf32, #tpu.memory_space<vmem>>, %arg11: memref<512x64xf32, #tpu.memory_space<vmem>>) attributes {dimension_semantics = [#tpu.dimension_semantics<parallel>, #tpu.dimension_semantics<arbitrary>], iteration_bounds = array<i64: 2, 2>, scalar_prefetch = 0 : i64, scratch_operands = 1 : i64, tpu.core_type = #tpu.core_type<tc>, window_params = [{transform_indices = @transform_0, window_bounds = array<i64: 512, 64>}, {transform_indices = @transform_1, window_bounds = array<i64: 512, 32>}, {transform_indices = @transform_2, window_bounds = array<i64: 512, 512>}, {transform_indices = @transform_3, window_bounds = array<i64: 512, 512>}, {transform_indices = @transform_4, window_bounds = array<i64: 512, 64>}, {pipeline_mode = #tpu.pipeline_mode<synchronous>, transform_indices = @transform_5, window_bounds = array<i64: 64, 128>}, {pipeline_mode = #tpu.pipeline_mode<synchronous>, transform_indices = @transform_6, window_bounds = array<i64: 32, 128>}, {pipeline_mode = #tpu.pipeline_mode<synchronous>, transform_indices = @transform_7, window_bounds = array<i64: 1, 128>}, {transform_indices = @transform_8, window_bounds = array<i64: 512, 128>}]} {
    %c0_i32 = arith.constant 0 : i32
    %0 = arith.cmpi eq, %arg1, %c0_i32 : i32
    %1 = arith.extui %0 : i1 to i32
    %c0_i32_0 = arith.constant 0 : i32
    %2 = arith.cmpi ne, %1, %c0_i32_0 : i32
    scf.if %2 {
      %cst_12 = arith.constant 0.000000e+00 : f32
      %19 = vector.broadcast %cst_12 : f32 to vector<512x64xf32>
      %c0_13 = arith.constant 0 : index
      %c0_14 = arith.constant 0 : index
      %20 = vector.load %arg11[%c0_13, %c0_14] : memref<512x64xf32, #tpu.memory_space<vmem>>, vector<512x64xf32>
      tpu.vector_store %arg11[%c0_13, %c0_14], %19 {strides = array<i32>} : memref<512x64xf32, #tpu.memory_space<vmem>>, vector<512x64xf32>,
    } else {
    }
    %c0 = arith.constant 0 : index
    %c0_1 = arith.constant 0 : index
    %3 = vector.load %arg2[%c0, %c0_1] : memref<512x64xbf16, #tpu.memory_space<vmem>>, vector<512x64xbf16>
    %c0_2 = arith.constant 0 : index
    %c0_3 = arith.constant 0 : index
    %4 = vector.load %arg4[%c0_2, %c0_3] : memref<512x512xi8, #tpu.memory_space<vmem>>, vector<512x512xi8>
    %5 = arith.sitofp %4 : vector<512x512xi8> to vector<512x512xbf16>
    %c0_4 = arith.constant 0 : index
    %c0_5 = arith.constant 0 : index
    %6 = vector.load %arg5[%c0_4, %c0_5] : memref<512x512xi8, #tpu.memory_space<vmem>>, vector<512x512xi8>
    %7 = arith.sitofp %6 : vector<512x512xi8> to vector<512x512xbf16>
    %8 = vector.extract_strided_slice %3 {offsets = [0, 0], sizes = [512, 32], strides = [1, 1]} : vector<512x64xbf16> to vector<512x32xbf16>
    %cst = arith.constant dense<0.000000e+00> : vector<512x32xf32>
    %9 = tpu.matmul %5, %8, %cst {dimension_numbers = #tpu.dot_dimension_numbers<[1], [0], [0], [1], [0, 0, 1, 1], [], []>} : vector<512x512xbf16>, vector<512x32xbf16>, vector<512x32xf32> -> vector<512x32xf32>
    %10 = vector.extract_strided_slice %3 {offsets = [0, 32], sizes = [512, 32], strides = [1, 1]} : vector<512x64xbf16> to vector<512x32xbf16>
    %cst_6 = arith.constant dense<0.000000e+00> : vector<512x32xf32>
    %11 = tpu.matmul %7, %10, %cst_6 {dimension_numbers = #tpu.dot_dimension_numbers<[1], [0], [0], [1], [0, 0, 1, 1], [], []>} : vector<512x512xbf16>, vector<512x32xbf16>, vector<512x32xf32> -> vector<512x32xf32>
    %c0_7 = arith.constant 0 : index
    %c0_8 = arith.constant 0 : index
    %12 = vector.load %arg11[%c0_7, %c0_8] : memref<512x64xf32, #tpu.memory_space<vmem>>, vector<512x64xf32>
    %13 = tpu.concatenate %9, %11 in 1 : vector<512x32xf32>, vector<512x32xf32> -> vector<512x64xf32>
    %14 = arith.addf %12, %13 : vector<512x64xf32>
    %c0_9 = arith.constant 0 : index
    %c0_10 = arith.constant 0 : index
    %15 = vector.load %arg11[%c0_9, %c0_10] : memref<512x64xf32, #tpu.memory_space<vmem>>, vector<512x64xf32>
    tpu.vector_store %arg11[%c0_9, %c0_10], %14 {strides = array<i32>} : memref<512x64xf32, #tpu.memory_space<vmem>>, vector<512x64xf32>,
    %c1_i32 = arith.constant 1 : i32
    %16 = arith.cmpi eq, %arg1, %c1_i32 : i32
    %17 = arith.extui %16 : i1 to i32
    %c0_i32_11 = arith.constant 0 : i32
    %18 = arith.cmpi ne, %17, %c0_i32_11 : i32
    scf.if %18 {
      %c0_12 = arith.constant 0 : index
      %c0_13 = arith.constant 0 : index
      %19 = vector.load %arg11[%c0_12, %c0_13] : memref<512x64xf32, #tpu.memory_space<vmem>>, vector<512x64xf32>
      %c0_14 = arith.constant 0 : index
      %c0_15 = arith.constant 0 : index
      %20 = vector.load %arg6[%c0_14, %c0_15] : memref<512x64xf32, #tpu.memory_space<vmem>>, vector<512x64xf32>
      %21 = arith.mulf %19, %20 : vector<512x64xf32>
      %22 = arith.truncf %21 : vector<512x64xf32> to vector<512x64xbf16>
      %c0_16 = arith.constant 0 : index
      %c0_17 = arith.constant 0 : index
      %23 = vector.load %arg7[%c0_16, %c0_17] : memref<64x128xbf16, #tpu.memory_space<vmem>>, vector<64x128xbf16>
      %cst_18 = arith.constant dense<0.000000e+00> : vector<512x128xf32>
      %24 = tpu.matmul %22, %23, %cst_18 {dimension_numbers = #tpu.dot_dimension_numbers<[1], [0], [0], [1], [0, 0, 1, 1], [], []>} : vector<512x64xbf16>, vector<64x128xbf16>, vector<512x128xf32> -> vector<512x128xf32>
      %c0_19 = arith.constant 0 : index
      %c0_20 = arith.constant 0 : index
      %25 = vector.load %arg3[%c0_19, %c0_20] : memref<512x32xbf16, #tpu.memory_space<vmem>>, vector<512x32xbf16>
      %c0_21 = arith.constant 0 : index
      %c0_22 = arith.constant 0 : index
      %26 = vector.load %arg8[%c0_21, %c0_22] : memref<32x128xbf16, #tpu.memory_space<vmem>>, vector<32x128xbf16>
      %cst_23 = arith.constant dense<0.000000e+00> : vector<512x128xf32>
      %27 = tpu.matmul %25, %26, %cst_23 {dimension_numbers = #tpu.dot_dimension_numbers<[1], [0], [0], [1], [0, 0, 1, 1], [], []>} : vector<512x32xbf16>, vector<32x128xbf16>, vector<512x128xf32> -> vector<512x128xf32>
      %28 = arith.addf %24, %27 : vector<512x128xf32>
      %c0_24 = arith.constant 0 : index
      %c0_25 = arith.constant 0 : index
      %29 = vector.load %arg9[%c0_24, %c0_25] : memref<1x128xf32, #tpu.memory_space<vmem>>, vector<1x128xf32>
      %30 = vector.broadcast %29 : vector<1x128xf32> to vector<512x128xf32>
      %31 = arith.addf %28, %30 : vector<512x128xf32>
      %c0_26 = arith.constant 0 : index
      %c0_27 = arith.constant 0 : index
      %32 = vector.load %arg10[%c0_26, %c0_27] : memref<512x128xf32, #tpu.memory_space<vmem>>, vector<512x128xf32>
      tpu.vector_store %arg10[%c0_26, %c0_27], %31 {strides = array<i32>} : memref<512x128xf32, #tpu.memory_space<vmem>>, vector<512x128xf32>,
    } else {
    }
    return
  }
  func.func @transform_0(%arg0: i32, %arg1: i32) -> (i32, i32) {
    %c0_i32 = arith.constant 0 : i32
    %c0_i32_0 = arith.constant 0 : i32
    return %arg1, %c0_i32 : i32, i32
  }
  func.func @transform_1(%arg0: i32, %arg1: i32) -> (i32, i32) {
    %c0_i32 = arith.constant 0 : i32
    %c0_i32_0 = arith.constant 0 : i32
    return %arg0, %c0_i32 : i32, i32
  }
  func.func @transform_2(%arg0: i32, %arg1: i32) -> (i32, i32) {
    %c0_i32 = arith.constant 0 : i32
    return %arg0, %arg1 : i32, i32
  }
  func.func @transform_3(%arg0: i32, %arg1: i32) -> (i32, i32) {
    %c0_i32 = arith.constant 0 : i32
    return %arg0, %arg1 : i32, i32
  }
  func.func @transform_4(%arg0: i32, %arg1: i32) -> (i32, i32) {
    %c0_i32 = arith.constant 0 : i32
    %c0_i32_0 = arith.constant 0 : i32
    return %arg0, %c0_i32 : i32, i32
  }
  func.func @transform_5(%arg0: i32, %arg1: i32) -> (i32, i32) {
    %c0_i32 = arith.constant 0 : i32
    %c0_i32_0 = arith.constant 0 : i32
    %c0_i32_1 = arith.constant 0 : i32
    return %c0_i32, %c0_i32_0 : i32, i32
  }
  func.func @transform_6(%arg0: i32, %arg1: i32) -> (i32, i32) {
    %c0_i32 = arith.constant 0 : i32
    %c0_i32_0 = arith.constant 0 : i32
    %c0_i32_1 = arith.constant 0 : i32
    return %c0_i32, %c0_i32_0 : i32, i32
  }
  func.func @transform_7(%arg0: i32, %arg1: i32) -> (i32, i32) {
    %c0_i32 = arith.constant 0 : i32
    %c0_i32_0 = arith.constant 0 : i32
    %c0_i32_1 = arith.constant 0 : i32
    return %c0_i32, %c0_i32_0 : i32, i32
  }
  func.func @transform_8(%arg0: i32, %arg1: i32) -> (i32, i32) {
    %c0_i32 = arith.constant 0 : i32
    %c0_i32_0 = arith.constant 0 : i32
    return %arg0, %c0_i32 : i32, i32
  }
}

</mosaic_0001>

<bundles_post_ra>
// kernel: tpu_custom_call.1
= control target key start
LH: loop header
LB: loop body
LE: loop exit
PB: predicated region body
PF: predicated region fallthrough
CT: control target
= control target key end

     0   :  { %s7172_s0 = inlined_call_operand.vmem [shape: bf16[1024,64], index: 0, kind: input, shape index: {}]   ;;  %s7173_s1 = inlined_call_operand.vmem [shape: bf16[1024,32], index: 1, kind: input, shape index: {}]   ;;  %s7174_s2 = inlined_call_operand.vmem [shape: s8[1024,1024], index: 2, kind: input, shape index: {}]   ;;  %s7175_s3 = inlined_call_operand.hbm [shape: s8[1024,1024], index: 3, kind: input, shape index: {}]   ;;  %s7176_s4 = inlined_call_operand.vmem [shape: f32[1024,64], index: 4, kind: input, shape index: {}]   ;;  %s7177_s5 = inlined_call_operand.vmem [shape: bf16[64,128], index: 5, kind: input, shape index: {}]   ;;  %s7178_s6 = inlined_call_operand.vmem [shape: bf16[32,128], index: 6, kind: input, shape index: {}]   ;;  %s7179_s7 = inlined_call_operand.vmem [shape: f32[1,128], index: 7, kind: input, shape index: {}]   ;;  %s7180_s8 = inlined_call_operand.hbm [shape: f32[1024,128], index: 8, kind: output, shape index: {}]  }
   0x1   :  { %7190 = sst [smem:[#allocation26_spill]] %s7174_s2 }
   0x2   :  { %7191 = sst [smem:[#allocation27_spill]] %s7175_s3 }
   0x3   :  { %7192 = sst [smem:[#allocation28_spill]] %s7179_s7 }
   0x4   :  { %7193 = sst [smem:[#allocation29_spill]] %s7180_s8 }
   0x5   :  { %13 = vsyncpa [#allocation5], 0 }
   0x6   :  { %15 = vsyncpa [#allocation5 + $0x1], 0 }
   0x7   :  { %16 = vsyncpa [#allocation6], 0 }
   0x8   :  { %18 = vsyncpa [#allocation6 + $0x1], 0  ;;  %s5705_s27 = smov 0   ;;  %s5707_s28 = smov 0  }
   0x9   :  { %s5709_s29 = smov 0   ;;  %s5711_s30 = smov 0  }
   0xa   :  { %s5713_s9 = smov 0   ;;  %s5715_s10 = smov 0  }
   0xb   :  { %s5717_s11 = smov 0   ;;  %s5719_s12 = smov 0  }
   0xc   :  { %s5721_s13 = smov 0   ;;  %s5723_s14 = smov 0  }
   0xd   :  { %s5725_s15 = smov 0  }
   0xe LB: > { %7194 = sst [smem:[#allocation10_spill]] %s5615_s29  ;;  %s4622_s16 = sadd.s32 4294967295, %s5647_s15   ;;  %s5647_s15 = sphi %s5725_s15, %s24_s15   ;;  %s5643_s14 = sphi %s5723_s14, %s7237_s14   ;;  %s5639_s13 = sphi %s5721_s13, %s7236_s13   ;;  %s5635_s12 = sphi %s5719_s12, %s7235_s12   ;;  %s5631_s11 = sphi %s5717_s11, %s7234_s11   ;;  %s5627_s10 = sphi %s5715_s10, %s7233_s10   ;;  %s5623_s9 = sphi %s5713_s9, %s7242_s9   ;;  %s5619_s30 = sphi %s5711_s30, %s7241_s30   ;;  %s5615_s29 = sphi %s5709_s29, %s7240_s29   ;;  %s5611_s28 = sphi %s5707_s28, %s7239_s28   ;;  %s5607_s27 = sphi %s5705_s27, %s7238_s27  }
   0xf   : > { %7195 = sst [smem:[#allocation11_spill]] %s5627_s10  ;;  %s4623_s17 = sadd.s32 4294967294, %s5647_s15  }
  0x10   : > { %7196 = sst [smem:[#allocation12_spill]] %s5639_s13  ;;  %s33_s18 = sadd.s32 1, %s5639_s13 }
  0x11   : > { %7197 = sst [smem:[#allocation13_spill]] %s5643_s14  ;;  %s36_s19 = sadd.s32 1, %s5643_s14 }
  0x12   : > { %p34_p0 = scmp.ge.s32.totalorder %s33_s18, 2  ;;  %s97_s20 = sadd.s32 1, %s5627_s10 }
  0x13   : > { %p104_p1 = scmp.ne.s32.totalorder %s5627_s10, %s5623_s9  ;;  %p105_p2 = scmp.eq.s32.totalorder %s5647_s15, 0 }
  0x14   : > { %s7244_s18 = smov (%p34_p0, %s33_s18), 0  ;;  %s7246_s19 = smov (!%p34_p0, %s36_s19), %s5643_s14 }
  0x15   : > { %7198 = sst [smem:[#allocation14_spill]] %s7244_s18  ;;  %s93_s21 = ssub.s32 %s5639_s13, %s7244_s18 }
  0x16   : > { %p5771_p3 = por %p105_p2, %p104_p1  ;;  %p38_p4 = scmp.ge.s32.totalorder %s7246_s19, 2 }
  0x17   : > { %p138_p5 = scmp.ne.s32.totalorder %s5623_s9, %s5619_s30  ;;  %p139_p6 = scmp.eq.s32.totalorder %s4622_s16, 0 }
  0x18   : > { %s240_s23 = sadd.s32 1, %s5615_s29  ;;  %s7248_s19 = smov (%p38_p4, %s7246_s19), 0 }
  0x19   : > { %7200 = sst [smem:[#allocation15_spill]] %s7248_s19  ;;  %p5779_p7 = por %p139_p6, %p138_p5 }
  0x1a   : > { %p250_p8 = scmp.ne.s32.totalorder %s5615_s29, %s5611_s28  ;;  %s92_s25 = ssub.s32 %s5643_s14, %s7248_s19 }
  0x1b   : > { %p251_p9 = scmp.eq.s32.totalorder %s4622_s16, 3  ;;  %s94_s26 = sor.u32 %s93_s21, %s92_s25 }
  0x1c   : > { %p238_p10 = scmp.eq.s32.totalorder %s92_s25, 0  ;;  %p95_p11 = scmp.eq.s32.totalorder %s94_s26, 0 }
  0x1d   : > { %p5787_p12 = por %p251_p9, %p250_p8  ;;  %p256_p13 = scmp.ne.s32.totalorder %s5611_s28, %s5607_s27 }
  0x1e   : > { %s5792_s30 = scalar_select %p238_p10, %s5615_s29, %s240_s23  }
  0x1f   : > { %s7202_s18 = scalar_select %p5787_p12, 1, 0 }
  0x20   : > { %7203 = sst [smem:[#allocation16_spill]] %s5792_s30  ;;  %p257_p0 = scmp.eq.s32.totalorder %s4623_s17, 3 }
  0x21   : > { %s5795_s8 = scalar_select %p95_p11, %s5627_s10, %s97_s20  }
  0x22   : > { %p5799_p1 = por %p257_p0, %p256_p13  ;;  %p4625_p2 = scmp.ge.s32.totalorder %s5647_s15, 4 }
  0x23   : > { %7204 = sst [smem:[#allocation17_spill]] %s5795_s8 }
  0x24   : > { %s7205_s7 = scalar_select %p5799_p1, 1, 0 }
  0x25   : > { %282 = sbr.rel (%p4625_p2) target bundleno = 120 (0x78), region = 28 }
  0x2c   : > { %303 = sbr.rel (!%p5771_p3) target bundleno = 86 (0x56), region = 40  ;;  %s305_s16 = sand.u32 (%p5771_p3), 1, %s5627_s10  }
  0x2d   : > { %s4628_s21 = sshll.u32 (%p5771_p3), %s5639_s13, 2  ;;  %s4626_s23 = sshll.u32 (%p5771_p3), %s305_s16, 9 }
  0x2e   : > { %s4788_s20 = sshll.u32 (%p5771_p3), %s5643_s14, 7  ;;  %s7206_s2 = sld [smem:[#allocation26_spill]] (%p5771_p3) }
  0x2f   : > { %s311_s25 = sadd.s32 (%p5771_p3), %s4788_s20, %s4628_s21  ;;  %s5817_s16 = scalar_lea.vmem (%p5771_p3), [#allocation3], %s4626_s23 }
  0x30   : > { %s4630_s26 = sshll.u32 (%p5771_p3), %s311_s25, 3 }
  0x34   : > { %s5812_s8 = scalar_lea.vmem %s7206_s2, %s4630_s26 }
  0x35   : > { %v326_v0 = vld [vmem:[%s5812_s8] sm:$0xff]  ;;  %v328_v1 = vld [vmem:[%s5812_s8 + $0x8] sm:$0xff]  ;;  %v330_v2 = vld [vmem:[%s5812_s8 + $0x10] sm:$0xff] }
  0x36   : > { %327 = vst [vmem:[%s5817_s16] sm:$0xff] %v326_v0  ;;  %329 = vst [vmem:[%s5817_s16 + $0x8] sm:$0xff] %v328_v1  ;;  %v332_v3 = vld [vmem:[%s5812_s8 + $0x18] sm:$0xff]  ;;  %v334_v4 = vld [vmem:[%s5812_s8 + $0x40] sm:$0xff] }
  0x37   : > { %331 = vst [vmem:[%s5817_s16 + $0x10] sm:$0xff] %v330_v2  ;;  %v336_v5 = vld [vmem:[%s5812_s8 + $0x48] sm:$0xff]  ;;  %333 = vst [vmem:[%s5817_s16 + $0x18] sm:$0xff] %v332_v3  ;;  %v338_v6 = vld [vmem:[%s5812_s8 + $0x50] sm:$0xff] }
  0x38   : > { %335 = vst [vmem:[%s5817_s16 + $0x20] sm:$0xff] %v334_v4  ;;  %337 = vst [vmem:[%s5817_s16 + $0x28] sm:$0xff] %v336_v5  ;;  %v340_v7 = vld [vmem:[%s5812_s8 + $0x58] sm:$0xff]  ;;  %v342_v8 = vld [vmem:[%s5812_s8 + $0x80] sm:$0xff] }
  0x39   : > { %339 = vst [vmem:[%s5817_s16 + $0x30] sm:$0xff] %v338_v6  ;;  %341 = vst [vmem:[%s5817_s16 + $0x38] sm:$0xff] %v340_v7  ;;  %v344_v9 = vld [vmem:[%s5812_s8 + $0x88] sm:$0xff]  ;;  %v346_v10 = vld [vmem:[%s5812_s8 + $0x90] sm:$0xff] }
  0x3a   : > { %343 = vst [vmem:[%s5817_s16 + $0x40] sm:$0xff] %v342_v8  ;;  %v348_v11 = vld [vmem:[%s5812_s8 + $0x98] sm:$0xff]  ;;  %345 = vst [vmem:[%s5817_s16 + $0x48] sm:$0xff] %v344_v9  ;;  %v350_v12 = vld [vmem:[%s5812_s8 + $0xc0] sm:$0xff] }
  0x3b   : > { %347 = vst [vmem:[%s5817_s16 + $0x50] sm:$0xff] %v346_v10  ;;  %349 = vst [vmem:[%s5817_s16 + $0x58] sm:$0xff] %v348_v11  ;;  %v352_v13 = vld [vmem:[%s5812_s8 + $0xc8] sm:$0xff]  ;;  %v354_v14 = vld [vmem:[%s5812_s8 + $0xd0] sm:$0xff] }
  0x3c   : > { %351 = vst [vmem:[%s5817_s16 + $0x60] sm:$0xff] %v350_v12  ;;  %353 = vst [vmem:[%s5817_s16 + $0x68] sm:$0xff] %v352_v13  ;;  %v356_v15 = vld [vmem:[%s5812_s8 + $0xd8] sm:$0xff]  ;;  %v358_v16 = vld [vmem:[%s5812_s8 + $0x100] sm:$0xff] }
  0x3d   : > { %355 = vst [vmem:[%s5817_s16 + $0x70] sm:$0xff] %v354_v14  ;;  %v360_v17 = vld [vmem:[%s5812_s8 + $0x108] sm:$0xff]  ;;  %357 = vst [vmem:[%s5817_s16 + $0x78] sm:$0xff] %v356_v15  ;;  %v362_v18 = vld [vmem:[%s5812_s8 + $0x110] sm:$0xff] }
  0x3e   : > { %359 = vst [vmem:[%s5817_s16 + $0x80] sm:$0xff] %v358_v16  ;;  %361 = vst [vmem:[%s5817_s16 + $0x88] sm:$0xff] %v360_v17  ;;  %v364_v19 = vld [vmem:[%s5812_s8 + $0x118] sm:$0xff]  ;;  %v366_v20 = vld [vmem:[%s5812_s8 + $0x140] sm:$0xff] }
  0x3f   : > { %363 = vst [vmem:[%s5817_s16 + $0x90] sm:$0xff] %v362_v18  ;;  %365 = vst [vmem:[%s5817_s16 + $0x98] sm:$0xff] %v364_v19  ;;  %v368_v21 = vld [vmem:[%s5812_s8 + $0x148] sm:$0xff]  ;;  %v370_v22 = vld [vmem:[%s5812_s8 + $0x150] sm:$0xff] }
  0x40   : > { %367 = vst [vmem:[%s5817_s16 + $0xa0] sm:$0xff] %v366_v20  ;;  %v372_v23 = vld [vmem:[%s5812_s8 + $0x158] sm:$0xff]  ;;  %369 = vst [vmem:[%s5817_s16 + $0xa8] sm:$0xff] %v368_v21  ;;  %v374_v24 = vld [vmem:[%s5812_s8 + $0x180] sm:$0xff] }
  0x41   : > { %371 = vst [vmem:[%s5817_s16 + $0xb0] sm:$0xff] %v370_v22  ;;  %373 = vst [vmem:[%s5817_s16 + $0xb8] sm:$0xff] %v372_v23  ;;  %v376_v25 = vld [vmem:[%s5812_s8 + $0x188] sm:$0xff]  ;;  %v378_v26 = vld [vmem:[%s5812_s8 + $0x190] sm:$0xff] }
  0x42   : > { %375 = vst [vmem:[%s5817_s16 + $0xc0] sm:$0xff] %v374_v24  ;;  %377 = vst [vmem:[%s5817_s16 + $0xc8] sm:$0xff] %v376_v25  ;;  %v380_v27 = vld [vmem:[%s5812_s8 + $0x198] sm:$0xff]  ;;  %v382_v28 = vld [vmem:[%s5812_s8 + $0x1c0] sm:$0xff] }
  0x43   : > { %379 = vst [vmem:[%s5817_s16 + $0xd0] sm:$0xff] %v378_v26  ;;  %v384_v29 = vld [vmem:[%s5812_s8 + $0x1c8] sm:$0xff]  ;;  %381 = vst [vmem:[%s5817_s16 + $0xd8] sm:$0xff] %v380_v27  ;;  %v386_v30 = vld [vmem:[%s5812_s8 + $0x1d0] sm:$0xff] }
  0x44   : > { %383 = vst [vmem:[%s5817_s16 + $0xe0] sm:$0xff] %v382_v28  ;;  %385 = vst [vmem:[%s5817_s16 + $0xe8] sm:$0xff] %v384_v29  ;;  %v388_v31 = vld [vmem:[%s5812_s8 + $0x1d8] sm:$0xff]  ;;  %v390_v32 = vld [vmem:[%s5812_s8 + $0x200] sm:$0xff] }
  0x45   : > { %387 = vst [vmem:[%s5817_s16 + $0xf0] sm:$0xff] %v386_v30  ;;  %389 = vst [vmem:[%s5817_s16 + $0xf8] sm:$0xff] %v388_v31  ;;  %v392_v33 = vld [vmem:[%s5812_s8 + $0x208] sm:$0xff]  ;;  %v394_v34 = vld [vmem:[%s5812_s8 + $0x210] sm:$0xff] }
  0x46   : > { %391 = vst [vmem:[%s5817_s16 + $0x100] sm:$0xff] %v390_v32  ;;  %v396_v35 = vld [vmem:[%s5812_s8 + $0x218] sm:$0xff]  ;;  %393 = vst [vmem:[%s5817_s16 + $0x108] sm:$0xff] %v392_v33  ;;  %v398_v36 = vld [vmem:[%s5812_s8 + $0x240] sm:$0xff] }
  0x47   : > { %395 = vst [vmem:[%s5817_s16 + $0x110] sm:$0xff] %v394_v34  ;;  %397 = vst [vmem:[%s5817_s16 + $0x118] sm:$0xff] %v396_v35  ;;  %v400_v37 = vld [vmem:[%s5812_s8 + $0x248] sm:$0xff]  ;;  %v402_v38 = vld [vmem:[%s5812_s8 + $0x250] sm:$0xff] }
  0x48   : > { %399 = vst [vmem:[%s5817_s16 + $0x120] sm:$0xff] %v398_v36  ;;  %401 = vst [vmem:[%s5817_s16 + $0x128] sm:$0xff] %v400_v37  ;;  %v404_v39 = vld [vmem:[%s5812_s8 + $0x258] sm:$0xff]  ;;  %v406_v40 = vld [vmem:[%s5812_s8 + $0x280] sm:$0xff] }
  0x49   : > { %403 = vst [vmem:[%s5817_s16 + $0x130] sm:$0xff] %v402_v38  ;;  %v408_v41 = vld [vmem:[%s5812_s8 + $0x288] sm:$0xff]  ;;  %405 = vst [vmem:[%s5817_s16 + $0x138] sm:$0xff] %v404_v39  ;;  %v410_v42 = vld [vmem:[%s5812_s8 + $0x290] sm:$0xff] }
  0x4a   : > { %407 = vst [vmem:[%s5817_s16 + $0x140] sm:$0xff] %v406_v40  ;;  %409 = vst [vmem:[%s5817_s16 + $0x148] sm:$0xff] %v408_v41  ;;  %v412_v43 = vld [vmem:[%s5812_s8 + $0x298] sm:$0xff]  ;;  %v414_v44 = vld [vmem:[%s5812_s8 + $0x2c0] sm:$0xff] }
  0x4b   : > { %411 = vst [vmem:[%s5817_s16 + $0x150] sm:$0xff] %v410_v42  ;;  %413 = vst [vmem:[%s5817_s16 + $0x158] sm:$0xff] %v412_v43  ;;  %v416_v45 = vld [vmem:[%s5812_s8 + $0x2c8] sm:$0xff]  ;;  %v418_v46 = vld [vmem:[%s5812_s8 + $0x2d0] sm:$0xff] }
  0x4c   : > { %415 = vst [vmem:[%s5817_s16 + $0x160] sm:$0xff] %v414_v44  ;;  %v420_v47 = vld [vmem:[%s5812_s8 + $0x2d8] sm:$0xff]  ;;  %417 = vst [vmem:[%s5817_s16 + $0x168] sm:$0xff] %v416_v45  ;;  %v422_v48 = vld [vmem:[%s5812_s8 + $0x300] sm:$0xff] }
  0x4d   : > { %419 = vst [vmem:[%s5817_s16 + $0x170] sm:$0xff] %v418_v46  ;;  %421 = vst [vmem:[%s5817_s16 + $0x178] sm:$0xff] %v420_v47  ;;  %v424_v49 = vld [vmem:[%s5812_s8 + $0x308] sm:$0xff]  ;;  %v426_v50 = vld [vmem:[%s5812_s8 + $0x310] sm:$0xff] }
  0x4e   : > { %423 = vst [vmem:[%s5817_s16 + $0x180] sm:$0xff] %v422_v48  ;;  %425 = vst [vmem:[%s5817_s16 + $0x188] sm:$0xff] %v424_v49  ;;  %v428_v51 = vld [vmem:[%s5812_s8 + $0x318] sm:$0xff]  ;;  %v430_v52 = vld [vmem:[%s5812_s8 + $0x340] sm:$0xff] }
  0x4f   : > { %427 = vst [vmem:[%s5817_s16 + $0x190] sm:$0xff] %v426_v50  ;;  %v432_v53 = vld [vmem:[%s5812_s8 + $0x348] sm:$0xff]  ;;  %429 = vst [vmem:[%s5817_s16 + $0x198] sm:$0xff] %v428_v51  ;;  %v434_v54 = vld [vmem:[%s5812_s8 + $0x350] sm:$0xff] }
  0x50   : > { %431 = vst [vmem:[%s5817_s16 + $0x1a0] sm:$0xff] %v430_v52  ;;  %433 = vst [vmem:[%s5817_s16 + $0x1a8] sm:$0xff] %v432_v53  ;;  %v436_v55 = vld [vmem:[%s5812_s8 + $0x358] sm:$0xff]  ;;  %v438_v56 = vld [vmem:[%s5812_s8 + $0x380] sm:$0xff] }
  0x51   : > { %435 = vst [vmem:[%s5817_s16 + $0x1b0] sm:$0xff] %v434_v54  ;;  %437 = vst [vmem:[%s5817_s16 + $0x1b8] sm:$0xff] %v436_v55  ;;  %v440_v57 = vld [vmem:[%s5812_s8 + $0x388] sm:$0xff]  ;;  %v442_v58 = vld [vmem:[%s5812_s8 + $0x390] sm:$0xff] }
  0x52   : > { %439 = vst [vmem:[%s5817_s16 + $0x1c0] sm:$0xff] %v438_v56  ;;  %v444_v59 = vld [vmem:[%s5812_s8 + $0x398] sm:$0xff]  ;;  %441 = vst [vmem:[%s5817_s16 + $0x1c8] sm:$0xff] %v440_v57  ;;  %v446_v60 = vld [vmem:[%s5812_s8 + $0x3c0] sm:$0xff] }
  0x53   : > { %443 = vst [vmem:[%s5817_s16 + $0x1d0] sm:$0xff] %v442_v58  ;;  %445 = vst [vmem:[%s5817_s16 + $0x1d8] sm:$0xff] %v444_v59  ;;  %v448_v61 = vld [vmem:[%s5812_s8 + $0x3c8] sm:$0xff]  ;;  %v450_v62 = vld [vmem:[%s5812_s8 + $0x3d0] sm:$0xff] }
  0x54   : > { %447 = vst [vmem:[%s5817_s16 + $0x1e0] sm:$0xff] %v446_v60  ;;  %449 = vst [vmem:[%s5817_s16 + $0x1e8] sm:$0xff] %v448_v61  ;;  %v452_v63 = vld [vmem:[%s5812_s8 + $0x3d8] sm:$0xff] }
  0x55   : > { %451 = vst [vmem:[%s5817_s16 + $0x1f0] sm:$0xff] %v450_v62  ;;  %453 = vst [vmem:[%s5817_s16 + $0x1f8] sm:$0xff] %v452_v63 }
  0x56 PF: > { %s460_s19 = sand.u32 1, %s5627_s10   ;;  %s4633_s21 = sshll.u32 %s5639_s13, 2 }
  0x57   : > { %s4631_s23 = sshll.u32 %s460_s19, 9  ;;  %s4789_s20 = sshll.u32 %s5643_s14, 7 }
  0x58   : > { %s471_s25 = sadd.s32 %s4789_s20, %s4633_s21  ;;  %s464_s26 = scalar_lea.vmem [#allocation4], %s4631_s23 }
  0x59   : > { %s474_s17 = sshll.u32 %s464_s26, 4  ;;  %s4635_s2 = sshll.u32 %s471_s25, 7  ;;  %s5947_s17 = int_to_ptr.vmem [resolvable:$true] %s474_s17 }
  0x5a   : > { %s7207_s3 = sld [smem:[#allocation27_spill]]  ;;  %s5954_s16 = scalar_lea.sflag [#allocation5], %s460_s19 }
  0x60   : > { %s5952_s8 = scalar_lea.hbm %s7207_s3, %s4635_s2  ;;  %s5501_s20 = scalar_lea.hbm %s7207_s3, 32768 }
  0x61   : > { %s5497_s13 = scalar_lea.hbm %s5952_s8, 8192  ;;  %p5502_p8 = scmp.lt.u32.totalorder %s5952_s8, %s7207_s3 }
  0x62   : > { %p5498_p4 = scmp.ne.s32.totalorder %s5952_s8, %s5497_s13  ;;  %p5503_p9 = scmp.lt.u32.totalorder %s5501_s20, %s5497_s13 }
  0x63   : > { %p5505_p11 = scmp.lt.u32.totalorder %s5497_s13, %s5952_s8 }
  0x64   : > { %p5499_p5 = pnand %p5498_p4, %p5771_p3  ;;  %p5504_p10 = por %p5503_p9, %p5502_p8 }
  0x66   : > { %p5500_p6 = pneg %p5499_p5  ;;  %p5506_p13 = por %p5505_p11, %p5504_p10 }
  0x68   : > { %p5507_p0 = pnand %p5506_p13, %p5500_p6 }
  0x6a   : > { %5510 = shalt.err (!%p5507_p0)
}
  0x6b   : > { %s5511_s2 = scalar_lea.vmem %s5947_s17, 8192  ;;  %s5649_s29 = smov [#allocation4]  }
  0x6c   : > { %p5512_p2 = scmp.ne.s32.totalorder %s5947_s17, %s5511_s2  ;;  %s5515_s30 = sshll.u32 %s5649_s29, 4  ;;  %s5516_s30 = int_to_ptr.vmem [resolvable:$false] %s5515_s30 }
  0x6d   : > { %s5517_s19 = scalar_lea.vmem %s5516_s30, 16384  ;;  %p5518_p1 = scmp.lt.s32.totalorder %s5947_s17, %s5516_s30 }
  0x6e   : > { %p5513_p4 = pnand %p5512_p2, %p5771_p3  ;;  %p5519_p12 = scmp.lt.s32.totalorder %s5517_s19, %s5511_s2 }
  0x70   : > { %p5514_p5 = pneg %p5513_p4  ;;  %p5520_p8 = por %p5519_p12, %p5518_p1 }
  0x72   : > { %p5521_p9 = pnand %p5520_p8, %p5514_p5 }
  0x74   : > { %5524 = shalt.err (!%p5521_p9)
}
  0x75   : > { %s5650_s13 = smov 1024   ;;  %s5651_s21 = smov 512  }
  0x76   : > { %s5652_s23 = smov 32  }
  0x77   : > { %5321 = dma.hbm_to_vmem [thread:$0]  (%p5771_p3), %s5952_s8, 8192, %s5947_s17, %s5954_s16, %s5650_s13, %s5651_s21, %s5652_s23  }
  0x78 PF: > { %p4636_p6 = scmp.ge.s32.totalorder %s5647_s15, 1  ;;  %p491_p10 = scmp.lt.s32.totalorder %s5647_s15, 5 }
  0x7a   : > { %p492_p11 = pnand %p4636_p6, %p491_p10 }
  0x7c   : > { %495 = sbr.rel (%p492_p11) target bundleno = 1565 (0x61d), region = 71 }
  0x83   : > { %s498_s20 = sand.u32 1, %s5623_s9  }
  0x84   : > { %s4637_s25 = sshll.u32 %s498_s20, 9  ;;  %s505_s2 = scalar_lea.sflag [#allocation5], %s498_s20 }
  0x85   : > { %s5981_s26 = scalar_lea.vmem [#allocation3], %s4637_s25  ;;  %s5983_s29 = scalar_lea.vmem [#allocation4], %s4637_s25 }
  0x86   : > { %5598 = dma.done.wait (%p5779_p7), %s505_s2, 8192  }
  0x87   : > { %5600 = vsyncadd (%p5779_p7), %s505_s2, 4294959104  ;;  %s7187_s22 = sand.u32 1, %s5611_s28   ;;  %s4640_s17 = sshll.u32 %s5631_s11, 6 }
  0x88   : > { %s4639_s8 = sshll.u32 %s7187_s22, 9  ;;  %p561_p3 = scmp.lt.s32.totalorder %s4640_s17, 127 }
  0x89   : > { %s4642_s16 = sshll.u32 %s5635_s12, 6  ;;  %s6009_s10 = scalar_lea.vmem [#allocation7], %s4639_s8 }
  0x8a   : > { %s7250_s17 = smov (!%p561_p3, %s4640_s17), 127  ;;  %p567_p12 = scmp.lt.s32.totalorder %s4642_s16, 127 }
  0x8b   : > { %s4641_s30 = sshll.u32 %s7250_s17, 2  ;;  %p4646_p7 = scmp.ne.s32.totalorder %s5631_s11, 0 }
  0x8c   : > { %s5997_s21 = scalar_lea.vmem %s7172_s0, %s4641_s30  ;;  %s7252_s16 = smov (!%p567_p12, %s4642_s16), 127  ;;  %vm588_vm0 = vcmask (!%p4646_p7), 523264   ;;  %v5653_v0 = vmov (!%p4646_p7), 0.0  }
  0x8d   : > { %s4643_s24 = sshll.u32 %s7252_s16, 2  ;;  %s4645_s23 = sshll.u32 %s7252_s16, 3  ;;  %589 = vst.msk [vmem:[#allocation2] sm:$0xff] (!%p4646_p7), %vm588_vm0, %v5653_v0  ;;  %590 = vst.msk [vmem:[#allocation2 + $0x8] sm:$0xff] (!%p4646_p7), %vm588_vm0, %v5653_v0 }
  0x8e   : > { %s6002_s2 = scalar_lea.vmem %s7173_s1, %s4643_s24  ;;  %s6007_s14 = scalar_lea.vmem %s7176_s4, %s4645_s23  ;;  %591 = vst.msk [vmem:[#allocation2 + $0x10] sm:$0xff] (!%p4646_p7), %vm588_vm0, %v5653_v0  ;;  %592 = vst.msk [vmem:[#allocation2 + $0x18] sm:$0xff] (!%p4646_p7), %vm588_vm0, %v5653_v0 }
  0x8f   : > { %587 = sbr.rel (%p4646_p7) target bundleno = 173 (0xad), region = 83  ;;  %593 = vst.msk [vmem:[#allocation2 + $0x20] sm:$0xff] (!%p4646_p7), %vm588_vm0, %v5653_v0  ;;  %594 = vst.msk [vmem:[#allocation2 + $0x28] sm:$0xff] (!%p4646_p7), %vm588_vm0, %v5653_v0 }
  0x90   : > { %595 = vst.msk [vmem:[#allocation2 + $0x30] sm:$0xff] (!%p4646_p7), %vm588_vm0, %v5653_v0  ;;  %596 = vst.msk [vmem:[#allocation2 + $0x38] sm:$0xff] (!%p4646_p7), %vm588_vm0, %v5653_v0 }
  0x91   : > { %597 = vst.msk [vmem:[#allocation2 + $0x40] sm:$0xff] (!%p4646_p7), %vm588_vm0, %v5653_v0  ;;  %598 = vst.msk [vmem:[#allocation2 + $0x48] sm:$0xff] (!%p4646_p7), %vm588_vm0, %v5653_v0 }
  0x92   : > { %599 = vst.msk [vmem:[#allocation2 + $0x50] sm:$0xff] (!%p4646_p7), %vm588_vm0, %v5653_v0  ;;  %600 = vst.msk [vmem:[#allocation2 + $0x58] sm:$0xff] (!%p4646_p7), %vm588_vm0, %v5653_v0 }
  0x93   : > { %601 = vst.msk [vmem:[#allocation2 + $0x60] sm:$0xff] (!%p4646_p7), %vm588_vm0, %v5653_v0  ;;  %602 = vst.msk [vmem:[#allocation2 + $0x68] sm:$0xff] (!%p4646_p7), %vm588_vm0, %v5653_v0 }
  0x94   : > { %603 = vst.msk [vmem:[#allocation2 + $0x70] sm:$0xff] (!%p4646_p7), %vm588_vm0, %v5653_v0  ;;  %604 = vst.msk [vmem:[#allocation2 + $0x78] sm:$0xff] (!%p4646_p7), %vm588_vm0, %v5653_v0 }
  0x95   : > { %605 = vst.msk [vmem:[#allocation2 + $0x80] sm:$0xff] (!%p4646_p7), %vm588_vm0, %v5653_v0  ;;  %606 = vst.msk [vmem:[#allocation2 + $0x88] sm:$0xff] (!%p4646_p7), %vm588_vm0, %v5653_v0 }
  0x96   : > { %607 = vst.msk [vmem:[#allocation2 + $0x90] sm:$0xff] %vm588_vm0, %v5653_v0  ;;  %608 = vst.msk [vmem:[#allocation2 + $0x98] sm:$0xff] %vm588_vm0, %v5653_v0 }
  0x97   : > { %609 = vst.msk [vmem:[#allocation2 + $0xa0] sm:$0xff] %vm588_vm0, %v5653_v0  ;;  %610 = vst.msk [vmem:[#allocation2 + $0xa8] sm:$0xff] %vm588_vm0, %v5653_v0 }
  0x98   : > { %611 = vst.msk [vmem:[#allocation2 + $0xb0] sm:$0xff] %vm588_vm0, %v5653_v0  ;;  %612 = vst.msk [vmem:[#allocation2 + $0xb8] sm:$0xff] %vm588_vm0, %v5653_v0 }
  0x99   : > { %613 = vst.msk [vmem:[#allocation2 + $0xc0] sm:$0xff] %vm588_vm0, %v5653_v0  ;;  %614 = vst.msk [vmem:[#allocation2 + $0xc8] sm:$0xff] %vm588_vm0, %v5653_v0 }
  0x9a   : > { %615 = vst.msk [vmem:[#allocation2 + $0xd0] sm:$0xff] %vm588_vm0, %v5653_v0  ;;  %616 = vst.msk [vmem:[#allocation2 + $0xd8] sm:$0xff] %vm588_vm0, %v5653_v0 }
  0x9b   : > { %617 = vst.msk [vmem:[#allocation2 + $0xe0] sm:$0xff] %vm588_vm0, %v5653_v0  ;;  %618 = vst.msk [vmem:[#allocation2 + $0xe8] sm:$0xff] %vm588_vm0, %v5653_v0 }
  0x9c   : > { %619 = vst.msk [vmem:[#allocation2 + $0xf0] sm:$0xff] %vm588_vm0, %v5653_v0  ;;  %620 = vst.msk [vmem:[#allocation2 + $0xf8] sm:$0xff] %vm588_vm0, %v5653_v0 }
  0x9d   : > { %621 = vst.msk [vmem:[#allocation2 + $0x100] sm:$0xff] %vm588_vm0, %v5653_v0  ;;  %622 = vst.msk [vmem:[#allocation2 + $0x108] sm:$0xff] %vm588_vm0, %v5653_v0 }
  0x9e   : > { %623 = vst.msk [vmem:[#allocation2 + $0x110] sm:$0xff] %vm588_vm0, %v5653_v0  ;;  %624 = vst.msk [vmem:[#allocation2 + $0x118] sm:$0xff] %vm588_vm0, %v5653_v0 }
  0x9f   : > { %625 = vst.msk [vmem:[#allocation2 + $0x120] sm:$0xff] %vm588_vm0, %v5653_v0  ;;  %626 = vst.msk [vmem:[#allocation2 + $0x128] sm:$0xff] %vm588_vm0, %v5653_v0 }
  0xa0   : > { %627 = vst.msk [vmem:[#allocation2 + $0x130] sm:$0xff] %vm588_vm0, %v5653_v0  ;;  %628 = vst.msk [vmem:[#allocation2 + $0x138] sm:$0xff] %vm588_vm0, %v5653_v0 }
  0xa1   : > { %629 = vst.msk [vmem:[#allocation2 + $0x140] sm:$0xff] %vm588_vm0, %v5653_v0  ;;  %630 = vst.msk [vmem:[#allocation2 + $0x148] sm:$0xff] %vm588_vm0, %v5653_v0 }
  0xa2   : > { %631 = vst.msk [vmem:[#allocation2 + $0x150] sm:$0xff] %vm588_vm0, %v5653_v0  ;;  %632 = vst.msk [vmem:[#allocation2 + $0x158] sm:$0xff] %vm588_vm0, %v5653_v0 }
  0xa3   : > { %633 = vst.msk [vmem:[#allocation2 + $0x160] sm:$0xff] %vm588_vm0, %v5653_v0  ;;  %634 = vst.msk [vmem:[#allocation2 + $0x168] sm:$0xff] %vm588_vm0, %v5653_v0 }
  0xa4   : > { %635 = vst.msk [vmem:[#allocation2 + $0x170] sm:$0xff] %vm588_vm0, %v5653_v0  ;;  %636 = vst.msk [vmem:[#allocation2 + $0x178] sm:$0xff] %vm588_vm0, %v5653_v0 }
  0xa5   : > { %637 = vst.msk [vmem:[#allocation2 + $0x180] sm:$0xff] %vm588_vm0, %v5653_v0  ;;  %638 = vst.msk [vmem:[#allocation2 + $0x188] sm:$0xff] %vm588_vm0, %v5653_v0 }
  0xa6   : > { %639 = vst.msk [vmem:[#allocation2 + $0x190] sm:$0xff] %vm588_vm0, %v5653_v0  ;;  %640 = vst.msk [vmem:[#allocation2 + $0x198] sm:$0xff] %vm588_vm0, %v5653_v0 }
  0xa7   : > { %641 = vst.msk [vmem:[#allocation2 + $0x1a0] sm:$0xff] %vm588_vm0, %v5653_v0  ;;  %642 = vst.msk [vmem:[#allocation2 + $0x1a8] sm:$0xff] %vm588_vm0, %v5653_v0 }
  0xa8   : > { %643 = vst.msk [vmem:[#allocation2 + $0x1b0] sm:$0xff] %vm588_vm0, %v5653_v0  ;;  %644 = vst.msk [vmem:[#allocation2 + $0x1b8] sm:$0xff] %vm588_vm0, %v5653_v0 }
  0xa9   : > { %645 = vst.msk [vmem:[#allocation2 + $0x1c0] sm:$0xff] %vm588_vm0, %v5653_v0  ;;  %646 = vst.msk [vmem:[#allocation2 + $0x1c8] sm:$0xff] %vm588_vm0, %v5653_v0 }
  0xaa   : > { %647 = vst.msk [vmem:[#allocation2 + $0x1d0] sm:$0xff] %vm588_vm0, %v5653_v0  ;;  %648 = vst.msk [vmem:[#allocation2 + $0x1d8] sm:$0xff] %vm588_vm0, %v5653_v0 }
  0xab   : > { %649 = vst.msk [vmem:[#allocation2 + $0x1e0] sm:$0xff] %vm588_vm0, %v5653_v0  ;;  %650 = vst.msk [vmem:[#allocation2 + $0x1e8] sm:$0xff] %vm588_vm0, %v5653_v0 }
  0xac   : > { %651 = vst.msk [vmem:[#allocation2 + $0x1f0] sm:$0xff] %vm588_vm0, %v5653_v0  ;;  %652 = vst.msk [vmem:[#allocation2 + $0x1f8] sm:$0xff] %vm588_vm0, %v5653_v0 }
  0xad PF: > { %v5427_v1 = vld [vmem:[%s5997_s21] sm:$0xff]   ;;  %v5654_v2 = vmov 0   ;;  %v5428_v3 = vld [vmem:[%s5997_s21 + $0x8] sm:$0xff]   ;;  %s5655_s3 = smov 96   ;;  %v5429_v4 = vld [vmem:[%s5997_s21 + $0x10] sm:$0xff]   ;;  %vm2865_vm1 = vcmask 261120  }
  0xae   : > { %1293 = vmatprep.subr.bf16.mxu0 %v5654_v2  ;;  %1967 = vmatprep.subr.bf16.mxu1 %v5654_v2  ;;  %v5430_v5 = vld [vmem:[%s5997_s21 + $0x18] sm:$0xff]   ;;  %v5431_v6 = vld [vmem:[%s5997_s21 + $0x20] sm:$0xff]   ;;  %v5432_v7 = vld [vmem:[%s5997_s21 + $0x28] sm:$0xff]   ;;  %vm2994_vm2 = vcmask 523264   ;;  %p4679_p1 = scmp.ne.s32.totalorder %s5631_s11, 1 }
  0xaf   : > { %1871 = vrot.lane.b32.xlu0 %v5427_v1, %s5655_s3  ;;  %1294 = vmatpush1.bf16.msra.mxu0 %v5427_v1  ;;  %v5433_v8 = vld [vmem:[%s5997_s21 + $0x30] sm:$0xff]   ;;  %v5434_v9 = vld [vmem:[%s5997_s21 + $0x38] sm:$0xff]   ;;  %v5435_v10 = vld [vmem:[%s5997_s21 + $0x40] sm:$0xff]   ;;  %s7224_s25 = sld [smem:[#allocation28_spill]] (!%p4679_p1) }
  0xb0   : > { %1295 = vmatprep.subr.bf16.mxu0 %v5654_v2  ;;  %1875 = vrot.lane.b32.xlu1 %v5429_v4, %s5655_s3  ;;  %v5436_v11 = vld [vmem:[%s5997_s21 + $0x48] sm:$0xff]   ;;  %v5437_v14 = vld [vmem:[%s5997_s21 + $0x50] sm:$0xff]   ;;  %v5438_v15 = vld [vmem:[%s5997_s21 + $0x58] sm:$0xff]  }
  0xb1   : > { %v6165_v12 = vld [vmem:[%s5981_s26 + $0x8] sm:$0xff]  ;;  %v5439_v16 = vld [vmem:[%s5997_s21 + $0x60] sm:$0xff]   ;;  %v5441_v18 = vld [vmem:[%s5997_s21 + $0x70] sm:$0xff]  }
  0xb2   : > { %v782_v13 = vunpack.c.l.s8.bf16 %v6165_v12  ;;  %v5440_v17 = vld [vmem:[%s5997_s21 + $0x68] sm:$0xff]   ;;  %v5442_v19 = vld [vmem:[%s5997_s21 + $0x78] sm:$0xff]   ;;  %v5443_v20 = vld [vmem:[%s5997_s21 + $0x80] sm:$0xff]   ;;  %v786_v32 = vunpack.c.h.s8.bf16 %v6165_v12 }
  0xb3   : > { %1873 = vrot.lane.b32.xlu0 %v5428_v3, %s5655_s3  ;;  %1296 = vmatpush1.bf16.msra.mxu0 %v5428_v3  ;;  %v5444_v21 = vld [vmem:[%s5997_s21 + $0x88] sm:$0xff]   ;;  %v5445_v22 = vld [vmem:[%s5997_s21 + $0x90] sm:$0xff]   ;;  %v5446_v23 = vld [vmem:[%s5997_s21 + $0x98] sm:$0xff]  }
  0xb4   : > { %1297 = vmatprep.subr.bf16.mxu0 %v5654_v2  ;;  %1877 = vrot.lane.b32.xlu1 %v5430_v5, %s5655_s3  ;;  %v5447_v24 = vld [vmem:[%s5997_s21 + $0xa0] sm:$0xff]   ;;  %v5448_v25 = vld [vmem:[%s5997_s21 + $0xa8] sm:$0xff]   ;;  %v5449_v26 = vld [vmem:[%s5997_s21 + $0xb0] sm:$0xff]  }
  0xb5   : > { %1325 = vmatprep.mubr.bf16.mxu0 %v782_v13  ;;  %v6205_v27 = vld [vmem:[%s5983_s29 + $0x8] sm:$0xff]  ;;  %v5450_v28 = vld [vmem:[%s5997_s21 + $0xb8] sm:$0xff]   ;;  %v717_v30 = vld [vmem:[%s5981_s26] sm:$0xff] }
  0xb6   : > { %v974_v29 = vunpack.c.l.s8.bf16 %v6205_v27  ;;  %v781_v31 = vunpack.c.l.s8.bf16 %v717_v30  ;;  %v5451_v33 = vld [vmem:[%s5997_s21 + $0xc0] sm:$0xff]   ;;  %v722_v34 = vld [vmem:[%s5981_s26 + $0x28] sm:$0xff]  ;;  %v785_v35 = vunpack.c.h.s8.bf16 %v717_v30  ;;  %v5453_v47 = vld [vmem:[%s5997_s21 + $0xd0] sm:$0xff]  }
  0xb7   : > { %1298 = vmatpush1.bf16.msra.mxu0 %v5429_v4  ;;  %1879 = vrot.lane.b32.xlu0 %v5431_v6, %s5655_s3  ;;  %v790_v36 = vunpack.c.l.s8.bf16 %v722_v34  ;;  %v721_v37 = vld [vmem:[%s5981_s26 + $0x20] sm:$0xff]  ;;  %v794_v39 = vunpack.c.h.s8.bf16 %v722_v34  ;;  %v5452_v40 = vld [vmem:[%s5997_s21 + $0xc8] sm:$0xff]   ;;  %v5454_v54 = vld [vmem:[%s5997_s21 + $0xd8] sm:$0xff]  }
  0xb8   : > { %1299 = vmatprep.subr.bf16.mxu0 %v5654_v2  ;;  %1881 = vrot.lane.b32.xlu1 %v5432_v7, %s5655_s3  ;;  %v789_v38 = vunpack.c.l.s8.bf16 %v721_v37  ;;  %v726_v41 = vld [vmem:[%s5981_s26 + $0x48] sm:$0xff]  ;;  %v793_v42 = vunpack.c.h.s8.bf16 %v721_v37  ;;  %v725_v44 = vld [vmem:[%s5981_s26 + $0x40] sm:$0xff] }
  0xb9   : > { %1999 = vmatprep.mubr.bf16.mxu1 %v974_v29  ;;  %v798_v43 = vunpack.c.l.s8.bf16 %v726_v41  ;;  %v797_v45 = vunpack.c.l.s8.bf16 %v725_v44  ;;  %v802_v46 = vunpack.c.h.s8.bf16 %v726_v41  ;;  %v730_v48 = vld [vmem:[%s5981_s26 + $0x68] sm:$0xff]  ;;  %v801_v49 = vunpack.c.h.s8.bf16 %v725_v44  ;;  %v729_v51 = vld [vmem:[%s5981_s26 + $0x60] sm:$0xff] }
  0xba   : > { %v806_v50 = vunpack.c.l.s8.bf16 %v730_v48  ;;  %v805_v52 = vunpack.c.l.s8.bf16 %v729_v51  ;;  %v810_v53 = vunpack.c.h.s8.bf16 %v730_v48  ;;  %v734_v55 = vld [vmem:[%s5981_s26 + $0x88] sm:$0xff]  ;;  %v809_v57 = vunpack.c.h.s8.bf16 %v729_v51  ;;  %v733_v61 = vld [vmem:[%s5981_s26 + $0x80] sm:$0xff] }
  0xbb   : > { %1300 = vmatpush1.bf16.msra.mxu0 %v5430_v5  ;;  %1883 = vrot.lane.b32.xlu0 %v5433_v8, %s5655_s3  ;;  %v814_v58 = vunpack.c.l.s8.bf16 %v734_v55  ;;  %v813_v62 = vunpack.c.l.s8.bf16 %v733_v61  ;;  %v818_v0 = vunpack.c.h.s8.bf16 %v734_v55  ;;  %v5455_v1 = vld [vmem:[%s5997_s21 + $0xe0] sm:$0xff]   ;;  %v738_v4 = vld [vmem:[%s5981_s26 + $0xa8] sm:$0xff]  ;;  %v817_v5 = vunpack.c.h.s8.bf16 %v733_v61 }
  0xbc   : > { %1301 = vmatprep.subr.bf16.mxu0 %v5654_v2  ;;  %1885 = vrot.lane.b32.xlu1 %v5434_v9, %s5655_s3  ;;  %v826_v12 = vunpack.c.h.s8.bf16 %v738_v4  ;;  %v5456_v13 = vld [vmem:[%s5997_s21 + $0xe8] sm:$0xff]   ;;  %v909_v34 = vld [vmem:[%s5983_s29] sm:$0xff] }
  0xbd   : > { %v973_v37 = vunpack.c.l.s8.bf16 %v909_v34  ;;  %v750_v41 = vld [vmem:[%s5981_s26 + $0x108] sm:$0xff] }
  0xbe   : > { %v914_v44 = vld [vmem:[%s5983_s29 + $0x28] sm:$0xff]  ;;  %v850_v51 = vunpack.c.h.s8.bf16 %v750_v41 }
  0xbf   : > { %1302 = vmatpush1.bf16.msra.mxu0 %v5431_v6  ;;  %1887 = vrot.lane.b32.xlu0 %v5435_v10, %s5655_s3 }
  0xc0   : > { %1303 = vmatprep.subr.bf16.mxu0 %v5654_v2  ;;  %1889 = vrot.lane.b32.xlu1 %v5436_v11, %s5655_s3 }
  0xc3   : > { %1304 = vmatpush1.bf16.msra.mxu0 %v5432_v7  ;;  %1891 = vrot.lane.b32.xlu0 %v5437_v14, %s5655_s3  ;;  %v822_v7 = vunpack.c.l.s8.bf16 %v738_v4 }
  0xc4   : > { %1305 = vmatprep.subr.bf16.mxu0 %v5654_v2  ;;  %1893 = vrot.lane.b32.xlu1 %v5438_v15, %s5655_s3 }
  0xc7   : > { %1306 = vmatpush1.bf16.msra.mxu0 %v5433_v8  ;;  %1895 = vrot.lane.b32.xlu0 %v5439_v16, %s5655_s3 }
  0xc8   : > { %1307 = vmatprep.subr.bf16.mxu0 %v5654_v2  ;;  %1897 = vrot.lane.b32.xlu1 %v5440_v17, %s5655_s3 }
  0xcb   : > { %1308 = vmatpush1.bf16.msra.mxu0 %v5434_v9  ;;  %1899 = vrot.lane.b32.xlu0 %v5441_v18, %s5655_s3  ;;  %v737_v9 = vld [vmem:[%s5981_s26 + $0xa0] sm:$0xff] }
  0xcc   : > { %1309 = vmatprep.subr.bf16.mxu0 %v5654_v2  ;;  %1901 = vrot.lane.b32.xlu1 %v5442_v19, %s5655_s3 }
  0xcf   : > { %1310 = vmatpush1.bf16.msra.mxu0 %v5435_v10  ;;  %1903 = vrot.lane.b32.xlu0 %v5443_v20, %s5655_s3  ;;  %v821_v10 = vunpack.c.l.s8.bf16 %v737_v9 }
  0xd0   : > { %1311 = vmatprep.subr.bf16.mxu0 %v5654_v2  ;;  %1905 = vrot.lane.b32.xlu1 %v5444_v21, %s5655_s3 }
  0xd3   : > { %1312 = vmatpush1.bf16.msra.mxu0 %v5436_v11  ;;  %1907 = vrot.lane.b32.xlu0 %v5445_v22, %s5655_s3 }
  0xd4   : > { %1313 = vmatprep.subr.bf16.mxu0 %v5654_v2  ;;  %1909 = vrot.lane.b32.xlu1 %v5446_v23, %s5655_s3 }
  0xd7   : > { %1314 = vmatpush1.bf16.msra.mxu0 %v5437_v14  ;;  %1911 = vrot.lane.b32.xlu0 %v5447_v24, %s5655_s3 }
  0xd8   : > { %1315 = vmatprep.subr.bf16.mxu0 %v5654_v2  ;;  %1913 = vrot.lane.b32.xlu1 %v5448_v25, %s5655_s3 }
  0xdb   : > { %1316 = vmatpush1.bf16.msra.mxu0 %v5438_v15  ;;  %1915 = vrot.lane.b32.xlu0 %v5449_v26, %s5655_s3  ;;  %v742_v15 = vld [vmem:[%s5981_s26 + $0xc8] sm:$0xff] }
  0xdc   : > { %1317 = vmatprep.subr.bf16.mxu0 %v5654_v2  ;;  %1917 = vrot.lane.b32.xlu1 %v5450_v28, %s5655_s3 }
  0xdf   : > { %1318 = vmatpush1.bf16.msra.mxu0 %v5439_v16  ;;  %1919 = vrot.lane.b32.xlu0 %v5451_v33, %s5655_s3  ;;  %v825_v16 = vunpack.c.h.s8.bf16 %v737_v9  ;;  %v758_v9 = vld [vmem:[%s5981_s26 + $0x148] sm:$0xff] }
  0xe0   : > { %1319 = vmatprep.subr.bf16.mxu0 %v5654_v2  ;;  %1921 = vrot.lane.b32.xlu1 %v5452_v40, %s5655_s3 }
  0xe3   : > { %1320 = vmatpush1.bf16.msra.mxu0 %v5440_v17  ;;  %1923 = vrot.lane.b32.xlu0 %v5453_v47, %s5655_s3 }
  0xe4   : > { %1321 = vmatprep.subr.bf16.mxu0 %v5654_v2  ;;  %1925 = vrot.lane.b32.xlu1 %v5454_v54, %s5655_s3 }
  0xe7   : > { %1322 = vmatpush1.bf16.msra.mxu0 %v5441_v18  ;;  %1927 = vrot.lane.b32.xlu0 %v5455_v1, %s5655_s3  ;;  %v830_v18 = vunpack.c.l.s8.bf16 %v742_v15 }
  0xe8   : > { %1323 = vmatprep.subr.bf16.mxu0 %v5654_v2  ;;  %1929 = vrot.lane.b32.xlu1 %v5456_v13, %s5655_s3 }
  0xeb   : > { %1324 = vmatpush1.bf16.msra.mxu0 %v5442_v19 }
  0xec   : > { %1582 = vmatprep.subr.bf16.mxu0 %v5654_v2 }
  0xee   : > { %1326 = vmatmul.mubr.bf16.vlgmr.msra.gmra.mrb[0].mxu0 %v781_v31 }
  0xef   : > { %1333 = vmatprep.mubr.bf16.mxu0 %v786_v32  ;;  %1583 = vmatpush1.bf16.msra.mxu0 %v5443_v20  ;;  %v741_v20 = vld [vmem:[%s5981_s26 + $0xc0] sm:$0xff] }
  0xf0   : > { %1584 = vmatprep.subr.bf16.mxu0 %v5654_v2  ;;  %v745_v32 = vld [vmem:[%s5981_s26 + $0xe0] sm:$0xff] }
  0xf3   : > { %1585 = vmatpush1.bf16.msra.mxu0 %v5444_v21  ;;  %v829_v21 = vunpack.c.l.s8.bf16 %v741_v20 }
  0xf4   : > { %1586 = vmatprep.subr.bf16.mxu0 %v5654_v2 }
  0xf6   : > { %1334 = vmatmul.mubr.bf16.gmra.mrb[4].mxu0 %v785_v35 }
  0xf7   : > { %1341 = vmatprep.mubr.bf16.mxu0 %v790_v36  ;;  %1587 = vmatpush1.bf16.msra.mxu0 %v5445_v22 }
  0xf8   : > { %1588 = vmatprep.subr.bf16.mxu0 %v5654_v2 }
  0xfb   : > { %1589 = vmatpush1.bf16.msra.mxu0 %v5446_v23  ;;  %v834_v23 = vunpack.c.h.s8.bf16 %v742_v15 }
  0xfc   : > { %1590 = vmatprep.subr.bf16.mxu0 %v5654_v2 }
  0xfe   : > { %1342 = vmatmul.mubr.bf16.gmra.mrb[8].mxu0 %v789_v38  ;;  %v978_v38 = vunpack.c.h.s8.bf16 %v6205_v27  ;;  %v977_v27 = vunpack.c.h.s8.bf16 %v909_v34 }
  0xff   : > { %1349 = vmatprep.mubr.bf16.mxu0 %v794_v39  ;;  %1591 = vmatpush1.bf16.msra.mxu0 %v5447_v24  ;;  %v5457_v24 = vld [vmem:[%s5997_s21 + $0xf0] sm:$0xff]   ;;  %v5458_v39 = vld [vmem:[%s5997_s21 + $0xf8] sm:$0xff]  }
 0x100   : > { %1592 = vmatprep.subr.bf16.mxu0 %v5654_v2  ;;  %1931 = vrot.lane.b32.xlu0 %v5457_v24, %s5655_s3 }
 0x101   : > { %1933 = vrot.lane.b32.xlu1 %v5458_v39, %s5655_s3 }
 0x103   : > { %1593 = vmatpush1.bf16.msra.mxu0 %v5448_v25 }
 0x104   : > { %1594 = vmatprep.subr.bf16.mxu0 %v5654_v2 }
 0x106   : > { %1350 = vmatmul.mubr.bf16.gmra.mrb[12].mxu0 %v793_v42  ;;  %v841_v42 = vunpack.c.h.s8.bf16 %v745_v32 }
 0x107   : > { %1357 = vmatprep.mubr.bf16.mxu0 %v798_v43  ;;  %1595 = vmatpush1.bf16.msra.mxu0 %v5449_v26  ;;  %v746_v26 = vld [vmem:[%s5981_s26 + $0xe8] sm:$0xff]  ;;  %v846_v43 = vunpack.c.l.s8.bf16 %v750_v41 }
 0x108   : > { %1596 = vmatprep.subr.bf16.mxu0 %v5654_v2  ;;  %v838_v30 = vunpack.c.l.s8.bf16 %v746_v26  ;;  %v842_v36 = vunpack.c.h.s8.bf16 %v746_v26  ;;  %v930_v41 = vld [vmem:[%s5983_s29 + $0xa8] sm:$0xff] }
 0x10b   : > { %1597 = vmatpush1.bf16.msra.mxu0 %v5450_v28  ;;  %v833_v28 = vunpack.c.h.s8.bf16 %v741_v20  ;;  %v866_v20 = vunpack.c.h.s8.bf16 %v758_v9 }
 0x10c   : > { %1598 = vmatprep.subr.bf16.mxu0 %v5654_v2 }
 0x10e   : > { %1358 = vmatmul.mubr.bf16.gmra.mrb[16].mxu0 %v797_v45 }
 0x10f   : > { %1365 = vmatprep.mubr.bf16.mxu0 %v802_v46  ;;  %1599 = vmatpush1.bf16.msra.mxu0 %v5451_v33  ;;  %v837_v33 = vunpack.c.l.s8.bf16 %v745_v32  ;;  %v982_v46 = vunpack.c.l.s8.bf16 %v914_v44 }
 0x110   : > { %1600 = vmatprep.subr.bf16.mxu0 %v5654_v2 }
 0x113   : > { %1601 = vmatpush1.bf16.msra.mxu0 %v5452_v40 }
 0x114   : > { %1602 = vmatprep.subr.bf16.mxu0 %v5654_v2 }
 0x116   : > { %1366 = vmatmul.mubr.bf16.gmra.mrb[20].mxu0 %v801_v49 }
 0x117   : > { %1373 = vmatprep.mubr.bf16.mxu0 %v806_v50  ;;  %1603 = vmatpush1.bf16.msra.mxu0 %v5453_v47  ;;  %v749_v47 = vld [vmem:[%s5981_s26 + $0x100] sm:$0xff] }
 0x118   : > { %1604 = vmatprep.subr.bf16.mxu0 %v5654_v2  ;;  %v845_v49 = vunpack.c.l.s8.bf16 %v749_v47  ;;  %v913_v50 = vld [vmem:[%s5983_s29 + $0x20] sm:$0xff] }
 0x119   : > { %v985_v61 = vunpack.c.h.s8.bf16 %v913_v50 }
 0x11b   : > { %1605 = vmatpush1.bf16.msra.mxu0 %v5454_v54  ;;  %v986_v54 = vunpack.c.h.s8.bf16 %v914_v44  ;;  %v765_v44 = vld [vmem:[%s5981_s26 + $0x180] sm:$0xff] }
 0x11c   : > { %1606 = vmatprep.subr.bf16.mxu0 %v5654_v2 }
 0x11e   : > { %1374 = vmatmul.mubr.bf16.gmra.mrb[24].mxu0 %v805_v52 }
 0x11f   : > { %1381 = vmatprep.mubr.bf16.mxu0 %v810_v53  ;;  %1607 = vmatpush1.bf16.msra.mxu0 %v5455_v1  ;;  %v981_v53 = vunpack.c.l.s8.bf16 %v913_v50  ;;  %v881_v50 = vunpack.c.h.s8.bf16 %v765_v44 }
 0x120   : > { %1608 = vmatprep.subr.bf16.mxu0 %v5654_v2 }
 0x121   : > { %v1872_v56 = vpop.permute.xlu0 %1871 }
 0x122   : > { %1968 = vmatpush1.bf16.msra.mxu1 %v1872_v56  ;;  %v1876_v60 = vpop.permute.xlu1 %1875  ;;  %v754_v56 = vld [vmem:[%s5981_s26 + $0x128] sm:$0xff] }
 0x123   : > { %1969 = vmatprep.subr.bf16.mxu1 %v5654_v2  ;;  %1609 = vmatpush1.bf16.msra.mxu0 %v5456_v13  ;;  %v858_v4 = vunpack.c.h.s8.bf16 %v754_v56 }
 0x124   : > { %1610 = vmatprep.subr.bf16.mxu0 %v5654_v2 }
 0x125   : > { %v1874_v59 = vpop.permute.xlu0 %1873 }
 0x126   : > { %1382 = vmatmul.mubr.bf16.gmra.mrb[28].mxu0 %v809_v57  ;;  %1970 = vmatpush1.bf16.msra.mxu1 %v1874_v59  ;;  %v1878_v63 = vpop.permute.xlu1 %1877  ;;  %v849_v57 = vunpack.c.h.s8.bf16 %v749_v47  ;;  %v918_v59 = vld [vmem:[%s5983_s29 + $0x48] sm:$0xff] }
 0x127   : > { %1971 = vmatprep.subr.bf16.mxu1 %v5654_v2  ;;  %1389 = vmatprep.mubr.bf16.mxu0 %v814_v58  ;;  %v854_v58 = vunpack.c.l.s8.bf16 %v754_v56  ;;  %v769_v56 = vld [vmem:[%s5981_s26 + $0x1a0] sm:$0xff] }
 0x128   : > { %1611 = vmatpush1.bf16.msra.mxu0 %v5457_v24 }
 0x129   : > { %v1880_v3 = vpop.permute.xlu0 %1879  ;;  %1612 = vmatprep.subr.bf16.mxu0 %v5654_v2 }
 0x12a   : > { %1972 = vmatpush1.bf16.msra.mxu1 %v1876_v60  ;;  %v1882_v6 = vpop.permute.xlu1 %1881 }
 0x12b   : > { %1973 = vmatprep.subr.bf16.mxu1 %v5654_v2 }
 0x12c   : > { %1613 = vmatpush1.bf16.msra.mxu0 %v5458_v39 }
 0x12d   : > { %v1884_v8 = vpop.permute.xlu0 %1883 }
 0x12e   : > { %1390 = vmatmul.mubr.bf16.gmra.mrb[32].mxu0 %v813_v62  ;;  %1974 = vmatpush1.bf16.msra.mxu1 %v1878_v63  ;;  %v1886_v11 = vpop.permute.xlu1 %1885  ;;  %v990_v62 = vunpack.c.l.s8.bf16 %v918_v59  ;;  %v753_v63 = vld [vmem:[%s5981_s26 + $0x120] sm:$0xff] }
 0x12f   : > { %1975 = vmatprep.subr.bf16.mxu1 %v5654_v2  ;;  %1397 = vmatprep.mubr.bf16.mxu0 %v818_v0  ;;  %v853_v1 = vunpack.c.l.s8.bf16 %v753_v63 }
 0x131   : > { %v1888_v14 = vpop.permute.xlu0 %1887 }
 0x132   : > { %1976 = vmatpush1.bf16.msra.mxu1 %v1880_v3  ;;  %v1890_v17 = vpop.permute.xlu1 %1889  ;;  %v917_v3 = vld [vmem:[%s5983_s29 + $0x40] sm:$0xff] }
 0x133   : > { %1977 = vmatprep.subr.bf16.mxu1 %v5654_v2 }
 0x135   : > { %v1892_v19 = vpop.permute.xlu0 %1891 }
 0x136   : > { %1398 = vmatmul.mubr.bf16.gmra.mrb[36].mxu0 %v817_v5  ;;  %1978 = vmatpush1.bf16.msra.mxu1 %v1882_v6  ;;  %v1894_v22 = vpop.permute.xlu1 %1893  ;;  %v989_v6 = vunpack.c.l.s8.bf16 %v917_v3 }
 0x137   : > { %1979 = vmatprep.subr.bf16.mxu1 %v5654_v2  ;;  %1405 = vmatprep.mubr.bf16.mxu0 %v822_v7  ;;  %v994_v7 = vunpack.c.h.s8.bf16 %v918_v59 }
 0x139   : > { %v1896_v25 = vpop.permute.xlu0 %1895 }
 0x13a   : > { %1980 = vmatpush1.bf16.msra.mxu1 %v1884_v8  ;;  %v1898_v29 = vpop.permute.xlu1 %1897 }
 0x13b   : > { %1981 = vmatprep.subr.bf16.mxu1 %v5654_v2 }
 0x13d   : > { %v1900_v31 = vpop.permute.xlu0 %1899 }
 0x13e   : > { %1406 = vmatmul.mubr.bf16.gmra.mrb[40].mxu0 %v821_v10  ;;  %1982 = vmatpush1.bf16.msra.mxu1 %v1886_v11  ;;  %v1902_v35 = vpop.permute.xlu1 %1901  ;;  %v857_v10 = vunpack.c.h.s8.bf16 %v753_v63  ;;  %v862_v11 = vunpack.c.l.s8.bf16 %v758_v9  ;;  %v889_v63 = vunpack.c.h.s8.bf16 %v769_v56 }
 0x13f   : > { %1983 = vmatprep.subr.bf16.mxu1 %v5654_v2  ;;  %1413 = vmatprep.mubr.bf16.mxu0 %v826_v12  ;;  %v922_v12 = vld [vmem:[%s5983_s29 + $0x68] sm:$0xff] }
 0x140   : > { %v998_v15 = vunpack.c.l.s8.bf16 %v922_v12 }
 0x141   : > { %v1904_v40 = vpop.permute.xlu0 %1903 }
 0x142   : > { %1984 = vmatpush1.bf16.msra.mxu1 %v1888_v14  ;;  %v1906_v45 = vpop.permute.xlu1 %1905  ;;  %v993_v14 = vunpack.c.h.s8.bf16 %v917_v3  ;;  %v938_v3 = vld [vmem:[%s5983_s29 + $0xe8] sm:$0xff] }
 0x143   : > { %1985 = vmatprep.subr.bf16.mxu1 %v5654_v2 }
 0x145   : > { %v1908_v48 = vpop.permute.xlu0 %1907 }
 0x146   : > { %1414 = vmatmul.mubr.bf16.gmra.mrb[44].mxu0 %v825_v16  ;;  %1986 = vmatpush1.bf16.msra.mxu1 %v1890_v17  ;;  %v1910_v52 = vpop.permute.xlu1 %1909  ;;  %v757_v16 = vld [vmem:[%s5981_s26 + $0x140] sm:$0xff] }
 0x147   : > { %1987 = vmatprep.subr.bf16.mxu1 %v5654_v2  ;;  %1421 = vmatprep.mubr.bf16.mxu0 %v830_v18  ;;  %v861_v18 = vunpack.c.l.s8.bf16 %v757_v16  ;;  %v865_v24 = vunpack.c.h.s8.bf16 %v757_v16 }
 0x149   : > { %v1912_v55 = vpop.permute.xlu0 %1911 }
 0x14a   : > { %1988 = vmatpush1.bf16.msra.mxu1 %v1892_v19  ;;  %v1914_v60 = vpop.permute.xlu1 %1913  ;;  %v921_v19 = vld [vmem:[%s5983_s29 + $0x60] sm:$0xff] }
 0x14b   : > { %1989 = vmatprep.subr.bf16.mxu1 %v5654_v2 }
 0x14d   : > { %v1916_v0 = vpop.permute.xlu0 %1915 }
 0x14e   : > { %1422 = vmatmul.mubr.bf16.gmra.mrb[48].mxu0 %v829_v21  ;;  %1990 = vmatpush1.bf16.msra.mxu1 %v1894_v22  ;;  %v1918_v5 = vpop.permute.xlu1 %1917  ;;  %v997_v21 = vunpack.c.l.s8.bf16 %v921_v19  ;;  %v1002_v22 = vunpack.c.h.s8.bf16 %v922_v12  ;;  %v778_v12 = vld [vmem:[%s5981_s26 + $0x1e8] sm:$0xff] }
 0x14f   : > { %1991 = vmatprep.subr.bf16.mxu1 %v5654_v2  ;;  %1429 = vmatprep.mubr.bf16.mxu0 %v834_v23  ;;  %v762_v23 = vld [vmem:[%s5981_s26 + $0x168] sm:$0xff] }
 0x150   : > { %v870_v26 = vunpack.c.l.s8.bf16 %v762_v23  ;;  %v874_v34 = vunpack.c.h.s8.bf16 %v762_v23 }
 0x151   : > { %v1920_v8 = vpop.permute.xlu0 %1919 }
 0x152   : > { %1992 = vmatpush1.bf16.msra.mxu1 %v1896_v25  ;;  %v1922_v13 = vpop.permute.xlu1 %1921 }
 0x153   : > { %1993 = vmatprep.subr.bf16.mxu1 %v5654_v2 }
 0x155   : > { %v1924_v17 = vpop.permute.xlu0 %1923 }
 0x156   : > { %1430 = vmatmul.mubr.bf16.gmra.mrb[52].mxu0 %v833_v28  ;;  %1994 = vmatpush1.bf16.msra.mxu1 %v1898_v29  ;;  %v1926_v25 = vpop.permute.xlu1 %1925  ;;  %v926_v28 = vld [vmem:[%s5983_s29 + $0x88] sm:$0xff]  ;;  %v1001_v29 = vunpack.c.h.s8.bf16 %v921_v19 }
 0x157   : > { %1995 = vmatprep.subr.bf16.mxu1 %v5654_v2  ;;  %1437 = vmatprep.mubr.bf16.mxu0 %v838_v30  ;;  %v1006_v30 = vunpack.c.l.s8.bf16 %v926_v28 }
 0x159   : > { %v1928_v39 = vpop.permute.xlu0 %1927 }
 0x15a   : > { %1996 = vmatpush1.bf16.msra.mxu1 %v1900_v31  ;;  %v761_v31 = vld [vmem:[%s5981_s26 + $0x160] sm:$0xff] }
 0x15b   : > { %1997 = vmatprep.subr.bf16.mxu1 %v5654_v2  ;;  %v869_v32 = vunpack.c.l.s8.bf16 %v761_v31 }
 0x15e   : > { %1438 = vmatmul.mubr.bf16.gmra.mrb[56].mxu0 %v837_v33  ;;  %1998 = vmatpush1.bf16.msra.mxu1 %v1902_v35  ;;  %v925_v33 = vld [vmem:[%s5983_s29 + $0x80] sm:$0xff] }
 0x15f   : > { %2256 = vmatprep.subr.bf16.mxu1 %v5654_v2  ;;  %1445 = vmatprep.mubr.bf16.mxu0 %v842_v36  ;;  %v1005_v35 = vunpack.c.l.s8.bf16 %v925_v33  ;;  %v1010_v36 = vunpack.c.h.s8.bf16 %v926_v28  ;;  %v946_v28 = vld [vmem:[%s5983_s29 + $0x128] sm:$0xff] }
 0x161   : > { %2000 = vmatmul.mubr.bf16.vlgmr.msra.gmra.mrb[0].mxu1 %v973_v37  ;;  %v766_v37 = vld [vmem:[%s5981_s26 + $0x188] sm:$0xff] }
 0x162   : > { %2257 = vmatpush1.bf16.msra.mxu1 %v1904_v40  ;;  %2007 = vmatprep.mubr.bf16.mxu1 %v978_v38  ;;  %v873_v38 = vunpack.c.h.s8.bf16 %v761_v31  ;;  %v878_v40 = vunpack.c.l.s8.bf16 %v766_v37  ;;  %v719_v31 = vld [vmem:[%s5981_s26 + $0x10] sm:$0xff] }
 0x163   : > { %2258 = vmatprep.subr.bf16.mxu1 %v5654_v2 }
 0x166   : > { %1446 = vmatmul.mubr.bf16.gmra.mrb[60].mxu0 %v841_v42  ;;  %2259 = vmatpush1.bf16.msra.mxu1 %v1906_v45  ;;  %v1009_v42 = vunpack.c.h.s8.bf16 %v925_v33  ;;  %v877_v45 = vunpack.c.l.s8.bf16 %v765_v44  ;;  %v945_v33 = vld [vmem:[%s5983_s29 + $0x120] sm:$0xff] }
 0x167   : > { %1453 = vmatprep.mubr.bf16.mxu0 %v846_v43  ;;  %2260 = vmatprep.subr.bf16.mxu1 %v5654_v2  ;;  %v1014_v43 = vunpack.c.l.s8.bf16 %v930_v41 }
 0x169   : > { %2008 = vmatmul.mubr.bf16.gmra.mrb[4].mxu1 %v977_v27  ;;  %v929_v27 = vld [vmem:[%s5983_s29 + $0xa0] sm:$0xff] }
 0x16a   : > { %2015 = vmatprep.mubr.bf16.mxu1 %v982_v46  ;;  %2261 = vmatpush1.bf16.msra.mxu1 %v1908_v48  ;;  %v882_v46 = vunpack.c.h.s8.bf16 %v766_v37  ;;  %v1013_v47 = vunpack.c.l.s8.bf16 %v929_v27  ;;  %v1018_v48 = vunpack.c.h.s8.bf16 %v930_v41  ;;  %v724_v37 = vld [vmem:[%s5981_s26 + $0x38] sm:$0xff]  ;;  %v1049_v41 = vunpack.c.h.s8.bf16 %v945_v33 }
 0x16b   : > { %2262 = vmatprep.subr.bf16.mxu1 %v5654_v2 }
 0x16e   : > { %1454 = vmatmul.mubr.bf16.gmra.mrb[64].mxu0 %v845_v49  ;;  %2263 = vmatpush1.bf16.msra.mxu1 %v1910_v52  ;;  %v770_v49 = vld [vmem:[%s5981_s26 + $0x1a8] sm:$0xff] }
 0x16f   : > { %1461 = vmatprep.mubr.bf16.mxu0 %v850_v51  ;;  %2264 = vmatprep.subr.bf16.mxu1 %v5654_v2  ;;  %v1930_v51 = vpop.permute.xlu1 %1929  ;;  %v886_v52 = vunpack.c.l.s8.bf16 %v770_v49  ;;  %v890_v59 = vunpack.c.h.s8.bf16 %v770_v49 }
 0x171   : > { %2016 = vmatmul.mubr.bf16.gmra.mrb[8].mxu1 %v981_v53  ;;  %v934_v53 = vld [vmem:[%s5983_s29 + $0xc8] sm:$0xff] }
 0x172   : > { %2023 = vmatprep.mubr.bf16.mxu1 %v986_v54  ;;  %2265 = vmatpush1.bf16.msra.mxu1 %v1912_v55  ;;  %v1017_v54 = vunpack.c.h.s8.bf16 %v929_v27  ;;  %v1022_v55 = vunpack.c.l.s8.bf16 %v934_v53  ;;  %v796_v27 = vunpack.c.h.s8.bf16 %v724_v37 }
 0x173   : > { %2266 = vmatprep.subr.bf16.mxu1 %v5654_v2 }
 0x176   : > { %1462 = vmatmul.mubr.bf16.gmra.mrb[68].mxu0 %v849_v57  ;;  %2267 = vmatpush1.bf16.msra.mxu1 %v1914_v60  ;;  %v885_v57 = vunpack.c.l.s8.bf16 %v769_v56  ;;  %v953_v56 = vld [vmem:[%s5983_s29 + $0x160] sm:$0xff] }
 0x177   : > { %1469 = vmatprep.mubr.bf16.mxu0 %v854_v58  ;;  %2268 = vmatprep.subr.bf16.mxu1 %v5654_v2  ;;  %v933_v58 = vld [vmem:[%s5983_s29 + $0xc0] sm:$0xff] }
 0x178   : > { %v1021_v60 = vunpack.c.l.s8.bf16 %v933_v58 }
 0x179   : > { %2024 = vmatmul.mubr.bf16.gmra.mrb[12].mxu1 %v985_v61  ;;  %v1026_v61 = vunpack.c.h.s8.bf16 %v934_v53 }
 0x17a   : > { %2031 = vmatprep.mubr.bf16.mxu1 %v990_v62  ;;  %2269 = vmatpush1.bf16.msra.mxu1 %v1916_v0  ;;  %v774_v62 = vld [vmem:[%s5981_s26 + $0x1c8] sm:$0xff]  ;;  %v1932_v0 = vpop.permute.xlu0 %1931 }
 0x17b   : > { %2270 = vmatprep.subr.bf16.mxu1 %v5654_v2  ;;  %v898_v9 = vunpack.c.h.s8.bf16 %v774_v62 }
 0x17e   : > { %1470 = vmatmul.mubr.bf16.gmra.mrb[72].mxu0 %v853_v1  ;;  %2271 = vmatpush1.bf16.msra.mxu1 %v1918_v5  ;;  %v894_v1 = vunpack.c.l.s8.bf16 %v774_v62  ;;  %v1030_v5 = vunpack.c.l.s8.bf16 %v938_v3 }
 0x17f   : > { %1477 = vmatprep.mubr.bf16.mxu0 %v858_v4  ;;  %2272 = vmatprep.subr.bf16.mxu1 %v5654_v2  ;;  %v1025_v4 = vunpack.c.h.s8.bf16 %v933_v58  ;;  %v1061_v58 = vunpack.c.l.s8.bf16 %v953_v56 }
 0x181   : > { %2032 = vmatmul.mubr.bf16.gmra.mrb[16].mxu1 %v989_v6  ;;  %v773_v6 = vld [vmem:[%s5981_s26 + $0x1c0] sm:$0xff] }
 0x182   : > { %2039 = vmatprep.mubr.bf16.mxu1 %v994_v7  ;;  %2273 = vmatpush1.bf16.msra.mxu1 %v1920_v8  ;;  %v893_v7 = vunpack.c.l.s8.bf16 %v773_v6  ;;  %v937_v8 = vld [vmem:[%s5983_s29 + $0xe0] sm:$0xff] }
 0x183   : > { %2274 = vmatprep.subr.bf16.mxu1 %v5654_v2  ;;  %v1033_v16 = vunpack.c.h.s8.bf16 %v937_v8 }
 0x186   : > { %1478 = vmatmul.mubr.bf16.gmra.mrb[76].mxu0 %v857_v10  ;;  %2275 = vmatpush1.bf16.msra.mxu1 %v1922_v13  ;;  %v1029_v10 = vunpack.c.l.s8.bf16 %v937_v8  ;;  %v1934_v13 = vpop.permute.xlu1 %1933 }
 0x187   : > { %1485 = vmatprep.mubr.bf16.mxu0 %v862_v11  ;;  %2276 = vmatprep.subr.bf16.mxu1 %v5654_v2  ;;  %v1034_v11 = vunpack.c.h.s8.bf16 %v938_v3  ;;  %v731_v3 = vld [vmem:[%s5981_s26 + $0x70] sm:$0xff] }
 0x189   : > { %2040 = vmatmul.mubr.bf16.gmra.mrb[20].mxu1 %v993_v14  ;;  %v902_v14 = vunpack.c.l.s8.bf16 %v778_v12 }
 0x18a   : > { %2047 = vmatprep.mubr.bf16.mxu1 %v998_v15  ;;  %2277 = vmatpush1.bf16.msra.mxu1 %v1924_v17  ;;  %v942_v15 = vld [vmem:[%s5983_s29 + $0x108] sm:$0xff] }
 0x18b   : > { %2278 = vmatprep.subr.bf16.mxu1 %v5654_v2  ;;  %v1038_v17 = vunpack.c.l.s8.bf16 %v942_v15  ;;  %v1042_v23 = vunpack.c.h.s8.bf16 %v942_v15 }
 0x18e   : > { %1486 = vmatmul.mubr.bf16.gmra.mrb[80].mxu0 %v861_v18  ;;  %2279 = vmatpush1.bf16.msra.mxu1 %v1926_v25  ;;  %v777_v18 = vld [vmem:[%s5981_s26 + $0x1e0] sm:$0xff] }
 0x18f   : > { %1493 = vmatprep.mubr.bf16.mxu0 %v866_v20  ;;  %2280 = vmatprep.subr.bf16.mxu1 %v5654_v2  ;;  %v901_v19 = vunpack.c.l.s8.bf16 %v777_v18  ;;  %v941_v20 = vld [vmem:[%s5983_s29 + $0x100] sm:$0xff]  ;;  %v905_v25 = vunpack.c.h.s8.bf16 %v777_v18 }
 0x191   : > { %2048 = vmatmul.mubr.bf16.gmra.mrb[24].mxu1 %v997_v21  ;;  %v906_v21 = vunpack.c.h.s8.bf16 %v778_v12  ;;  %v962_v12 = vld [vmem:[%s5983_s29 + $0x1a8] sm:$0xff] }
 0x192   : > { %2055 = vmatprep.mubr.bf16.mxu1 %v1002_v22  ;;  %2281 = vmatpush1.bf16.msra.mxu1 %v1928_v39  ;;  %v1037_v22 = vunpack.c.l.s8.bf16 %v941_v20  ;;  %v792_v39 = vunpack.c.l.s8.bf16 %v724_v37 }
 0x193   : > { %2282 = vmatprep.subr.bf16.mxu1 %v5654_v2 }
 0x196   : > { %1494 = vmatmul.mubr.bf16.gmra.mrb[84].mxu0 %v865_v24  ;;  %2283 = vmatpush1.bf16.msra.mxu1 %v1930_v51  ;;  %v720_v24 = vld [vmem:[%s5981_s26 + $0x18] sm:$0xff]  ;;  %v954_v51 = vld [vmem:[%s5983_s29 + $0x168] sm:$0xff] }
 0x197   : > { %1501 = vmatprep.mubr.bf16.mxu0 %v870_v26  ;;  %2284 = vmatprep.subr.bf16.mxu1 %v5654_v2  ;;  %v784_v26 = vunpack.c.l.s8.bf16 %v720_v24  ;;  %v1062_v53 = vunpack.c.l.s8.bf16 %v954_v51 }
 0x199   : > { %2056 = vmatmul.mubr.bf16.gmra.mrb[28].mxu1 %v1001_v29  ;;  %v1041_v29 = vunpack.c.h.s8.bf16 %v941_v20  ;;  %v740_v20 = vld [vmem:[%s5981_s26 + $0xb8] sm:$0xff] }
 0x19a   : > { %2063 = vmatprep.mubr.bf16.mxu1 %v1006_v30  ;;  %2285 = vmatpush1.bf16.msra.mxu1 %v1932_v0  ;;  %v1046_v30 = vunpack.c.l.s8.bf16 %v946_v28  ;;  %v1065_v0 = vunpack.c.h.s8.bf16 %v953_v56  ;;  %v752_v56 = vld [vmem:[%s5981_s26 + $0x118] sm:$0xff] }
 0x19b   : > { %2286 = vmatprep.subr.bf16.mxu1 %v5654_v2  ;;  %v897_v2 = vunpack.c.h.s8.bf16 %v773_v6 }
 0x19e   : > { %1502 = vmatmul.mubr.bf16.gmra.mrb[88].mxu0 %v869_v32  ;;  %2287 = vmatpush1.bf16.msra.mxu1 %v1934_v13  ;;  %v783_v32 = vunpack.c.l.s8.bf16 %v719_v31  ;;  %v1078_v13 = vunpack.c.l.s8.bf16 %v962_v12 }
 0x19f   : > { %1509 = vmatprep.mubr.bf16.mxu0 %v874_v34  ;;  %v788_v34 = vunpack.c.h.s8.bf16 %v720_v24 }
 0x1a1   : > { %2064 = vmatmul.mubr.bf16.gmra.mrb[32].mxu1 %v1005_v35  ;;  %v1045_v35 = vunpack.c.l.s8.bf16 %v945_v33  ;;  %v744_v33 = vld [vmem:[%s5981_s26 + $0xd8] sm:$0xff] }
 0x1a2   : > { %2071 = vmatprep.mubr.bf16.mxu1 %v1010_v36  ;;  %v1050_v36 = vunpack.c.h.s8.bf16 %v946_v28 }
 0x1a6   : > { %1510 = vmatmul.mubr.bf16.gmra.mrb[92].mxu0 %v873_v38  ;;  %v787_v38 = vunpack.c.h.s8.bf16 %v719_v31 }
 0x1a7   : > { %1517 = vmatprep.mubr.bf16.mxu0 %v878_v40  ;;  %v950_v40 = vld [vmem:[%s5983_s29 + $0x148] sm:$0xff] }
 0x1a9   : > { %2072 = vmatmul.mubr.bf16.gmra.mrb[36].mxu1 %v1009_v42  ;;  %v1054_v42 = vunpack.c.l.s8.bf16 %v950_v40 }
 0x1aa   : > { %2079 = vmatprep.mubr.bf16.mxu1 %v1014_v43  ;;  %v723_v43 = vld [vmem:[%s5981_s26 + $0x30] sm:$0xff] }
 0x1ab   : > { %v791_v44 = vunpack.c.l.s8.bf16 %v723_v43  ;;  %v795_v49 = vunpack.c.h.s8.bf16 %v723_v43 }
 0x1ae   : > { %1518 = vmatmul.mubr.bf16.gmra.mrb[96].mxu0 %v877_v45  ;;  %v949_v45 = vld [vmem:[%s5983_s29 + $0x140] sm:$0xff] }
 0x1af   : > { %1525 = vmatprep.mubr.bf16.mxu0 %v882_v46  ;;  %v1053_v46 = vunpack.c.l.s8.bf16 %v949_v45 }
 0x1b1   : > { %2080 = vmatmul.mubr.bf16.gmra.mrb[40].mxu1 %v1013_v47  ;;  %v1058_v47 = vunpack.c.h.s8.bf16 %v950_v40 }
 0x1b2   : > { %2087 = vmatprep.mubr.bf16.mxu1 %v1018_v48  ;;  %v728_v48 = vld [vmem:[%s5981_s26 + $0x58] sm:$0xff] }
 0x1b6   : > { %1526 = vmatmul.mubr.bf16.gmra.mrb[100].mxu0 %v881_v50  ;;  %v800_v50 = vunpack.c.l.s8.bf16 %v728_v48 }
 0x1b7   : > { %1533 = vmatprep.mubr.bf16.mxu0 %v886_v52  ;;  %v1057_v52 = vunpack.c.h.s8.bf16 %v949_v45  ;;  %v748_v45 = vld [vmem:[%s5981_s26 + $0xf8] sm:$0xff] }
 0x1b9   : > { %2088 = vmatmul.mubr.bf16.gmra.mrb[44].mxu1 %v1017_v54  ;;  %v727_v54 = vld [vmem:[%s5981_s26 + $0x50] sm:$0xff] }
 0x1ba   : > { %2095 = vmatprep.mubr.bf16.mxu1 %v1022_v55  ;;  %v799_v55 = vunpack.c.l.s8.bf16 %v727_v54 }
 0x1be   : > { %1534 = vmatmul.mubr.bf16.gmra.mrb[104].mxu0 %v885_v57  ;;  %v804_v57 = vunpack.c.h.s8.bf16 %v728_v48 }
 0x1bf   : > { %1541 = vmatprep.mubr.bf16.mxu0 %v890_v59  ;;  %v1066_v59 = vunpack.c.h.s8.bf16 %v954_v51 }
 0x1c1   : > { %2096 = vmatmul.mubr.bf16.gmra.mrb[48].mxu1 %v1021_v60  ;;  %v732_v60 = vld [vmem:[%s5981_s26 + $0x78] sm:$0xff] }
 0x1c2   : > { %2103 = vmatprep.mubr.bf16.mxu1 %v1026_v61  ;;  %v803_v61 = vunpack.c.h.s8.bf16 %v727_v54  ;;  %v808_v62 = vunpack.c.l.s8.bf16 %v732_v60  ;;  %v812_v6 = vunpack.c.h.s8.bf16 %v732_v60 }
 0x1c6   : > { %1542 = vmatmul.mubr.bf16.gmra.mrb[108].mxu0 %v889_v63  ;;  %v958_v63 = vld [vmem:[%s5983_s29 + $0x188] sm:$0xff] }
 0x1c7   : > { %1549 = vmatprep.mubr.bf16.mxu0 %v894_v1  ;;  %v1070_v1 = vunpack.c.l.s8.bf16 %v958_v63  ;;  %v1074_v8 = vunpack.c.h.s8.bf16 %v958_v63 }
 0x1c9   : > { %2104 = vmatmul.mubr.bf16.gmra.mrb[52].mxu1 %v1025_v4  ;;  %v807_v4 = vunpack.c.l.s8.bf16 %v731_v3 }
 0x1ca   : > { %2111 = vmatprep.mubr.bf16.mxu1 %v1030_v5  ;;  %v957_v5 = vld [vmem:[%s5983_s29 + $0x180] sm:$0xff] }
 0x1ce   : > { %1550 = vmatmul.mubr.bf16.gmra.mrb[112].mxu0 %v893_v7  ;;  %v1069_v7 = vunpack.c.l.s8.bf16 %v957_v5 }
 0x1cf   : > { %1557 = vmatprep.mubr.bf16.mxu0 %v898_v9  ;;  %v736_v9 = vld [vmem:[%s5981_s26 + $0x98] sm:$0xff] }
 0x1d1   : > { %2112 = vmatmul.mubr.bf16.gmra.mrb[56].mxu1 %v1029_v10  ;;  %v811_v10 = vunpack.c.h.s8.bf16 %v731_v3 }
 0x1d2   : > { %2119 = vmatprep.mubr.bf16.mxu1 %v1034_v11  ;;  %v816_v11 = vunpack.c.l.s8.bf16 %v736_v9 }
 0x1d6   : > { %1558 = vmatmul.mubr.bf16.gmra.mrb[116].mxu0 %v897_v2  ;;  %v1073_v2 = vunpack.c.h.s8.bf16 %v957_v5  ;;  %v756_v5 = vld [vmem:[%s5981_s26 + $0x138] sm:$0xff] }
 0x1d7   : > { %1565 = vmatprep.mubr.bf16.mxu0 %v902_v14  ;;  %v735_v14 = vld [vmem:[%s5981_s26 + $0x90] sm:$0xff] }
 0x1d8   : > { %v815_v15 = vunpack.c.l.s8.bf16 %v735_v14 }
 0x1d9   : > { %2120 = vmatmul.mubr.bf16.gmra.mrb[60].mxu1 %v1033_v16  ;;  %v961_v16 = vld [vmem:[%s5983_s29 + $0x1a0] sm:$0xff] }
 0x1da   : > { %2127 = vmatprep.mubr.bf16.mxu1 %v1038_v17  ;;  %v820_v17 = vunpack.c.h.s8.bf16 %v736_v9  ;;  %v1077_v18 = vunpack.c.l.s8.bf16 %v961_v16  ;;  %v1081_v24 = vunpack.c.h.s8.bf16 %v961_v16  ;;  %v760_v16 = vld [vmem:[%s5981_s26 + $0x158] sm:$0xff] }
 0x1de   : > { %1566 = vmatmul.mubr.bf16.gmra.mrb[120].mxu0 %v901_v19  ;;  %v1082_v19 = vunpack.c.h.s8.bf16 %v962_v12 }
 0x1df   : > { %1573 = vmatprep.mubr.bf16.mxu0 %v906_v21  ;;  %v819_v21 = vunpack.c.h.s8.bf16 %v735_v14 }
 0x1e1   : > { %2128 = vmatmul.mubr.bf16.gmra.mrb[64].mxu1 %v1037_v22  ;;  %v824_v22 = vunpack.c.l.s8.bf16 %v740_v20 }
 0x1e2   : > { %2135 = vmatprep.mubr.bf16.mxu1 %v1042_v23  ;;  %v966_v23 = vld [vmem:[%s5983_s29 + $0x1c8] sm:$0xff] }
 0x1e6   : > { %1574 = vmatmul.mubr.bf16.gmra.mrb[124].mxu0 %v905_v25  ;;  %v1086_v25 = vunpack.c.l.s8.bf16 %v966_v23 }
 0x1e7   : > { %1614 = vmatprep.mubr.bf16.mxu0 %v784_v26  ;;  %v739_v26 = vld [vmem:[%s5981_s26 + $0xb0] sm:$0xff] }
 0x1e8   : > { %v823_v28 = vunpack.c.l.s8.bf16 %v739_v26 }
 0x1e9   : > { %2136 = vmatmul.mubr.bf16.gmra.mrb[68].mxu1 %v1041_v29  ;;  %v965_v29 = vld [vmem:[%s5983_s29 + $0x1c0] sm:$0xff] }
 0x1ea   : > { %2143 = vmatprep.mubr.bf16.mxu1 %v1046_v30  ;;  %v828_v30 = vunpack.c.h.s8.bf16 %v740_v20  ;;  %v1085_v31 = vunpack.c.l.s8.bf16 %v965_v29  ;;  %v1089_v37 = vunpack.c.h.s8.bf16 %v965_v29  ;;  %v764_v29 = vld [vmem:[%s5981_s26 + $0x178] sm:$0xff] }
 0x1ee   : > { %1615 = vmatmul.mubr.bf16.vlgmr.msra.gmra.mrb[0].mxu0 %v783_v32  ;;  %v1090_v32 = vunpack.c.h.s8.bf16 %v966_v23 }
 0x1ef   : > { %1622 = vmatprep.mubr.bf16.mxu0 %v788_v34  ;;  %v827_v34 = vunpack.c.h.s8.bf16 %v739_v26 }
 0x1f1   : > { %2144 = vmatmul.mubr.bf16.gmra.mrb[72].mxu1 %v1045_v35  ;;  %v832_v35 = vunpack.c.l.s8.bf16 %v744_v33 }
 0x1f2   : > { %2151 = vmatprep.mubr.bf16.mxu1 %v1050_v36  ;;  %v970_v36 = vld [vmem:[%s5983_s29 + $0x1e8] sm:$0xff] }
 0x1f6   : > { %1623 = vmatmul.mubr.bf16.gmra.mrb[4].mxu0 %v787_v38  ;;  %v1094_v38 = vunpack.c.l.s8.bf16 %v970_v36 }
 0x1f7   : > { %1630 = vmatprep.mubr.bf16.mxu0 %v792_v39  ;;  %v743_v39 = vld [vmem:[%s5981_s26 + $0xd0] sm:$0xff] }
 0x1f8   : > { %v831_v40 = vunpack.c.l.s8.bf16 %v743_v39 }
 0x1f9   : > { %2152 = vmatmul.mubr.bf16.gmra.mrb[76].mxu1 %v1049_v41  ;;  %v969_v41 = vld [vmem:[%s5983_s29 + $0x1e0] sm:$0xff] }
 0x1fa   : > { %2159 = vmatprep.mubr.bf16.mxu1 %v1054_v42  ;;  %v836_v42 = vunpack.c.h.s8.bf16 %v744_v33  ;;  %v1093_v43 = vunpack.c.l.s8.bf16 %v969_v41  ;;  %v1097_v48 = vunpack.c.h.s8.bf16 %v969_v41  ;;  %v768_v41 = vld [vmem:[%s5981_s26 + $0x198] sm:$0xff] }
 0x1fe   : > { %1631 = vmatmul.mubr.bf16.gmra.mrb[8].mxu0 %v791_v44  ;;  %v1098_v44 = vunpack.c.h.s8.bf16 %v970_v36 }
 0x1ff   : > { %1638 = vmatprep.mubr.bf16.mxu0 %v796_v27  ;;  %v835_v27 = vunpack.c.h.s8.bf16 %v743_v39 }
 0x201   : > { %2160 = vmatmul.mubr.bf16.gmra.mrb[80].mxu1 %v1053_v46  ;;  %v840_v46 = vunpack.c.l.s8.bf16 %v748_v45 }
 0x202   : > { %2167 = vmatprep.mubr.bf16.mxu1 %v1058_v47  ;;  %v912_v47 = vld [vmem:[%s5983_s29 + $0x18] sm:$0xff] }
 0x206   : > { %1639 = vmatmul.mubr.bf16.gmra.mrb[12].mxu0 %v795_v49  ;;  %v976_v49 = vunpack.c.l.s8.bf16 %v912_v47 }
 0x207   : > { %1646 = vmatprep.mubr.bf16.mxu0 %v800_v50  ;;  %v747_v50 = vld [vmem:[%s5981_s26 + $0xf0] sm:$0xff] }
 0x208   : > { %v839_v51 = vunpack.c.l.s8.bf16 %v747_v50 }
 0x209   : > { %2168 = vmatmul.mubr.bf16.gmra.mrb[84].mxu1 %v1057_v52  ;;  %v911_v52 = vld [vmem:[%s5983_s29 + $0x10] sm:$0xff] }
 0x20a   : > { %2175 = vmatprep.mubr.bf16.mxu1 %v1062_v53  ;;  %v844_v53 = vunpack.c.h.s8.bf16 %v748_v45  ;;  %v975_v54 = vunpack.c.l.s8.bf16 %v911_v52  ;;  %v979_v60 = vunpack.c.h.s8.bf16 %v911_v52  ;;  %v772_v52 = vld [vmem:[%s5981_s26 + $0x1b8] sm:$0xff] }
 0x20e   : > { %1647 = vmatmul.mubr.bf16.gmra.mrb[16].mxu0 %v799_v55  ;;  %v980_v55 = vunpack.c.h.s8.bf16 %v912_v47 }
 0x20f   : > { %1654 = vmatprep.mubr.bf16.mxu0 %v804_v57  ;;  %v843_v57 = vunpack.c.h.s8.bf16 %v747_v50 }
 0x211   : > { %2176 = vmatmul.mubr.bf16.gmra.mrb[88].mxu1 %v1061_v58  ;;  %v848_v58 = vunpack.c.l.s8.bf16 %v752_v56 }
 0x212   : > { %2183 = vmatprep.mubr.bf16.mxu1 %v1066_v59  ;;  %v916_v59 = vld [vmem:[%s5983_s29 + $0x38] sm:$0xff] }
 0x216   : > { %1655 = vmatmul.mubr.bf16.gmra.mrb[20].mxu0 %v803_v61  ;;  %v984_v61 = vunpack.c.l.s8.bf16 %v916_v59 }
 0x217   : > { %1662 = vmatprep.mubr.bf16.mxu0 %v808_v62  ;;  %v751_v62 = vld [vmem:[%s5981_s26 + $0x110] sm:$0xff] }
 0x218   : > { %v847_v63 = vunpack.c.l.s8.bf16 %v751_v62 }
 0x219   : > { %2184 = vmatmul.mubr.bf16.gmra.mrb[92].mxu1 %v1065_v0  ;;  %v915_v0 = vld [vmem:[%s5983_s29 + $0x30] sm:$0xff] }
 0x21a   : > { %2191 = vmatprep.mubr.bf16.mxu1 %v1070_v1  ;;  %v852_v1 = vunpack.c.h.s8.bf16 %v752_v56  ;;  %v983_v3 = vunpack.c.l.s8.bf16 %v915_v0  ;;  %v987_v9 = vunpack.c.h.s8.bf16 %v915_v0  ;;  %v776_v0 = vld [vmem:[%s5981_s26 + $0x1d8] sm:$0xff] }
 0x21e   : > { %1663 = vmatmul.mubr.bf16.gmra.mrb[24].mxu0 %v807_v4  ;;  %v988_v4 = vunpack.c.h.s8.bf16 %v916_v59 }
 0x21f   : > { %1670 = vmatprep.mubr.bf16.mxu0 %v812_v6  ;;  %v851_v6 = vunpack.c.h.s8.bf16 %v751_v62 }
 0x221   : > { %2192 = vmatmul.mubr.bf16.gmra.mrb[96].mxu1 %v1069_v7  ;;  %v856_v7 = vunpack.c.l.s8.bf16 %v756_v5 }
 0x222   : > { %2199 = vmatprep.mubr.bf16.mxu1 %v1074_v8  ;;  %v920_v8 = vld [vmem:[%s5983_s29 + $0x58] sm:$0xff] }
 0x226   : > { %1671 = vmatmul.mubr.bf16.gmra.mrb[28].mxu0 %v811_v10  ;;  %v992_v10 = vunpack.c.l.s8.bf16 %v920_v8 }
 0x227   : > { %1678 = vmatprep.mubr.bf16.mxu0 %v816_v11  ;;  %v755_v11 = vld [vmem:[%s5981_s26 + $0x130] sm:$0xff] }
 0x228   : > { %v855_v12 = vunpack.c.l.s8.bf16 %v755_v11 }
 0x229   : > { %2200 = vmatmul.mubr.bf16.gmra.mrb[100].mxu1 %v1073_v2  ;;  %v919_v2 = vld [vmem:[%s5983_s29 + $0x50] sm:$0xff] }
 0x22a   : > { %2207 = vmatprep.mubr.bf16.mxu1 %v1078_v13  ;;  %v860_v13 = vunpack.c.h.s8.bf16 %v756_v5  ;;  %v991_v14 = vunpack.c.l.s8.bf16 %v919_v2  ;;  %v995_v20 = vunpack.c.h.s8.bf16 %v919_v2 }
 0x22e   : > { %1679 = vmatmul.mubr.bf16.gmra.mrb[32].mxu0 %v815_v15  ;;  %v996_v15 = vunpack.c.h.s8.bf16 %v920_v8 }
 0x22f   : > { %1686 = vmatprep.mubr.bf16.mxu0 %v820_v17  ;;  %v859_v17 = vunpack.c.h.s8.bf16 %v755_v11  ;;  %v775_v11 = vld [vmem:[%s5981_s26 + $0x1d0] sm:$0xff] }
 0x231   : > { %2208 = vmatmul.mubr.bf16.gmra.mrb[104].mxu1 %v1077_v18  ;;  %v864_v18 = vunpack.c.l.s8.bf16 %v760_v16 }
 0x232   : > { %2215 = vmatprep.mubr.bf16.mxu1 %v1082_v19  ;;  %v924_v19 = vld [vmem:[%s5983_s29 + $0x78] sm:$0xff] }
 0x236   : > { %1687 = vmatmul.mubr.bf16.gmra.mrb[36].mxu0 %v819_v21  ;;  %v1000_v21 = vunpack.c.l.s8.bf16 %v924_v19 }
 0x237   : > { %1694 = vmatprep.mubr.bf16.mxu0 %v824_v22  ;;  %v759_v22 = vld [vmem:[%s5981_s26 + $0x150] sm:$0xff] }
 0x238   : > { %v863_v23 = vunpack.c.l.s8.bf16 %v759_v22 }
 0x239   : > { %2216 = vmatmul.mubr.bf16.gmra.mrb[108].mxu1 %v1081_v24  ;;  %v923_v24 = vld [vmem:[%s5983_s29 + $0x70] sm:$0xff] }
 0x23a   : > { %2223 = vmatprep.mubr.bf16.mxu1 %v1086_v25  ;;  %v868_v25 = vunpack.c.h.s8.bf16 %v760_v16  ;;  %v999_v26 = vunpack.c.l.s8.bf16 %v923_v24  ;;  %v1003_v33 = vunpack.c.h.s8.bf16 %v923_v24  ;;  %v900_v16 = vunpack.c.h.s8.bf16 %v776_v0 }
 0x23e   : > { %1695 = vmatmul.mubr.bf16.gmra.mrb[40].mxu0 %v823_v28  ;;  %v1004_v28 = vunpack.c.h.s8.bf16 %v924_v19 }
 0x23f   : > { %1702 = vmatprep.mubr.bf16.mxu0 %v828_v30  ;;  %v867_v30 = vunpack.c.h.s8.bf16 %v759_v22 }
 0x241   : > { %2224 = vmatmul.mubr.bf16.gmra.mrb[112].mxu1 %v1085_v31  ;;  %v872_v31 = vunpack.c.l.s8.bf16 %v764_v29 }
 0x242   : > { %2231 = vmatprep.mubr.bf16.mxu1 %v1090_v32  ;;  %v928_v32 = vld [vmem:[%s5983_s29 + $0x98] sm:$0xff] }
 0x246   : > { %1703 = vmatmul.mubr.bf16.gmra.mrb[44].mxu0 %v827_v34  ;;  %v1008_v34 = vunpack.c.l.s8.bf16 %v928_v32 }
 0x247   : > { %1710 = vmatprep.mubr.bf16.mxu0 %v832_v35  ;;  %v763_v35 = vld [vmem:[%s5981_s26 + $0x170] sm:$0xff] }
 0x248   : > { %v871_v36 = vunpack.c.l.s8.bf16 %v763_v35 }
 0x249   : > { %2232 = vmatmul.mubr.bf16.gmra.mrb[116].mxu1 %v1089_v37  ;;  %v927_v37 = vld [vmem:[%s5983_s29 + $0x90] sm:$0xff] }
 0x24a   : > { %2239 = vmatprep.mubr.bf16.mxu1 %v1094_v38  ;;  %v876_v38 = vunpack.c.h.s8.bf16 %v764_v29  ;;  %v1007_v39 = vunpack.c.l.s8.bf16 %v927_v37  ;;  %v1011_v45 = vunpack.c.h.s8.bf16 %v927_v37 }
 0x24e   : > { %1711 = vmatmul.mubr.bf16.gmra.mrb[48].mxu0 %v831_v40  ;;  %v1012_v40 = vunpack.c.h.s8.bf16 %v928_v32 }
 0x24f   : > { %1718 = vmatprep.mubr.bf16.mxu0 %v836_v42  ;;  %v875_v42 = vunpack.c.h.s8.bf16 %v763_v35  ;;  %v943_v35 = vld [vmem:[%s5983_s29 + $0x110] sm:$0xff] }
 0x251   : > { %2240 = vmatmul.mubr.bf16.gmra.mrb[120].mxu1 %v1093_v43  ;;  %v880_v43 = vunpack.c.l.s8.bf16 %v768_v41 }
 0x252   : > { %2247 = vmatprep.mubr.bf16.mxu1 %v1098_v44  ;;  %v932_v44 = vld [vmem:[%s5983_s29 + $0xb8] sm:$0xff] }
 0x256   : > { %1719 = vmatmul.mubr.bf16.gmra.mrb[52].mxu0 %v835_v27  ;;  %v1016_v27 = vunpack.c.l.s8.bf16 %v932_v44 }
 0x257   : > { %1726 = vmatprep.mubr.bf16.mxu0 %v840_v46  ;;  %v767_v46 = vld [vmem:[%s5981_s26 + $0x190] sm:$0xff] }
 0x258   : > { %v879_v47 = vunpack.c.l.s8.bf16 %v767_v46 }
 0x259   : > { %2248 = vmatmul.mubr.bf16.gmra.mrb[124].mxu1 %v1097_v48  ;;  %v931_v48 = vld [vmem:[%s5983_s29 + $0xb0] sm:$0xff] }
 0x25a   : > { %2288 = vmatprep.mubr.bf16.mxu1 %v976_v49  ;;  %v884_v49 = vunpack.c.h.s8.bf16 %v768_v41  ;;  %v1015_v50 = vunpack.c.l.s8.bf16 %v931_v48  ;;  %v1019_v56 = vunpack.c.h.s8.bf16 %v931_v48 }
 0x25e   : > { %1727 = vmatmul.mubr.bf16.gmra.mrb[56].mxu0 %v839_v51  ;;  %v1020_v51 = vunpack.c.h.s8.bf16 %v932_v44 }
 0x25f   : > { %1734 = vmatprep.mubr.bf16.mxu0 %v844_v53  ;;  %v883_v53 = vunpack.c.h.s8.bf16 %v767_v46  ;;  %v1043_v46 = vunpack.c.h.s8.bf16 %v943_v35 }
 0x261   : > { %2289 = vmatmul.mubr.bf16.vlgmr.msra.gmra.mrb[0].mxu1 %v975_v54  ;;  %v888_v54 = vunpack.c.l.s8.bf16 %v772_v52 }
 0x262   : > { %2296 = vmatprep.mubr.bf16.mxu1 %v980_v55  ;;  %v936_v55 = vld [vmem:[%s5983_s29 + $0xd8] sm:$0xff] }
 0x266   : > { %1735 = vmatmul.mubr.bf16.gmra.mrb[60].mxu0 %v843_v57  ;;  %v1024_v57 = vunpack.c.l.s8.bf16 %v936_v55 }
 0x267   : > { %1742 = vmatprep.mubr.bf16.mxu0 %v848_v58  ;;  %v771_v58 = vld [vmem:[%s5981_s26 + $0x1b0] sm:$0xff] }
 0x268   : > { %v887_v59 = vunpack.c.l.s8.bf16 %v771_v58 }
 0x269   : > { %2297 = vmatmul.mubr.bf16.gmra.mrb[4].mxu1 %v979_v60  ;;  %v935_v60 = vld [vmem:[%s5983_s29 + $0xd0] sm:$0xff] }
 0x26a   : > { %2304 = vmatprep.mubr.bf16.mxu1 %v984_v61  ;;  %v892_v61 = vunpack.c.h.s8.bf16 %v772_v52  ;;  %v1023_v62 = vunpack.c.l.s8.bf16 %v935_v60 }
 0x26e   : > { %1743 = vmatmul.mubr.bf16.gmra.mrb[64].mxu0 %v847_v63  ;;  %v1028_v63 = vunpack.c.h.s8.bf16 %v936_v55 }
 0x26f   : > { %1750 = vmatprep.mubr.bf16.mxu0 %v852_v1 }
 0x271   : > { %2305 = vmatmul.mubr.bf16.gmra.mrb[8].mxu1 %v983_v3 }
 0x272   : > { %2312 = vmatprep.mubr.bf16.mxu1 %v988_v4  ;;  %v891_v4 = vunpack.c.h.s8.bf16 %v771_v58  ;;  %v952_v58 = vld [vmem:[%s5983_s29 + $0x158] sm:$0xff] }
 0x276   : > { %1751 = vmatmul.mubr.bf16.gmra.mrb[68].mxu0 %v851_v6  ;;  %v896_v6 = vunpack.c.l.s8.bf16 %v776_v0  ;;  %v951_v0 = vld [vmem:[%s5983_s29 + $0x150] sm:$0xff] }
 0x277   : > { %1758 = vmatprep.mubr.bf16.mxu0 %v856_v7  ;;  %v940_v7 = vld [vmem:[%s5983_s29 + $0xf8] sm:$0xff] }
 0x278   : > { %v1036_v19 = vunpack.c.h.s8.bf16 %v940_v7 }
 0x279   : > { %2313 = vmatmul.mubr.bf16.gmra.mrb[12].mxu1 %v987_v9  ;;  %v1027_v9 = vunpack.c.h.s8.bf16 %v935_v60 }
 0x27a   : > { %2320 = vmatprep.mubr.bf16.mxu1 %v992_v10  ;;  %v1032_v10 = vunpack.c.l.s8.bf16 %v940_v7  ;;  %v1060_v7 = vunpack.c.h.s8.bf16 %v952_v58 }
 0x27e   : > { %1759 = vmatmul.mubr.bf16.gmra.mrb[72].mxu0 %v855_v12 }
 0x27f   : > { %1766 = vmatprep.mubr.bf16.mxu0 %v860_v13  ;;  %v895_v13 = vunpack.c.l.s8.bf16 %v775_v11 }
 0x281   : > { %2321 = vmatmul.mubr.bf16.gmra.mrb[16].mxu1 %v991_v14  ;;  %v939_v14 = vld [vmem:[%s5983_s29 + $0xf0] sm:$0xff] }
 0x282   : > { %2328 = vmatprep.mubr.bf16.mxu1 %v996_v15  ;;  %v1035_v29 = vunpack.c.h.s8.bf16 %v939_v14 }
 0x286   : > { %1767 = vmatmul.mubr.bf16.gmra.mrb[76].mxu0 %v859_v17 }
 0x287   : > { %1774 = vmatprep.mubr.bf16.mxu0 %v864_v18  ;;  %v1031_v18 = vunpack.c.l.s8.bf16 %v939_v14 }
 0x289   : > { %2329 = vmatmul.mubr.bf16.gmra.mrb[20].mxu1 %v995_v20  ;;  %v780_v20 = vld [vmem:[%s5981_s26 + $0x1f8] sm:$0xff] }
 0x28a   : > { %2336 = vmatprep.mubr.bf16.mxu1 %v1000_v21  ;;  %v908_v37 = vunpack.c.h.s8.bf16 %v780_v20 }
 0x28e   : > { %1775 = vmatmul.mubr.bf16.gmra.mrb[80].mxu0 %v863_v23  ;;  %v899_v23 = vunpack.c.h.s8.bf16 %v775_v11  ;;  %v956_v11 = vld [vmem:[%s5983_s29 + $0x178] sm:$0xff] }
 0x28f   : > { %1782 = vmatprep.mubr.bf16.mxu0 %v868_v25  ;;  %v904_v25 = vunpack.c.l.s8.bf16 %v780_v20  ;;  %v1064_v14 = vunpack.c.l.s8.bf16 %v956_v11 }
 0x291   : > { %2337 = vmatmul.mubr.bf16.gmra.mrb[24].mxu1 %v999_v26  ;;  %v944_v26 = vld [vmem:[%s5983_s29 + $0x118] sm:$0xff] }
 0x292   : > { %2344 = vmatprep.mubr.bf16.mxu1 %v1004_v28 }
 0x296   : > { %1783 = vmatmul.mubr.bf16.gmra.mrb[84].mxu0 %v867_v30  ;;  %v1040_v30 = vunpack.c.l.s8.bf16 %v944_v26 }
 0x297   : > { %1790 = vmatprep.mubr.bf16.mxu0 %v872_v31  ;;  %v779_v31 = vld [vmem:[%s5981_s26 + $0x1f0] sm:$0xff]  ;;  %s5656_s26 = smov 32  }
 0x299   : > { %2345 = vmatmul.mubr.bf16.gmra.mrb[28].mxu1 %v1003_v33 }
 0x29a   : > { %2352 = vmatprep.mubr.bf16.mxu1 %v1008_v34  ;;  %v903_v34 = vunpack.c.l.s8.bf16 %v779_v31 }
 0x29e   : > { %1791 = vmatmul.mubr.bf16.gmra.mrb[88].mxu0 %v871_v36 }
 0x29f   : > { %1798 = vmatprep.mubr.bf16.mxu0 %v876_v38 }
 0x2a1   : > { %2353 = vmatmul.mubr.bf16.gmra.mrb[32].mxu1 %v1007_v39  ;;  %v1039_v39 = vunpack.c.l.s8.bf16 %v943_v35 }
 0x2a2   : > { %2360 = vmatprep.mubr.bf16.mxu1 %v1012_v40  ;;  %v1044_v40 = vunpack.c.h.s8.bf16 %v944_v26 }
 0x2a6   : > { %1799 = vmatmul.mubr.bf16.gmra.mrb[92].mxu0 %v875_v42 }
 0x2a7   : > { %1806 = vmatprep.mubr.bf16.mxu0 %v880_v43  ;;  %v907_v43 = vunpack.c.h.s8.bf16 %v779_v31 }
 0x2a9   : > { %2361 = vmatmul.mubr.bf16.gmra.mrb[36].mxu1 %v1011_v45  ;;  %v948_v45 = vld [vmem:[%s5983_s29 + $0x138] sm:$0xff] }
 0x2aa   : > { %2368 = vmatprep.mubr.bf16.mxu1 %v1016_v27 }
 0x2ae   : > { %1807 = vmatmul.mubr.bf16.gmra.mrb[96].mxu0 %v879_v47  ;;  %v1048_v47 = vunpack.c.l.s8.bf16 %v948_v45 }
 0x2af   : > { %1814 = vmatprep.mubr.bf16.mxu0 %v884_v49 }
 0x2b1   : > { %2369 = vmatmul.mubr.bf16.gmra.mrb[40].mxu1 %v1015_v50  ;;  %v947_v50 = vld [vmem:[%s5983_s29 + $0x130] sm:$0xff] }
 0x2b2   : > { %2376 = vmatprep.mubr.bf16.mxu1 %v1020_v51  ;;  %v1051_v60 = vunpack.c.h.s8.bf16 %v947_v50 }
 0x2b6   : > { %1815 = vmatmul.mubr.bf16.gmra.mrb[100].mxu0 %v883_v53  ;;  %v1047_v53 = vunpack.c.l.s8.bf16 %v947_v50 }
 0x2b7   : > { %1822 = vmatprep.mubr.bf16.mxu0 %v888_v54  ;;  %v1052_v54 = vunpack.c.h.s8.bf16 %v948_v45 }
 0x2b9   : > { %2377 = vmatmul.mubr.bf16.gmra.mrb[44].mxu1 %v1019_v56 }
 0x2ba   : > { %2384 = vmatprep.mubr.bf16.mxu1 %v1024_v57 }
 0x2be   : > { %1823 = vmatmul.mubr.bf16.gmra.mrb[104].mxu0 %v887_v59 }
 0x2bf   : > { %1830 = vmatprep.mubr.bf16.mxu0 %v892_v61  ;;  %v1056_v61 = vunpack.c.l.s8.bf16 %v952_v58 }
 0x2c1   : > { %v6383_v1 = vpop.f32.mrb[0].mxu0  ;;  %2385 = vmatmul.mubr.bf16.gmra.mrb[48].mxu1 %v1023_v62 }
 0x2c2   : > { %v1618_v3 = vpop.f32.mrb[1].mxu0  ;;  %2392 = vmatprep.mubr.bf16.mxu1 %v1028_v63 }
 0x2c3   : > { %v6385_v5 = vpop.f32.mrb[2].mxu0 }
 0x2c4   : > { %v1621_v8 = vpop.f32.mrb[3].mxu0 }
 0x2c6   : > { %1831 = vmatmul.mubr.bf16.gmra.mrb[108].mxu0 %v891_v4 }
 0x2c7   : > { %1838 = vmatprep.mubr.bf16.mxu0 %v896_v6  ;;  %v1055_v6 = vunpack.c.l.s8.bf16 %v951_v0 }
 0x2c9   : > { %v6389_v12 = vpop.f32.mrb[4].mxu0  ;;  %2393 = vmatmul.mubr.bf16.gmra.mrb[52].mxu1 %v1027_v9 }
 0x2ca   : > { %v1626_v2 = vpop.f32.mrb[5].mxu0  ;;  %2400 = vmatprep.mubr.bf16.mxu1 %v1032_v10 }
 0x2cb   : > { %v6392_v15 = vpop.f32.mrb[6].mxu0 }
 0x2cc   : > { %v1629_v17 = vpop.f32.mrb[7].mxu0 }
 0x2ce   : > { %1839 = vmatmul.mubr.bf16.gmra.mrb[112].mxu0 %v895_v13  ;;  %v1059_v13 = vunpack.c.h.s8.bf16 %v951_v0 }
 0x2cf   : > { %1846 = vmatprep.mubr.bf16.mxu0 %v900_v16 }
 0x2d1   : > { %v6395_v21 = vpop.f32.mrb[8].mxu0  ;;  %2401 = vmatmul.mubr.bf16.gmra.mrb[56].mxu1 %v1031_v18  ;;  %v955_v18 = vld [vmem:[%s5983_s29 + $0x170] sm:$0xff] }
 0x2d2   : > { %v1634_v22 = vpop.f32.mrb[9].mxu0  ;;  %2408 = vmatprep.mubr.bf16.mxu1 %v1036_v19  ;;  %v1067_v31 = vunpack.c.h.s8.bf16 %v955_v18 }
 0x2d3   : > { %v6397_v24 = vpop.f32.mrb[10].mxu0  ;;  %v1063_v22 = vunpack.c.l.s8.bf16 %v955_v18 }
 0x2d4   : > { %v1637_v28 = vpop.f32.mrb[11].mxu0 }
 0x2d6   : > { %1847 = vmatmul.mubr.bf16.gmra.mrb[116].mxu0 %v899_v23  ;;  %v1068_v23 = vunpack.c.h.s8.bf16 %v956_v11 }
 0x2d7   : > { %1854 = vmatprep.mubr.bf16.mxu0 %v904_v25 }
 0x2d9   : > { %v6401_v32 = vpop.f32.mrb[12].mxu0  ;;  %2409 = vmatmul.mubr.bf16.gmra.mrb[60].mxu1 %v1035_v29  ;;  %v960_v29 = vld [vmem:[%s5983_s29 + $0x198] sm:$0xff] }
 0x2da   : > { %v1642_v33 = vpop.f32.mrb[13].mxu0  ;;  %2416 = vmatprep.mubr.bf16.mxu1 %v1040_v30 }
 0x2db   : > { %v6404_v36 = vpop.f32.mrb[14].mxu0  ;;  %v1072_v33 = vunpack.c.l.s8.bf16 %v960_v29 }
 0x2dc   : > { %v1645_v38 = vpop.f32.mrb[15].mxu0 }
 0x2de   : > { %1855 = vmatmul.mubr.bf16.gmra.mrb[120].mxu0 %v903_v34 }
 0x2df   : > { %1862 = vmatprep.mubr.bf16.mxu0 %v908_v37  ;;  %v959_v37 = vld [vmem:[%s5983_s29 + $0x190] sm:$0xff] }
 0x2e1   : > { %v6406_v41 = vpop.f32.mrb[16].mxu0  ;;  %2417 = vmatmul.mubr.bf16.gmra.mrb[64].mxu1 %v1039_v39 }
 0x2e2   : > { %v1650_v42 = vpop.f32.mrb[17].mxu0  ;;  %2424 = vmatprep.mubr.bf16.mxu1 %v1044_v40  ;;  %v1071_v40 = vunpack.c.l.s8.bf16 %v959_v37 }
 0x2e3   : > { %v6408_v44 = vpop.f32.mrb[18].mxu0  ;;  %v1076_v42 = vunpack.c.h.s8.bf16 %v960_v29 }
 0x2e4   : > { %v1653_v27 = vpop.f32.mrb[19].mxu0 }
 0x2e6   : > { %1863 = vmatmul.mubr.bf16.gmra.mrb[124].mxu0 %v907_v43 }
 0x2e9   : > { %v6411_v48 = vpop.f32.mrb[20].mxu0  ;;  %2425 = vmatmul.mubr.bf16.gmra.mrb[68].mxu1 %v1043_v46  ;;  %v964_v46 = vld [vmem:[%s5983_s29 + $0x1b8] sm:$0xff] }
 0x2ea   : > { %v1658_v49 = vpop.f32.mrb[21].mxu0  ;;  %2432 = vmatprep.mubr.bf16.mxu1 %v1048_v47  ;;  %v1080_v50 = vunpack.c.l.s8.bf16 %v964_v46 }
 0x2eb   : > { %v6414_v51 = vpop.f32.mrb[22].mxu0  ;;  %v1075_v49 = vunpack.c.h.s8.bf16 %v959_v37 }
 0x2ec   : > { %v1661_v52 = vpop.f32.mrb[23].mxu0 }
 0x2f1   : > { %v6416_v55 = vpop.f32.mrb[24].mxu0  ;;  %2433 = vmatmul.mubr.bf16.gmra.mrb[72].mxu1 %v1047_v53 }
 0x2f2   : > { %v1666_v56 = vpop.f32.mrb[25].mxu0  ;;  %2440 = vmatprep.mubr.bf16.mxu1 %v1052_v54  ;;  %v963_v54 = vld [vmem:[%s5983_s29 + $0x1b0] sm:$0xff] }
 0x2f3   : > { %v6418_v57 = vpop.f32.mrb[26].mxu0  ;;  %v1083_v11 = vunpack.c.h.s8.bf16 %v963_v54 }
 0x2f4   : > { %v1669_v59 = vpop.f32.mrb[27].mxu0 }
 0x2f5   : > { %v1079_v59 = vunpack.c.l.s8.bf16 %v963_v54 }
 0x2f9   : > { %v6421_v62 = vpop.f32.mrb[28].mxu0  ;;  %2441 = vmatmul.mubr.bf16.gmra.mrb[76].mxu1 %v1051_v60  ;;  %v1084_v60 = vunpack.c.h.s8.bf16 %v964_v46 }
 0x2fa   : > { %v1674_v63 = vpop.f32.mrb[29].mxu0  ;;  %2448 = vmatprep.mubr.bf16.mxu1 %v1056_v61 }
 0x2fb   : > { %v6424_v3 = vpop.f32.mrb[30].mxu0 }
 0x2fc   : > { %v1677_v4 = vpop.f32.mrb[31].mxu0 }
 0x2fd   : > { %v968_v4 = vld [vmem:[%s5983_s29 + $0x1d8] sm:$0xff] }
 0x301   : > { %v6426_v8 = vpop.f32.mrb[32].mxu0  ;;  %2449 = vmatmul.mubr.bf16.gmra.mrb[80].mxu1 %v1055_v6 }
 0x302   : > { %v1682_v9 = vpop.f32.mrb[33].mxu0  ;;  %2456 = vmatprep.mubr.bf16.mxu1 %v1060_v7 }
 0x303   : > { %v6428_v10 = vpop.f32.mrb[34].mxu0 }
 0x304   : > { %v1685_v2 = vpop.f32.mrb[35].mxu0 }
 0x309   : > { %v6431_v16 = vpop.f32.mrb[36].mxu0  ;;  %2457 = vmatmul.mubr.bf16.gmra.mrb[84].mxu1 %v1059_v13  ;;  %v1088_v13 = vunpack.c.l.s8.bf16 %v968_v4 }
 0x30a   : > { %v1690_v17 = vpop.f32.mrb[37].mxu0  ;;  %2464 = vmatprep.mubr.bf16.mxu1 %v1064_v14 }
 0x30b   : > { %v6434_v19 = vpop.f32.mrb[38].mxu0 }
 0x30c   : > { %v1693_v20 = vpop.f32.mrb[39].mxu0 }
 0x30d   : > { %v967_v20 = vld [vmem:[%s5983_s29 + $0x1d0] sm:$0xff] }
 0x311   : > { %v6436_v25 = vpop.f32.mrb[40].mxu0  ;;  %2465 = vmatmul.mubr.bf16.gmra.mrb[88].mxu1 %v1063_v22 }
 0x312   : > { %v1698_v26 = vpop.f32.mrb[41].mxu0  ;;  %2472 = vmatprep.mubr.bf16.mxu1 %v1068_v23 }
 0x313   : > { %v6438_v28 = vpop.f32.mrb[42].mxu0 }
 0x314   : > { %v1701_v30 = vpop.f32.mrb[43].mxu0 }
 0x315   : > { %v1087_v30 = vunpack.c.l.s8.bf16 %v967_v20 }
 0x319   : > { %v6441_v34 = vpop.f32.mrb[44].mxu0  ;;  %2473 = vmatmul.mubr.bf16.gmra.mrb[92].mxu1 %v1067_v31 }
 0x31a   : > { %v1706_v35 = vpop.f32.mrb[45].mxu0  ;;  %2480 = vmatprep.mubr.bf16.mxu1 %v1072_v33  ;;  %v1092_v33 = vunpack.c.h.s8.bf16 %v968_v4 }
 0x31b   : > { %v6444_v38 = vpop.f32.mrb[46].mxu0 }
 0x31c   : > { %v1709_v39 = vpop.f32.mrb[47].mxu0 }
 0x321   : > { %v6446_v43 = vpop.f32.mrb[48].mxu0  ;;  %2481 = vmatmul.mubr.bf16.gmra.mrb[96].mxu1 %v1071_v40 }
 0x322   : > { %v1714_v45 = vpop.f32.mrb[49].mxu0  ;;  %2488 = vmatprep.mubr.bf16.mxu1 %v1076_v42  ;;  %v972_v42 = vld [vmem:[%s5983_s29 + $0x1f8] sm:$0xff] }
 0x323   : > { %v6448_v27 = vpop.f32.mrb[50].mxu0 }
 0x324   : > { %v1717_v47 = vpop.f32.mrb[51].mxu0 }
 0x329   : > { %v6451_v52 = vpop.f32.mrb[52].mxu0  ;;  %2489 = vmatmul.mubr.bf16.gmra.mrb[100].mxu1 %v1075_v49  ;;  %v1091_v49 = vunpack.c.h.s8.bf16 %v967_v20 }
 0x32a   : > { %v1722_v53 = vpop.f32.mrb[53].mxu0  ;;  %2496 = vmatprep.mubr.bf16.mxu1 %v1080_v50 }
 0x32b   : > { %v6454_v56 = vpop.f32.mrb[54].mxu0  ;;  %v1096_v53 = vunpack.c.l.s8.bf16 %v972_v42 }
 0x32c   : > { %v1725_v58 = vpop.f32.mrb[55].mxu0 }
 0x331   : > { %v6456_v61 = vpop.f32.mrb[56].mxu0  ;;  %2497 = vmatmul.mubr.bf16.gmra.mrb[104].mxu1 %v1079_v59 }
 0x332   : > { %v1730_v63 = vpop.f32.mrb[57].mxu0  ;;  %2504 = vmatprep.mubr.bf16.mxu1 %v1084_v60  ;;  %v971_v60 = vld [vmem:[%s5983_s29 + $0x1f0] sm:$0xff] }
 0x333   : > { %v6458_v0 = vpop.f32.mrb[58].mxu0 }
 0x334   : > { %v1733_v6 = vpop.f32.mrb[59].mxu0  ;;  %v2290_v7 = vpop.f32.mrb[0].mxu1 }
 0x335   : > { %2673 = vrot.lane.b32.xlu0 %v2290_v7, %s5656_s26  ;;  %v2292_v9 = vpop.f32.mrb[1].mxu1 }
 0x336   : > { %v2293_v2 = vpop.f32.mrb[2].mxu1  ;;  %v1095_v9 = vunpack.c.l.s8.bf16 %v971_v60 }
 0x337   : > { %2675 = vrot.lane.b32.xlu1 %v2293_v2, %s5656_s26  ;;  %v2295_v14 = vpop.f32.mrb[3].mxu1  ;;  %v1100_v2 = vunpack.c.h.s8.bf16 %v972_v42 }
 0x339   : > { %v6463_v17 = vpop.f32.mrb[60].mxu0  ;;  %2505 = vmatmul.mubr.bf16.gmra.mrb[108].mxu1 %v1083_v11 }
 0x33a   : > { %v1738_v18 = vpop.f32.mrb[61].mxu0  ;;  %2512 = vmatprep.mubr.bf16.mxu1 %v1088_v13 }
 0x33b   : > { %v6466_v22 = vpop.f32.mrb[62].mxu0 }
 0x33c   : > { %v1741_v23 = vpop.f32.mrb[63].mxu0  ;;  %v2298_v26 = vpop.f32.mrb[4].mxu1 }
 0x33d   : > { %2677 = vrot.lane.b32.xlu0 %v2298_v26, %s5656_s26  ;;  %v2300_v29 = vpop.f32.mrb[5].mxu1 }
 0x33e   : > { %v2301_v31 = vpop.f32.mrb[6].mxu1 }
 0x33f   : > { %2679 = vrot.lane.b32.xlu1 %v2301_v31, %s5656_s26  ;;  %v2303_v35 = vpop.f32.mrb[7].mxu1 }
 0x341   : > { %v6470_v37 = vpop.f32.mrb[64].mxu0  ;;  %2513 = vmatmul.mubr.bf16.gmra.mrb[112].mxu1 %v1087_v30  ;;  %v1099_v30 = vunpack.c.h.s8.bf16 %v971_v60 }
 0x342   : > { %v1746_v39 = vpop.f32.mrb[65].mxu0  ;;  %2520 = vmatprep.mubr.bf16.mxu1 %v1092_v33 }
 0x343   : > { %v6472_v40 = vpop.f32.mrb[66].mxu0 }
 0x344   : > { %v1749_v45 = vpop.f32.mrb[67].mxu0  ;;  %v2306_v46 = vpop.f32.mrb[8].mxu1 }
 0x345   : > { %2681 = vrot.lane.b32.xlu0 %v2306_v46, %s5656_s26  ;;  %v2308_v47 = vpop.f32.mrb[9].mxu1 }
 0x346   : > { %v2309_v50 = vpop.f32.mrb[10].mxu1 }
 0x347   : > { %2683 = vrot.lane.b32.xlu1 %v2309_v50, %s5656_s26  ;;  %v2311_v54 = vpop.f32.mrb[11].mxu1 }
 0x349   : > { %v6477_v58 = vpop.f32.mrb[68].mxu0  ;;  %2521 = vmatmul.mubr.bf16.gmra.mrb[116].mxu1 %v1091_v49 }
 0x34a   : > { %v1754_v59 = vpop.f32.mrb[69].mxu0  ;;  %2528 = vmatprep.mubr.bf16.mxu1 %v1096_v53 }
 0x34b   : > { %v6480_v63 = vpop.f32.mrb[70].mxu0 }
 0x34c   : > { %v1757_v4 = vpop.f32.mrb[71].mxu0  ;;  %v2314_v6 = vpop.f32.mrb[12].mxu1 }
 0x34d   : > { %2685 = vrot.lane.b32.xlu0 %v2314_v6, %s5656_s26  ;;  %v2316_v7 = vpop.f32.mrb[13].mxu1 }
 0x34e   : > { %v2317_v11 = vpop.f32.mrb[14].mxu1 }
 0x34f   : > { %2687 = vrot.lane.b32.xlu1 %v2317_v11, %s5656_s26  ;;  %v2319_v13 = vpop.f32.mrb[15].mxu1 }
 0x351   : > { %v6484_v14 = vpop.f32.mrb[72].mxu0  ;;  %2529 = vmatmul.mubr.bf16.gmra.mrb[120].mxu1 %v1095_v9 }
 0x352   : > { %v1762_v18 = vpop.f32.mrb[73].mxu0  ;;  %2536 = vmatprep.mubr.bf16.mxu1 %v1100_v2 }
 0x353   : > { %v6486_v20 = vpop.f32.mrb[74].mxu0 }
 0x354   : > { %v1765_v23 = vpop.f32.mrb[75].mxu0  ;;  %v2322_v26 = vpop.f32.mrb[16].mxu1 }
 0x355   : > { %2689 = vrot.lane.b32.xlu0 %v2322_v26, %s5656_s26  ;;  %v2324_v29 = vpop.f32.mrb[17].mxu1 }
 0x356   : > { %v2325_v31 = vpop.f32.mrb[18].mxu1 }
 0x357   : > { %2691 = vrot.lane.b32.xlu1 %v2325_v31, %s5656_s26  ;;  %v2327_v33 = vpop.f32.mrb[19].mxu1 }
 0x359   : > { %v6490_v35 = vpop.f32.mrb[76].mxu0  ;;  %2537 = vmatmul.mubr.bf16.gmra.mrb[124].mxu1 %v1099_v30 }
 0x35a   : > { %v1770_v39 = vpop.f32.mrb[77].mxu0 }
 0x35b   : > { %v6492_v42 = vpop.f32.mrb[78].mxu0 }
 0x35c   : > { %v1773_v45 = vpop.f32.mrb[79].mxu0  ;;  %v2330_v46 = vpop.f32.mrb[20].mxu1 }
 0x35d   : > { %2693 = vrot.lane.b32.xlu0 %v2330_v46, %s5656_s26  ;;  %v2332_v47 = vpop.f32.mrb[21].mxu1 }
 0x35e   : > { %v2333_v49 = vpop.f32.mrb[22].mxu1 }
 0x35f   : > { %2695 = vrot.lane.b32.xlu1 %v2333_v49, %s5656_s26  ;;  %v2335_v50 = vpop.f32.mrb[23].mxu1 }
 0x361   : > { %v6496_v53 = vpop.f32.mrb[80].mxu0 }
 0x362   : > { %v1778_v54 = vpop.f32.mrb[81].mxu0 }
 0x363   : > { %v6498_v59 = vpop.f32.mrb[82].mxu0 }
 0x364   : > { %v1781_v60 = vpop.f32.mrb[83].mxu0  ;;  %v2338_v4 = vpop.f32.mrb[24].mxu1 }
 0x365   : > { %2697 = vrot.lane.b32.xlu0 %v2338_v4, %s5656_s26  ;;  %v2340_v6 = vpop.f32.mrb[25].mxu1 }
 0x366   : > { %v2341_v7 = vpop.f32.mrb[26].mxu1 }
 0x367   : > { %2699 = vrot.lane.b32.xlu1 %v2341_v7, %s5656_s26  ;;  %v2343_v9 = vpop.f32.mrb[27].mxu1 }
 0x369   : > { %v6502_v11 = vpop.f32.mrb[84].mxu0 }
 0x36a   : > { %v1786_v2 = vpop.f32.mrb[85].mxu0 }
 0x36b   : > { %v6504_v13 = vpop.f32.mrb[86].mxu0 }
 0x36c   : > { %v1789_v18 = vpop.f32.mrb[87].mxu0  ;;  %v2346_v23 = vpop.f32.mrb[28].mxu1 }
 0x36d   : > { %2701 = vrot.lane.b32.xlu0 %v2346_v23, %s5656_s26  ;;  %v2348_v26 = vpop.f32.mrb[29].mxu1 }
 0x36e   : > { %v2349_v29 = vpop.f32.mrb[30].mxu1 }
 0x36f   : > { %2703 = vrot.lane.b32.xlu1 %v2349_v29, %s5656_s26  ;;  %v2351_v30 = vpop.f32.mrb[31].mxu1 }
 0x371   : > { %v6508_v31 = vpop.f32.mrb[88].mxu0 }
 0x372   : > { %v1794_v33 = vpop.f32.mrb[89].mxu0 }
 0x373   : > { %v6510_v39 = vpop.f32.mrb[90].mxu0 }
 0x374   : > { %v1797_v45 = vpop.f32.mrb[91].mxu0  ;;  %v2354_v46 = vpop.f32.mrb[32].mxu1 }
 0x375   : > { %2705 = vrot.lane.b32.xlu0 %v2354_v46, %s5656_s26  ;;  %v2356_v47 = vpop.f32.mrb[33].mxu1 }
 0x376   : > { %v2357_v49 = vpop.f32.mrb[34].mxu1 }
 0x377   : > { %2707 = vrot.lane.b32.xlu1 %v2357_v49, %s5656_s26  ;;  %v2359_v50 = vpop.f32.mrb[35].mxu1 }
 0x379   : > { %v6514_v54 = vpop.f32.mrb[92].mxu0 }
 0x37a   : > { %v1802_v60 = vpop.f32.mrb[93].mxu0 }
 0x37b   : > { %v6516_v4 = vpop.f32.mrb[94].mxu0 }
 0x37c   : > { %v1805_v6 = vpop.f32.mrb[95].mxu0  ;;  %v2362_v7 = vpop.f32.mrb[36].mxu1 }
 0x37d   : > { %2709 = vrot.lane.b32.xlu0 %v2362_v7, %s5656_s26  ;;  %v2364_v9 = vpop.f32.mrb[37].mxu1 }
 0x37e   : > { %v2365_v2 = vpop.f32.mrb[38].mxu1 }
 0x37f   : > { %2711 = vrot.lane.b32.xlu1 %v2365_v2, %s5656_s26  ;;  %v2367_v18 = vpop.f32.mrb[39].mxu1 }
 0x381   : > { %v6520_v23 = vpop.f32.mrb[96].mxu0 }
 0x382   : > { %v1810_v26 = vpop.f32.mrb[97].mxu0 }
 0x383   : > { %v6522_v29 = vpop.f32.mrb[98].mxu0 }
 0x384   : > { %v1813_v30 = vpop.f32.mrb[99].mxu0  ;;  %v2370_v33 = vpop.f32.mrb[40].mxu1 }
 0x385   : > { %2713 = vrot.lane.b32.xlu0 %v2370_v33, %s5656_s26  ;;  %v2372_v45 = vpop.f32.mrb[41].mxu1 }
 0x386   : > { %v2373_v46 = vpop.f32.mrb[42].mxu1 }
 0x387   : > { %2715 = vrot.lane.b32.xlu1 %v2373_v46, %s5656_s26  ;;  %v2375_v47 = vpop.f32.mrb[43].mxu1 }
 0x389   : > { %v6526_v49 = vpop.f32.mrb[100].mxu0 }
 0x38a   : > { %v1818_v50 = vpop.f32.mrb[101].mxu0 }
 0x38b   : > { %v6528_v60 = vpop.f32.mrb[102].mxu0 }
 0x38c   : > { %7208 = vst [vmem:[#allocation18_spill] sm:$0xff] %v6528_v60  ;;  %v1821_v6 = vpop.f32.mrb[103].mxu0  ;;  %v2378_v7 = vpop.f32.mrb[44].mxu1 }
 0x38d   : > { %2717 = vrot.lane.b32.xlu0 %v2378_v7, %s5656_s26  ;;  %v2380_v9 = vpop.f32.mrb[45].mxu1 }
 0x38e   : > { %v2381_v2 = vpop.f32.mrb[46].mxu1 }
 0x38f   : > { %2719 = vrot.lane.b32.xlu1 %v2381_v2, %s5656_s26  ;;  %v2383_v18 = vpop.f32.mrb[47].mxu1 }
 0x391   : > { %v6532_v26 = vpop.f32.mrb[104].mxu0 }
 0x392   : > { %7209 = vst [vmem:[#allocation19_spill] sm:$0xff] %v6532_v26  ;;  %v1826_v30 = vpop.f32.mrb[105].mxu0 }
 0x393   : > { %v6534_v33 = vpop.f32.mrb[106].mxu0 }
 0x394   : > { %7210 = vst [vmem:[#allocation20_spill] sm:$0xff] %v6534_v33  ;;  %v1829_v45 = vpop.f32.mrb[107].mxu0  ;;  %v2386_v46 = vpop.f32.mrb[48].mxu1 }
 0x395   : > { %2721 = vrot.lane.b32.xlu0 %v2386_v46, %s5656_s26  ;;  %v2388_v47 = vpop.f32.mrb[49].mxu1 }
 0x396   : > { %v2389_v50 = vpop.f32.mrb[50].mxu1 }
 0x397   : > { %2723 = vrot.lane.b32.xlu1 %v2389_v50, %s5656_s26  ;;  %v2391_v6 = vpop.f32.mrb[51].mxu1 }
 0x399   : > { %v6538_v7 = vpop.f32.mrb[108].mxu0 }
 0x39a   : > { %7211 = vst [vmem:[#allocation21_spill] sm:$0xff] %v6538_v7  ;;  %v1834_v9 = vpop.f32.mrb[109].mxu0 }
 0x39b   : > { %v6540_v60 = vpop.f32.mrb[110].mxu0 }
 0x39c   : > { %7212 = vst [vmem:[#allocation22_spill] sm:$0xff] %v6540_v60  ;;  %v1837_v2 = vpop.f32.mrb[111].mxu0  ;;  %v2394_v18 = vpop.f32.mrb[52].mxu1  ;;  %v2545_v60 = vld [vmem:[#allocation2] sm:$0xff] }
 0x39d   : > { %2725 = vrot.lane.b32.xlu0 %v2394_v18, %s5656_s26  ;;  %v2396_v30 = vpop.f32.mrb[53].mxu1 }
 0x39e   : > { %v2397_v33 = vpop.f32.mrb[54].mxu1  ;;  %v2546_v30 = vld [vmem:[#allocation2 + $0x8] sm:$0xff] }
 0x39f   : > { %2727 = vrot.lane.b32.xlu1 %v2397_v33, %s5656_s26  ;;  %v2399_v45 = vpop.f32.mrb[55].mxu1 }
 0x3a1   : > { %v6544_v46 = vpop.f32.mrb[112].mxu0 }
 0x3a2   : > { %7213 = vst [vmem:[#allocation23_spill] sm:$0xff] %v6544_v46  ;;  %v1842_v47 = vpop.f32.mrb[113].mxu0 }
 0x3a3   : > { %v6546_v26 = vpop.f32.mrb[114].mxu0 }
 0x3a4   : > { %7214 = vst [vmem:[#allocation24_spill] sm:$0xff] %v6546_v26  ;;  %v1845_v50 = vpop.f32.mrb[115].mxu0  ;;  %v2402_v6 = vpop.f32.mrb[56].mxu1 }
 0x3a5   : > { %2729 = vrot.lane.b32.xlu0 %v2402_v6, %s5656_s26  ;;  %v2404_v9 = vpop.f32.mrb[57].mxu1 }
 0x3a6   : > { %v2405_v2 = vpop.f32.mrb[58].mxu1 }
 0x3a7   : > { %v2674_v7 = vpop.permute.xlu0 %2673  ;;  %2731 = vrot.lane.b32.xlu1 %v2405_v2, %s5656_s26  ;;  %v2407_v18 = vpop.f32.mrb[59].mxu1 }
 0x3a8   : > { %v2866_v33 = vsel %vm2865_vm1, %v6383_v1, %v2674_v7  ;;  %v2547_v7 = vld [vmem:[#allocation2 + $0x10] sm:$0xff] }
 0x3a9   : > { %v2930_v45 = vadd.f32 %v2866_v33, %v2545_v60  ;;  %v2676_v47 = vpop.permute.xlu1 %2675  ;;  %v6552_v26 = vpop.f32.mrb[116].mxu0 }
 0x3aa   : > { %7215 = vst [vmem:[#allocation25_spill] sm:$0xff] %v6552_v26  ;;  %v2867_v50 = vsel %vm2865_vm1, %v6385_v5, %v2676_v47  ;;  %v1850_v6 = vpop.f32.mrb[117].mxu0 }
 0x3ab   : > { %2995 = vst.msk [vmem:[#allocation2] sm:$0xff] %vm2994_vm2, %v2930_v45  ;;  %v2931_v9 = vadd.f32 %v2867_v50, %v2546_v30  ;;  %v6557_v46 = vpop.f32.mrb[118].mxu0  ;;  %v2548_v45 = vld [vmem:[#allocation2 + $0x18] sm:$0xff] }
 0x3ac   : > { %v1853_v2 = vpop.f32.mrb[119].mxu0  ;;  %v2410_v18 = vpop.f32.mrb[60].mxu1 }
 0x3ad   : > { %2996 = vst.msk [vmem:[#allocation2 + $0x8] sm:$0xff] %vm2994_vm2, %v2931_v9  ;;  %2733 = vrot.lane.b32.xlu0 %v2410_v18, %s5656_s26  ;;  %v2412_v1 = vpop.f32.mrb[61].mxu1 }
 0x3ae   : > { %v2413_v60 = vpop.f32.mrb[62].mxu1 }
 0x3af   : > { %v2678_v33 = vpop.permute.xlu0 %2677  ;;  %2735 = vrot.lane.b32.xlu1 %v2413_v60, %s5656_s26  ;;  %v2415_v26 = vpop.f32.mrb[63].mxu1 }
 0x3b0   : > { %v2868_v5 = vsel %vm2865_vm1, %v6389_v12, %v2678_v33 }
 0x3b1   : > { %v2932_v30 = vadd.f32 %v2868_v5, %v2547_v7  ;;  %v2680_v47 = vpop.permute.xlu1 %2679  ;;  %v6564_v50 = vpop.f32.mrb[120].mxu0  ;;  %v2549_v7 = vld [vmem:[#allocation2 + $0x20] sm:$0xff] }
 0x3b2   : > { %v2869_v6 = vsel %vm2865_vm1, %v6392_v15, %v2680_v47  ;;  %v1858_v9 = vpop.f32.mrb[121].mxu0 }
 0x3b3   : > { %2997 = vst.msk [vmem:[#allocation2 + $0x10] sm:$0xff] %vm2994_vm2, %v2932_v30  ;;  %v2933_v2 = vadd.f32 %v2869_v6, %v2548_v45  ;;  %v6569_v18 = vpop.f32.mrb[122].mxu0  ;;  %v2550_v30 = vld [vmem:[#allocation2 + $0x28] sm:$0xff] }
 0x3b4   : > { %v1861_v1 = vpop.f32.mrb[123].mxu0  ;;  %v2418_v60 = vpop.f32.mrb[64].mxu1 }
 0x3b5   : > { %2998 = vst.msk [vmem:[#allocation2 + $0x18] sm:$0xff] %vm2994_vm2, %v2933_v2  ;;  %2737 = vrot.lane.b32.xlu0 %v2418_v60, %s5656_s26  ;;  %v2420_v12 = vpop.f32.mrb[65].mxu1 }
 0x3b6   : > { %v2421_v26 = vpop.f32.mrb[66].mxu1 }
 0x3b7   : > { %v2682_v33 = vpop.permute.xlu0 %2681  ;;  %2739 = vrot.lane.b32.xlu1 %v2421_v26, %s5656_s26  ;;  %v2423_v5 = vpop.f32.mrb[67].mxu1 }
 0x3b8   : > { %v2870_v15 = vsel %vm2865_vm1, %v6395_v21, %v2682_v33  ;;  %v2551_v33 = vld [vmem:[#allocation2 + $0x30] sm:$0xff] }
 0x3b9   : > { %v2934_v45 = vadd.f32 %v2870_v15, %v2549_v7  ;;  %v2684_v47 = vpop.permute.xlu1 %2683  ;;  %v6576_v6 = vpop.f32.mrb[124].mxu0 }
 0x3ba   : > { %v2871_v9 = vsel %vm2865_vm1, %v6397_v24, %v2684_v47  ;;  %v1866_v2 = vpop.f32.mrb[125].mxu0 }
 0x3bb   : > { %2999 = vst.msk [vmem:[#allocation2 + $0x20] sm:$0xff] %vm2994_vm2, %v2934_v45  ;;  %v2935_v1 = vadd.f32 %v2871_v9, %v2550_v30  ;;  %v6581_v60 = vpop.f32.mrb[126].mxu0  ;;  %v2552_v45 = vld [vmem:[#allocation2 + $0x38] sm:$0xff] }
 0x3bc   : > { %v1869_v12 = vpop.f32.mrb[127].mxu0  ;;  %v2426_v26 = vpop.f32.mrb[68].mxu1 }
 0x3bd   : > { %3000 = vst.msk [vmem:[#allocation2 + $0x28] sm:$0xff] %vm2994_vm2, %v2935_v1  ;;  %2741 = vrot.lane.b32.xlu0 %v2426_v26, %s5656_s26  ;;  %v2428_v21 = vpop.f32.mrb[69].mxu1 }
 0x3be   : > { %v2429_v7 = vpop.f32.mrb[70].mxu1  ;;  %v2553_v21 = vld [vmem:[#allocation2 + $0x40] sm:$0xff] }
 0x3bf   : > { %v2686_v5 = vpop.permute.xlu0 %2685  ;;  %2743 = vrot.lane.b32.xlu1 %v2429_v7, %s5656_s26  ;;  %v2431_v15 = vpop.f32.mrb[71].mxu1 }
 0x3c0   : > { %v2872_v24 = vsel %vm2865_vm1, %v6401_v32, %v2686_v5  ;;  %v2554_v5 = vld [vmem:[#allocation2 + $0x48] sm:$0xff] }
 0x3c1   : > { %v2936_v30 = vadd.f32 %v2872_v24, %v2551_v33  ;;  %v2688_v47 = vpop.permute.xlu1 %2687 }
 0x3c2   : > { %v2873_v9 = vsel %vm2865_vm1, %v6404_v36, %v2688_v47 }
 0x3c3   : > { %3001 = vst.msk [vmem:[#allocation2 + $0x30] sm:$0xff] %vm2994_vm2, %v2936_v30  ;;  %v2937_v2 = vadd.f32 %v2873_v9, %v2552_v45 }
 0x3c4   : > { %v2434_v1 = vpop.f32.mrb[72].mxu1 }
 0x3c5   : > { %3002 = vst.msk [vmem:[#allocation2 + $0x38] sm:$0xff] %vm2994_vm2, %v2937_v2  ;;  %2745 = vrot.lane.b32.xlu0 %v2434_v1, %s5656_s26  ;;  %v2436_v12 = vpop.f32.mrb[73].mxu1  ;;  %v2555_v2 = vld [vmem:[#allocation2 + $0x50] sm:$0xff] }
 0x3c6   : > { %v2437_v26 = vpop.f32.mrb[74].mxu1 }
 0x3c7   : > { %v2690_v7 = vpop.permute.xlu0 %2689  ;;  %2747 = vrot.lane.b32.xlu1 %v2437_v26, %s5656_s26  ;;  %v2439_v32 = vpop.f32.mrb[75].mxu1  ;;  %v2556_v26 = vld [vmem:[#allocation2 + $0x58] sm:$0xff] }
 0x3c8   : > { %v2874_v33 = vsel %vm2865_vm1, %v6406_v41, %v2690_v7 }
 0x3c9   : > { %v2938_v36 = vadd.f32 %v2874_v33, %v2553_v21  ;;  %v2692_v15 = vpop.permute.xlu1 %2691 }
 0x3ca   : > { %v2875_v24 = vsel %vm2865_vm1, %v6408_v44, %v2692_v15  ;;  %v2557_v15 = vld [vmem:[#allocation2 + $0x60] sm:$0xff] }
 0x3cb   : > { %3003 = vst.msk [vmem:[#allocation2 + $0x40] sm:$0xff] %vm2994_vm2, %v2938_v36  ;;  %v2939_v45 = vadd.f32 %v2875_v24, %v2554_v5 }
 0x3cc   : > { %v2442_v30 = vpop.f32.mrb[76].mxu1 }
 0x3cd   : > { %3004 = vst.msk [vmem:[#allocation2 + $0x48] sm:$0xff] %vm2994_vm2, %v2939_v45  ;;  %2749 = vrot.lane.b32.xlu0 %v2442_v30, %s5656_s26  ;;  %v2444_v47 = vpop.f32.mrb[77].mxu1  ;;  %v2558_v30 = vld [vmem:[#allocation2 + $0x68] sm:$0xff] }
 0x3ce   : > { %v2445_v9 = vpop.f32.mrb[78].mxu1 }
 0x3cf   : > { %v2694_v1 = vpop.permute.xlu0 %2693  ;;  %2751 = vrot.lane.b32.xlu1 %v2445_v9, %s5656_s26  ;;  %v2447_v41 = vpop.f32.mrb[79].mxu1 }
 0x3d0   : > { %v2876_v12 = vsel %vm2865_vm1, %v6411_v48, %v2694_v1 }
 0x3d1   : > { %v2940_v44 = vadd.f32 %v2876_v12, %v2555_v2  ;;  %v2696_v21 = vpop.permute.xlu1 %2695 }
 0x3d2   : > { %v2877_v7 = vsel %vm2865_vm1, %v6414_v51, %v2696_v21 }
 0x3d3   : > { %3005 = vst.msk [vmem:[#allocation2 + $0x50] sm:$0xff] %vm2994_vm2, %v2940_v44  ;;  %v2941_v32 = vadd.f32 %v2877_v7, %v2556_v26  ;;  %v2559_v26 = vld [vmem:[#allocation2 + $0x70] sm:$0xff]  ;;  %v2560_v7 = vld [vmem:[#allocation2 + $0x78] sm:$0xff] }
 0x3d4   : > { %v2450_v33 = vpop.f32.mrb[80].mxu1 }
 0x3d5   : > { %3006 = vst.msk [vmem:[#allocation2 + $0x58] sm:$0xff] %vm2994_vm2, %v2941_v32  ;;  %2753 = vrot.lane.b32.xlu0 %v2450_v33, %s5656_s26  ;;  %v2452_v5 = vpop.f32.mrb[81].mxu1 }
 0x3d6   : > { %v2453_v36 = vpop.f32.mrb[82].mxu1 }
 0x3d7   : > { %v2698_v24 = vpop.permute.xlu0 %2697  ;;  %2755 = vrot.lane.b32.xlu1 %v2453_v36, %s5656_s26  ;;  %v2455_v48 = vpop.f32.mrb[83].mxu1 }
 0x3d8   : > { %v2878_v45 = vsel %vm2865_vm1, %v6416_v55, %v2698_v24  ;;  %v2561_v48 = vld [vmem:[#allocation2 + $0x80] sm:$0xff] }
 0x3d9   : > { %v2942_v51 = vadd.f32 %v2878_v45, %v2557_v15  ;;  %v2700_v47 = vpop.permute.xlu1 %2699 }
 0x3da   : > { %v2879_v9 = vsel %vm2865_vm1, %v6418_v57, %v2700_v47 }
 0x3db   : > { %3007 = vst.msk [vmem:[#allocation2 + $0x60] sm:$0xff] %vm2994_vm2, %v2942_v51  ;;  %v2943_v2 = vadd.f32 %v2879_v9, %v2558_v30  ;;  %v2562_v51 = vld [vmem:[#allocation2 + $0x88] sm:$0xff] }
 0x3dc   : > { %v2458_v1 = vpop.f32.mrb[84].mxu1 }
 0x3dd   : > { %3008 = vst.msk [vmem:[#allocation2 + $0x68] sm:$0xff] %vm2994_vm2, %v2943_v2  ;;  %2757 = vrot.lane.b32.xlu0 %v2458_v1, %s5656_s26  ;;  %v2460_v41 = vpop.f32.mrb[85].mxu1 }
 0x3de   : > { %v2461_v12 = vpop.f32.mrb[86].mxu1 }
 0x3df   : > { %v2702_v44 = vpop.permute.xlu0 %2701  ;;  %2759 = vrot.lane.b32.xlu1 %v2461_v12, %s5656_s26  ;;  %v2463_v55 = vpop.f32.mrb[87].mxu1 }
 0x3e0   : > { %v2880_v21 = vsel %vm2865_vm1, %v6421_v62, %v2702_v44 }
 0x3e1   : > { %v2944_v57 = vadd.f32 %v2880_v21, %v2559_v26  ;;  %v2704_v32 = vpop.permute.xlu1 %2703  ;;  %v2563_v26 = vld [vmem:[#allocation2 + $0x90] sm:$0xff]  ;;  %v2564_v21 = vld [vmem:[#allocation2 + $0x98] sm:$0xff] }
 0x3e2   : > { %v2881_v33 = vsel %vm2865_vm1, %v6424_v3, %v2704_v32 }
 0x3e3   : > { %3009 = vst.msk [vmem:[#allocation2 + $0x70] sm:$0xff] %vm2994_vm2, %v2944_v57  ;;  %v2945_v5 = vadd.f32 %v2881_v33, %v2560_v7 }
 0x3e4   : > { %v2466_v36 = vpop.f32.mrb[88].mxu1 }
 0x3e5   : > { %3010 = vst.msk [vmem:[#allocation2 + $0x78] sm:$0xff] %vm2994_vm2, %v2945_v5  ;;  %2761 = vrot.lane.b32.xlu0 %v2466_v36, %s5656_s26  ;;  %v2468_v15 = vpop.f32.mrb[89].mxu1 }
 0x3e6   : > { %v2469_v24 = vpop.f32.mrb[90].mxu1  ;;  %v2565_v15 = vld [vmem:[#allocation2 + $0xa0] sm:$0xff] }
 0x3e7   : > { %v2706_v45 = vpop.permute.xlu0 %2705  ;;  %2763 = vrot.lane.b32.xlu1 %v2469_v24, %s5656_s26  ;;  %v2471_v62 = vpop.f32.mrb[91].mxu1 }
 0x3e8   : > { %v2882_v30 = vsel %vm2865_vm1, %v6426_v8, %v2706_v45  ;;  %v2566_v45 = vld [vmem:[#allocation2 + $0xa8] sm:$0xff] }
 0x3e9   : > { %v2946_v3 = vadd.f32 %v2882_v30, %v2561_v48  ;;  %v2708_v47 = vpop.permute.xlu1 %2707 }
 0x3ea   : > { %v2883_v9 = vsel %vm2865_vm1, %v6428_v10, %v2708_v47 }
 0x3eb   : > { %3011 = vst.msk [vmem:[#allocation2 + $0x80] sm:$0xff] %vm2994_vm2, %v2946_v3  ;;  %v2947_v2 = vadd.f32 %v2883_v9, %v2562_v51 }
 0x3ec   : > { %v2474_v1 = vpop.f32.mrb[92].mxu1 }
 0x3ed   : > { %3012 = vst.msk [vmem:[#allocation2 + $0x88] sm:$0xff] %vm2994_vm2, %v2947_v2  ;;  %2765 = vrot.lane.b32.xlu0 %v2474_v1, %s5656_s26  ;;  %v2476_v41 = vpop.f32.mrb[93].mxu1  ;;  %v2567_v2 = vld [vmem:[#allocation2 + $0xb0] sm:$0xff] }
 0x3ee   : > { %v2477_v12 = vpop.f32.mrb[94].mxu1 }
 0x3ef   : > { %v2710_v44 = vpop.permute.xlu0 %2709  ;;  %2767 = vrot.lane.b32.xlu1 %v2477_v12, %s5656_s26  ;;  %v2479_v8 = vpop.f32.mrb[95].mxu1  ;;  %v2568_v12 = vld [vmem:[#allocation2 + $0xb8] sm:$0xff] }
 0x3f0   : > { %v2884_v55 = vsel %vm2865_vm1, %v6431_v16, %v2710_v44 }
 0x3f1   : > { %v2948_v10 = vadd.f32 %v2884_v55, %v2563_v26  ;;  %v2712_v7 = vpop.permute.xlu1 %2711 }
 0x3f2   : > { %v2885_v57 = vsel %vm2865_vm1, %v6434_v19, %v2712_v7  ;;  %v2569_v7 = vld [vmem:[#allocation2 + $0xc0] sm:$0xff] }
 0x3f3   : > { %3013 = vst.msk [vmem:[#allocation2 + $0x90] sm:$0xff] %vm2994_vm2, %v2948_v10  ;;  %v2949_v32 = vadd.f32 %v2885_v57, %v2564_v21 }
 0x3f4   : > { %v2482_v33 = vpop.f32.mrb[96].mxu1 }
 0x3f5   : > { %3014 = vst.msk [vmem:[#allocation2 + $0x98] sm:$0xff] %vm2994_vm2, %v2949_v32  ;;  %2769 = vrot.lane.b32.xlu0 %v2482_v33, %s5656_s26  ;;  %v2484_v5 = vpop.f32.mrb[97].mxu1  ;;  %v2570_v33 = vld [vmem:[#allocation2 + $0xc8] sm:$0xff] }
 0x3f6   : > { %v2485_v36 = vpop.f32.mrb[98].mxu1 }
 0x3f7   : > { %v2714_v24 = vpop.permute.xlu0 %2713  ;;  %2771 = vrot.lane.b32.xlu1 %v2485_v36, %s5656_s26  ;;  %v2487_v16 = vpop.f32.mrb[99].mxu1 }
 0x3f8   : > { %v2886_v48 = vsel %vm2865_vm1, %v6436_v25, %v2714_v24 }
 0x3f9   : > { %v2950_v19 = vadd.f32 %v2886_v48, %v2565_v15  ;;  %v2716_v62 = vpop.permute.xlu1 %2715 }
 0x3fa   : > { %v2887_v30 = vsel %vm2865_vm1, %v6438_v28, %v2716_v62 }
 0x3fb   : > { %3015 = vst.msk [vmem:[#allocation2 + $0xa0] sm:$0xff] %vm2994_vm2, %v2950_v19  ;;  %v2951_v51 = vadd.f32 %v2887_v30, %v2566_v45  ;;  %v2571_v45 = vld [vmem:[#allocation2 + $0xd0] sm:$0xff]  ;;  %v2572_v30 = vld [vmem:[#allocation2 + $0xd8] sm:$0xff] }
 0x3fc   : > { %v2490_v3 = vpop.f32.mrb[100].mxu1 }
 0x3fd   : > { %3016 = vst.msk [vmem:[#allocation2 + $0xa8] sm:$0xff] %vm2994_vm2, %v2951_v51  ;;  %2773 = vrot.lane.b32.xlu0 %v2490_v3, %s5656_s26  ;;  %v2492_v47 = vpop.f32.mrb[101].mxu1 }
 0x3fe   : > { %v2493_v9 = vpop.f32.mrb[102].mxu1 }
 0x3ff   : > { %v2718_v1 = vpop.permute.xlu0 %2717  ;;  %2775 = vrot.lane.b32.xlu1 %v2493_v9, %s5656_s26  ;;  %v2495_v25 = vpop.f32.mrb[103].mxu1 }
 0x400   : > { %v2888_v41 = vsel %vm2865_vm1, %v6441_v34, %v2718_v1  ;;  %v2573_v25 = vld [vmem:[#allocation2 + $0xe0] sm:$0xff] }
 0x401   : > { %v2952_v28 = vadd.f32 %v2888_v41, %v2567_v2  ;;  %v2720_v26 = vpop.permute.xlu1 %2719 }
 0x402   : > { %v2889_v44 = vsel %vm2865_vm1, %v6444_v38, %v2720_v26 }
 0x403   : > { %3017 = vst.msk [vmem:[#allocation2 + $0xb0] sm:$0xff] %vm2994_vm2, %v2952_v28  ;;  %v2953_v8 = vadd.f32 %v2889_v44, %v2568_v12  ;;  %v2574_v28 = vld [vmem:[#allocation2 + $0xe8] sm:$0xff] }
 0x404   : > { %v2498_v55 = vpop.f32.mrb[104].mxu1 }
 0x405   : > { %3018 = vst.msk [vmem:[#allocation2 + $0xb8] sm:$0xff] %vm2994_vm2, %v2953_v8  ;;  %2777 = vrot.lane.b32.xlu0 %v2498_v55, %s5656_s26  ;;  %v2500_v21 = vpop.f32.mrb[105].mxu1 }
 0x406   : > { %v2501_v10 = vpop.f32.mrb[106].mxu1 }
 0x407   : > { %v2722_v57 = vpop.permute.xlu0 %2721  ;;  %2779 = vrot.lane.b32.xlu1 %v2501_v10, %s5656_s26  ;;  %v2503_v34 = vpop.f32.mrb[107].mxu1 }
 0x408   : > { %v2890_v32 = vsel %vm2865_vm1, %v6446_v43, %v2722_v57 }
 0x409   : > { %v2954_v38 = vadd.f32 %v2890_v32, %v2569_v7  ;;  %v2724_v5 = vpop.permute.xlu1 %2723  ;;  %v2575_v7 = vld [vmem:[#allocation2 + $0xf0] sm:$0xff]  ;;  %v2576_v32 = vld [vmem:[#allocation2 + $0xf8] sm:$0xff] }
 0x40a   : > { %v2891_v36 = vsel %vm2865_vm1, %v6448_v27, %v2724_v5 }
 0x40b   : > { %3019 = vst.msk [vmem:[#allocation2 + $0xc0] sm:$0xff] %vm2994_vm2, %v2954_v38  ;;  %v2955_v15 = vadd.f32 %v2891_v36, %v2570_v33 }
 0x40c   : > { %v2506_v24 = vpop.f32.mrb[108].mxu1 }
 0x40d   : > { %3020 = vst.msk [vmem:[#allocation2 + $0xc8] sm:$0xff] %vm2994_vm2, %v2955_v15  ;;  %2781 = vrot.lane.b32.xlu0 %v2506_v24, %s5656_s26  ;;  %v2508_v16 = vpop.f32.mrb[109].mxu1 }
 0x40e   : > { %v2509_v48 = vpop.f32.mrb[110].mxu1  ;;  %v2577_v16 = vld [vmem:[#allocation2 + $0x100] sm:$0xff] }
 0x40f   : > { %v2726_v19 = vpop.permute.xlu0 %2725  ;;  %2783 = vrot.lane.b32.xlu1 %v2509_v48, %s5656_s26  ;;  %v2511_v43 = vpop.f32.mrb[111].mxu1 }
 0x410   : > { %v2892_v62 = vsel %vm2865_vm1, %v6451_v52, %v2726_v19  ;;  %v2578_v19 = vld [vmem:[#allocation2 + $0x108] sm:$0xff] }
 0x411   : > { %v2956_v27 = vadd.f32 %v2892_v62, %v2571_v45  ;;  %v2728_v51 = vpop.permute.xlu1 %2727 }
 0x412   : > { %v2893_v3 = vsel %vm2865_vm1, %v6454_v56, %v2728_v51 }
 0x413   : > { %3021 = vst.msk [vmem:[#allocation2 + $0xd0] sm:$0xff] %vm2994_vm2, %v2956_v27  ;;  %v2957_v47 = vadd.f32 %v2893_v3, %v2572_v30 }
 0x414   : > { %v2514_v9 = vpop.f32.mrb[112].mxu1 }
 0x415   : > { %3022 = vst.msk [vmem:[#allocation2 + $0xd8] sm:$0xff] %vm2994_vm2, %v2957_v47  ;;  %2785 = vrot.lane.b32.xlu0 %v2514_v9, %s5656_s26  ;;  %v2516_v2 = vpop.f32.mrb[113].mxu1  ;;  %v2579_v47 = vld [vmem:[#allocation2 + $0x110] sm:$0xff] }
 0x416   : > { %v2517_v1 = vpop.f32.mrb[114].mxu1 }
 0x417   : > { %v2730_v41 = vpop.permute.xlu0 %2729  ;;  %2787 = vrot.lane.b32.xlu1 %v2517_v1, %s5656_s26  ;;  %v2519_v52 = vpop.f32.mrb[115].mxu1  ;;  %v2580_v1 = vld [vmem:[#allocation2 + $0x118] sm:$0xff] }
 0x418   : > { %v2894_v12 = vsel %vm2865_vm1, %v6456_v61, %v2730_v41 }
 0x419   : > { %v2958_v56 = vadd.f32 %v2894_v12, %v2573_v25  ;;  %v2732_v26 = vpop.permute.xlu1 %2731  ;;  %v2581_v12 = vld [vmem:[#allocation2 + $0x120] sm:$0xff] }
 0x41a   : > { %v2895_v44 = vsel %vm2865_vm1, %v6458_v0, %v2732_v26  ;;  %v2582_v26 = vld [vmem:[#allocation2 + $0x128] sm:$0xff] }
 0x41b   : > { %3023 = vst.msk [vmem:[#allocation2 + $0xe0] sm:$0xff] %vm2994_vm2, %v2958_v56  ;;  %v2959_v8 = vadd.f32 %v2895_v44, %v2574_v28 }
 0x41c   : > { %v2522_v55 = vpop.f32.mrb[116].mxu1 }
 0x41d   : > { %3024 = vst.msk [vmem:[#allocation2 + $0xe8] sm:$0xff] %vm2994_vm2, %v2959_v8  ;;  %2789 = vrot.lane.b32.xlu0 %v2522_v55, %s5656_s26  ;;  %v2524_v21 = vpop.f32.mrb[117].mxu1 }
 0x41e   : > { %v2525_v10 = vpop.f32.mrb[118].mxu1 }
 0x41f   : > { %v2734_v57 = vpop.permute.xlu0 %2733  ;;  %2791 = vrot.lane.b32.xlu1 %v2525_v10, %s5656_s26  ;;  %v2527_v61 = vpop.f32.mrb[119].mxu1 }
 0x420   : > { %v2896_v34 = vsel %vm2865_vm1, %v6463_v17, %v2734_v57 }
 0x421   : > { %v2960_v0 = vadd.f32 %v2896_v34, %v2575_v7  ;;  %v2736_v33 = vpop.permute.xlu1 %2735  ;;  %v2584_v7 = vld [vmem:[#allocation2 + $0x138] sm:$0xff] }
 0x422   : > { %v2897_v38 = vsel %vm2865_vm1, %v6466_v22, %v2736_v33  ;;  %v2586_v33 = vld [vmem:[#allocation2 + $0x148] sm:$0xff] }
 0x423   : > { %3025 = vst.msk [vmem:[#allocation2 + $0xf0] sm:$0xff] %vm2994_vm2, %v2960_v0  ;;  %v2961_v5 = vadd.f32 %v2897_v38, %v2576_v32 }
 0x424   : > { %v2530_v36 = vpop.f32.mrb[120].mxu1 }
 0x425   : > { %3026 = vst.msk [vmem:[#allocation2 + $0xf8] sm:$0xff] %vm2994_vm2, %v2961_v5  ;;  %2793 = vrot.lane.b32.xlu0 %v2530_v36, %s5656_s26  ;;  %v2532_v15 = vpop.f32.mrb[121].mxu1 }
 0x426   : > { %v2533_v24 = vpop.f32.mrb[122].mxu1 }
 0x427   : > { %v2738_v48 = vpop.permute.xlu0 %2737  ;;  %2795 = vrot.lane.b32.xlu1 %v2533_v24, %s5656_s26  ;;  %v2535_v17 = vpop.f32.mrb[123].mxu1 }
 0x428   : > { %v2898_v45 = vsel %vm2865_vm1, %v6470_v37, %v2738_v48 }
 0x429   : > { %v2962_v22 = vadd.f32 %v2898_v45, %v2577_v16  ;;  %v2740_v43 = vpop.permute.xlu1 %2739  ;;  %v2588_v16 = vld [vmem:[#allocation2 + $0x158] sm:$0xff] }
 0x42a   : > { %v2899_v62 = vsel %vm2865_vm1, %v6472_v40, %v2740_v43  ;;  %v2590_v43 = vld [vmem:[#allocation2 + $0x168] sm:$0xff] }
 0x42b   : > { %3027 = vst.msk [vmem:[#allocation2 + $0x100] sm:$0xff] %vm2994_vm2, %v2962_v22  ;;  %v2963_v30 = vadd.f32 %v2899_v62, %v2578_v19 }
 0x42c   : > { %v2538_v27 = vpop.f32.mrb[124].mxu1 }
 0x42d   : > { %3028 = vst.msk [vmem:[#allocation2 + $0x108] sm:$0xff] %vm2994_vm2, %v2963_v30  ;;  %2797 = vrot.lane.b32.xlu0 %v2538_v27, %s5656_s26  ;;  %v2540_v51 = vpop.f32.mrb[125].mxu1 }
 0x42e   : > { %v2541_v3 = vpop.f32.mrb[126].mxu1 }
 0x42f   : > { %v2742_v9 = vpop.permute.xlu0 %2741  ;;  %2799 = vrot.lane.b32.xlu1 %v2541_v3, %s5656_s26  ;;  %v2543_v37 = vpop.f32.mrb[127].mxu1 }
 0x430   : > { %v2900_v2 = vsel %vm2865_vm1, %v6477_v58, %v2742_v9 }
 0x431   : > { %v2964_v40 = vadd.f32 %v2900_v2, %v2579_v47  ;;  %v2744_v25 = vpop.permute.xlu1 %2743  ;;  %v2592_v47 = vld [vmem:[#allocation2 + $0x178] sm:$0xff] }
 0x432   : > { %v2901_v41 = vsel %vm2865_vm1, %v6480_v63, %v2744_v25  ;;  %v2583_v63 = vld [vmem:[#allocation2 + $0x130] sm:$0xff]  ;;  %v2594_v25 = vld [vmem:[#allocation2 + $0x188] sm:$0xff] }
 0x433   : > { %3029 = vst.msk [vmem:[#allocation2 + $0x110] sm:$0xff] %vm2994_vm2, %v2964_v40  ;;  %v2965_v52 = vadd.f32 %v2901_v41, %v2580_v1 }
 0x435   : > { %3030 = vst.msk [vmem:[#allocation2 + $0x118] sm:$0xff] %vm2994_vm2, %v2965_v52 }
 0x437   : > { %v2746_v28 = vpop.permute.xlu0 %2745 }
 0x438   : > { %v2902_v56 = vsel %vm2865_vm1, %v6484_v14, %v2746_v28 }
 0x439   : > { %v2966_v44 = vadd.f32 %v2902_v56, %v2581_v12  ;;  %v2748_v8 = vpop.permute.xlu1 %2747 }
 0x43a   : > { %v2903_v58 = vsel %vm2865_vm1, %v6486_v20, %v2748_v8  ;;  %v2585_v20 = vld [vmem:[#allocation2 + $0x140] sm:$0xff] }
 0x43b   : > { %3031 = vst.msk [vmem:[#allocation2 + $0x120] sm:$0xff] %vm2994_vm2, %v2966_v44  ;;  %v2967_v55 = vadd.f32 %v2903_v58, %v2582_v26  ;;  %v2596_v26 = vld [vmem:[#allocation2 + $0x198] sm:$0xff] }
 0x43d   : > { %3032 = vst.msk [vmem:[#allocation2 + $0x128] sm:$0xff] %vm2994_vm2, %v2967_v55 }
 0x43f   : > { %v2750_v21 = vpop.permute.xlu0 %2749 }
 0x440   : > { %v2904_v10 = vsel %vm2865_vm1, %v6490_v35, %v2750_v21  ;;  %v7217_v21 = vld [vmem:[#allocation19_spill] sm:$0xff] }
 0x441   : > { %v2968_v57 = vadd.f32 %v2904_v10, %v2583_v63  ;;  %v2752_v61 = vpop.permute.xlu1 %2751 }
 0x442   : > { %v2905_v14 = vsel %vm2865_vm1, %v6492_v42, %v2752_v61  ;;  %v2587_v42 = vld [vmem:[#allocation2 + $0x150] sm:$0xff] }
 0x443   : > { %3033 = vst.msk [vmem:[#allocation2 + $0x130] sm:$0xff] %vm2994_vm2, %v2968_v57  ;;  %v2969_v34 = vadd.f32 %v2905_v14, %v2584_v7  ;;  %v2598_v7 = vld [vmem:[#allocation2 + $0x1a8] sm:$0xff] }
 0x445   : > { %3034 = vst.msk [vmem:[#allocation2 + $0x138] sm:$0xff] %vm2994_vm2, %v2969_v34 }
 0x447   : > { %v2754_v32 = vpop.permute.xlu0 %2753 }
 0x448   : > { %v2906_v0 = vsel %vm2865_vm1, %v6496_v53, %v2754_v32 }
 0x449   : > { %v2970_v38 = vadd.f32 %v2906_v0, %v2585_v20  ;;  %v2756_v5 = vpop.permute.xlu1 %2755  ;;  %v2599_v20 = vld [vmem:[#allocation2 + $0x1b0] sm:$0xff]  ;;  %v7219_v0 = vld [vmem:[#allocation21_spill] sm:$0xff] }
 0x44a   : > { %v2907_v35 = vsel %vm2865_vm1, %v6498_v59, %v2756_v5  ;;  %v2589_v59 = vld [vmem:[#allocation2 + $0x160] sm:$0xff] }
 0x44b   : > { %3035 = vst.msk [vmem:[#allocation2 + $0x140] sm:$0xff] %vm2994_vm2, %v2970_v38  ;;  %v2971_v36 = vadd.f32 %v2907_v35, %v2586_v33  ;;  %v2600_v38 = vld [vmem:[#allocation2 + $0x1b8] sm:$0xff] }
 0x44d   : > { %3036 = vst.msk [vmem:[#allocation2 + $0x148] sm:$0xff] %vm2994_vm2, %v2971_v36  ;;  %v7220_v36 = vld [vmem:[#allocation22_spill] sm:$0xff] }
 0x44f   : > { %v2758_v15 = vpop.permute.xlu0 %2757 }
 0x450   : > { %v2908_v24 = vsel %vm2865_vm1, %v6502_v11, %v2758_v15 }
 0x451   : > { %v2972_v48 = vadd.f32 %v2908_v24, %v2587_v42  ;;  %v2760_v17 = vpop.permute.xlu1 %2759  ;;  %v2601_v24 = vld [vmem:[#allocation2 + $0x1c0] sm:$0xff] }
 0x452   : > { %v2909_v53 = vsel %vm2865_vm1, %v6504_v13, %v2760_v17  ;;  %v2591_v13 = vld [vmem:[#allocation2 + $0x170] sm:$0xff] }
 0x453   : > { %3037 = vst.msk [vmem:[#allocation2 + $0x150] sm:$0xff] %vm2994_vm2, %v2972_v48  ;;  %v2973_v45 = vadd.f32 %v2909_v53, %v2588_v16  ;;  %v7221_v48 = vld [vmem:[#allocation23_spill] sm:$0xff] }
 0x454   : > { %v2602_v53 = vld [vmem:[#allocation2 + $0x1c8] sm:$0xff] }
 0x455   : > { %3038 = vst.msk [vmem:[#allocation2 + $0x158] sm:$0xff] %vm2994_vm2, %v2973_v45 }
 0x457   : > { %v2762_v19 = vpop.permute.xlu0 %2761 }
 0x458   : > { %v2910_v22 = vsel %vm2865_vm1, %v6508_v31, %v2762_v19  ;;  %v7222_v19 = vld [vmem:[#allocation24_spill] sm:$0xff] }
 0x459   : > { %v2974_v62 = vadd.f32 %v2910_v22, %v2589_v59  ;;  %v2764_v30 = vpop.permute.xlu1 %2763 }
 0x45a   : > { %v2911_v11 = vsel %vm2865_vm1, %v6510_v39, %v2764_v30  ;;  %v2593_v39 = vld [vmem:[#allocation2 + $0x180] sm:$0xff] }
 0x45b   : > { %3039 = vst.msk [vmem:[#allocation2 + $0x160] sm:$0xff] %vm2994_vm2, %v2974_v62  ;;  %v2975_v27 = vadd.f32 %v2911_v11, %v2590_v43  ;;  %v2603_v62 = vld [vmem:[#allocation2 + $0x1d0] sm:$0xff]  ;;  %v7223_v11 = vld [vmem:[#allocation25_spill] sm:$0xff] }
 0x45d   : > { %3040 = vst.msk [vmem:[#allocation2 + $0x168] sm:$0xff] %vm2994_vm2, %v2975_v27 }
 0x45f   : > { %v2766_v51 = vpop.permute.xlu0 %2765 }
 0x460   : > { %v2912_v3 = vsel %vm2865_vm1, %v6514_v54, %v2766_v51 }
 0x461   : > { %v2976_v9 = vadd.f32 %v2912_v3, %v2591_v13  ;;  %v2768_v37 = vpop.permute.xlu1 %2767  ;;  %v2604_v13 = vld [vmem:[#allocation2 + $0x1d8] sm:$0xff] }
 0x462   : > { %v2913_v31 = vsel %vm2865_vm1, %v6516_v4, %v2768_v37  ;;  %v2595_v4 = vld [vmem:[#allocation2 + $0x190] sm:$0xff]  ;;  %v2605_v37 = vld [vmem:[#allocation2 + $0x1e0] sm:$0xff] }
 0x463   : > { %3041 = vst.msk [vmem:[#allocation2 + $0x170] sm:$0xff] %vm2994_vm2, %v2976_v9  ;;  %v2977_v2 = vadd.f32 %v2913_v31, %v2592_v47 }
 0x465   : > { %3042 = vst.msk [vmem:[#allocation2 + $0x178] sm:$0xff] %vm2994_vm2, %v2977_v2 }
 0x467   : > { %v2770_v1 = vpop.permute.xlu0 %2769 }
 0x468   : > { %v2914_v40 = vsel %vm2865_vm1, %v6520_v23, %v2770_v1  ;;  %v7216_v23 = vld [vmem:[#allocation18_spill] sm:$0xff] }
 0x469   : > { %v2978_v41 = vadd.f32 %v2914_v40, %v2593_v39  ;;  %v2772_v52 = vpop.permute.xlu1 %2771  ;;  %v2606_v39 = vld [vmem:[#allocation2 + $0x1e8] sm:$0xff] }
 0x46a   : > { %v2915_v54 = vsel %vm2865_vm1, %v6522_v29, %v2772_v52  ;;  %v2597_v29 = vld [vmem:[#allocation2 + $0x1a0] sm:$0xff] }
 0x46b   : > { %3043 = vst.msk [vmem:[#allocation2 + $0x180] sm:$0xff] %vm2994_vm2, %v2978_v41  ;;  %v2979_v12 = vadd.f32 %v2915_v54, %v2594_v25 }
 0x46d   : > { %3044 = vst.msk [vmem:[#allocation2 + $0x188] sm:$0xff] %vm2994_vm2, %v2979_v12  ;;  %v2608_v12 = vld [vmem:[#allocation2 + $0x1f8] sm:$0xff] }
 0x46f   : > { %v2774_v28 = vpop.permute.xlu0 %2773 }
 0x470   : > { %v2916_v56 = vsel %vm2865_vm1, %v6526_v49, %v2774_v28  ;;  %v7218_v49 = vld [vmem:[#allocation20_spill] sm:$0xff] }
 0x471   : > { %v2980_v44 = vadd.f32 %v2916_v56, %v2595_v4  ;;  %v2776_v8 = vpop.permute.xlu1 %2775 }
 0x472   : > { %v2917_v58 = vsel %vm2865_vm1, %v7216_v23, %v2776_v8  ;;  %v5464_v8 = vld [vmem:[%s6002_s2] sm:$0xff] (!%p4679_p1)   ;;  %v5465_v23 = vld [vmem:[%s7177_s5 + $0x18] sm:$0xff] (!%p4679_p1)  }
 0x473   : > { %3045 = vst.msk [vmem:[#allocation2 + $0x190] sm:$0xff] %vm2994_vm2, %v2980_v44  ;;  %v2981_v55 = vadd.f32 %v2917_v58, %v2596_v26  ;;  %v5462_v26 = vld [vmem:[%s7177_s5 + $0x10] sm:$0xff] (!%p4679_p1)   ;;  %v5463_v44 = vld [vmem:[%s7178_s6 + $0x8] sm:$0xff] (!%p4679_p1)   ;;  %4865 = vmatprep.mubr.msk.bf16.mxu1 (!%p4679_p1), %vm2865_vm1, %v5464_v8  ;;  %v3143_v8 = vld [vmem:[%s6007_s14 + $0x80] sm:$0xff] (!%p4679_p1) }
 0x474   : > { %v5466_v58 = vld [vmem:[%s6002_s2 + $0x8] sm:$0xff] (!%p4679_p1)  }
 0x475   : > { %3046 = vst.msk [vmem:[#allocation2 + $0x198] sm:$0xff] %vm2994_vm2, %v2981_v55  ;;  %v3063_v55 = vld [vmem:[#allocation2] sm:$0xff] (!%p4679_p1) }
 0x477   : > { %v2778_v63 = vpop.permute.xlu0 %2777 }
 0x478   : > { %v2918_v10 = vsel %vm2865_vm1, %v7217_v21, %v2778_v63  ;;  %v3127_v63 = vld [vmem:[%s6007_s14] sm:$0xff] (!%p4679_p1)  ;;  %v3128_v21 = vld [vmem:[%s6007_s14 + $0x8] sm:$0xff] (!%p4679_p1) }
 0x479   : > { %v2982_v57 = vadd.f32 %v2918_v10, %v2597_v29  ;;  %v2780_v61 = vpop.permute.xlu1 %2779  ;;  %v3064_v29 = vld [vmem:[#allocation2 + $0x8] sm:$0xff] (!%p4679_p1)  ;;  %v3191_v10 = vmul.f32 (!%p4679_p1), %v3127_v63, %v3063_v55 }
 0x47a   : > { %v2919_v14 = vsel %vm2865_vm1, %v7218_v49, %v2780_v61  ;;  %v3192_v61 = vmul.f32 (!%p4679_p1), %v3128_v21, %v3064_v29  ;;  %v3129_v49 = vld [vmem:[%s6007_s14 + $0x10] sm:$0xff] (!%p4679_p1) }
 0x47b   : > { %3047 = vst.msk [vmem:[#allocation2 + $0x1a0] sm:$0xff] %vm2994_vm2, %v2982_v57  ;;  %v2983_v34 = vadd.f32 %v2919_v14, %v2598_v7  ;;  %v3065_v7 = vld [vmem:[#allocation2 + $0x10] sm:$0xff] (!%p4679_p1)  ;;  %v3066_v57 = vld [vmem:[#allocation2 + $0x18] sm:$0xff] (!%p4679_p1) }
 0x47c   : > { %v3130_v14 = vld [vmem:[%s6007_s14 + $0x18] sm:$0xff] (!%p4679_p1) }
 0x47d   : > { %3048 = vst.msk [vmem:[#allocation2 + $0x1a8] sm:$0xff] %vm2994_vm2, %v2983_v34  ;;  %v3193_v34 = vmul.f32 (!%p4679_p1), %v3129_v49, %v3065_v7  ;;  %v3082_v7 = vld [vmem:[#allocation2 + $0x98] sm:$0xff] (!%p4679_p1)  ;;  %v5474_v49 = vld [vmem:[%s6002_s2 + $0x48] sm:$0xff] (!%p4679_p1)  }
 0x47f   : > { %v2782_v32 = vpop.permute.xlu0 %2781 }
 0x480   : > { %v2920_v33 = vsel %vm2865_vm1, %v7219_v0, %v2782_v32  ;;  %v5467_v32 = vld [vmem:[%s6002_s2 + $0x10] sm:$0xff] (!%p4679_p1)   ;;  %v3255_v0 = vpack.c.bf16 (!%p4679_p1), %v3192_v61, %v3191_v10 }
 0x481   : > { %v2984_v5 = vadd.f32 %v2920_v33, %v2599_v20  ;;  %v2784_v35 = vpop.permute.xlu1 %2783  ;;  %v3194_v20 = vmul.f32 (!%p4679_p1), %v3130_v14, %v3066_v57  ;;  %v3067_v33 = vld [vmem:[#allocation2 + $0x20] sm:$0xff] (!%p4679_p1)  ;;  %v3081_v10 = vld [vmem:[#allocation2 + $0x90] sm:$0xff] (!%p4679_p1)  ;;  %v3146_v14 = vld [vmem:[%s6007_s14 + $0x98] sm:$0xff] (!%p4679_p1) }
 0x482   : > { %v2921_v42 = vsel %vm2865_vm1, %v7220_v36, %v2784_v35  ;;  %v3132_v35 = vld [vmem:[%s6007_s14 + $0x28] sm:$0xff] (!%p4679_p1)  ;;  %4937 = vmatprep.mubr.msk.bf16.mxu0 (!%p4679_p1), %vm2994_vm2, %v3255_v0  ;;  %v3145_v57 = vld [vmem:[%s6007_s14 + $0x90] sm:$0xff] (!%p4679_p1)  ;;  %v3147_v0 = vld [vmem:[%s6007_s14 + $0xa0] sm:$0xff] (!%p4679_p1) }
 0x483   : > { %3049 = vst.msk [vmem:[#allocation2 + $0x1b0] sm:$0xff] %vm2994_vm2, %v2984_v5  ;;  %v2985_v15 = vadd.f32 %v2921_v42, %v2600_v38  ;;  %v3068_v38 = vld [vmem:[#allocation2 + $0x28] sm:$0xff] (!%p4679_p1)  ;;  %v3131_v5 = vld [vmem:[%s6007_s14 + $0x20] sm:$0xff] (!%p4679_p1)  ;;  %v3256_v36 = vpack.c.bf16 (!%p4679_p1), %v3194_v20, %v3193_v34 }
 0x484   : > { %v3195_v42 = vmul.f32 (!%p4679_p1), %v3131_v5, %v3067_v33  ;;  %v3083_v34 = vld [vmem:[#allocation2 + $0xa0] sm:$0xff] (!%p4679_p1)  ;;  %v3148_v33 = vld [vmem:[%s6007_s14 + $0xa8] sm:$0xff] (!%p4679_p1)  ;;  %v3209_v5 = vmul.f32 (!%p4679_p1), %v3145_v57, %v3081_v10  ;;  %v3097_v10 = vld [vmem:[#allocation2 + $0x110] sm:$0xff] (!%p4679_p1) }
 0x485   : > { %3050 = vst.msk [vmem:[#allocation2 + $0x1b8] sm:$0xff] %vm2994_vm2, %v2985_v15  ;;  %v3196_v15 = vmul.f32 (!%p4679_p1), %v3132_v35, %v3068_v38  ;;  %v5475_v38 = vld [vmem:[%s6002_s2 + $0x50] sm:$0xff] (!%p4679_p1)   ;;  %v3210_v35 = vmul.f32 (!%p4679_p1), %v3146_v14, %v3082_v7  ;;  %v3098_v7 = vld [vmem:[#allocation2 + $0x118] sm:$0xff] (!%p4679_p1) }
 0x486   : > { %v3161_v57 = vld [vmem:[%s6007_s14 + $0x110] sm:$0xff] (!%p4679_p1)  ;;  %v3162_v14 = vld [vmem:[%s6007_s14 + $0x118] sm:$0xff] (!%p4679_p1) }
 0x487   : > { %v2786_v16 = vpop.permute.xlu0 %2785 }
 0x488   : > { %v2922_v17 = vsel %vm2865_vm1, %v7221_v48, %v2786_v16  ;;  %v3070_v16 = vld [vmem:[#allocation2 + $0x38] sm:$0xff] (!%p4679_p1)  ;;  %v3133_v48 = vld [vmem:[%s6007_s14 + $0x30] sm:$0xff] (!%p4679_p1) }
 0x489   : > { %v2986_v45 = vadd.f32 %v2922_v17, %v2601_v24  ;;  %v2788_v59 = vpop.permute.xlu1 %2787  ;;  %v3069_v24 = vld [vmem:[#allocation2 + $0x30] sm:$0xff] (!%p4679_p1)  ;;  %v3134_v17 = vld [vmem:[%s6007_s14 + $0x38] sm:$0xff] (!%p4679_p1) }
 0x48a   : > { %v2923_v22 = vsel %vm2865_vm1, %v7222_v19, %v2788_v59  ;;  %v5469_v59 = vld [vmem:[%s6002_s2 + $0x20] sm:$0xff] (!%p4679_p1)  }
 0x48b   : > { %3051 = vst.msk [vmem:[#allocation2 + $0x1c0] sm:$0xff] %vm2994_vm2, %v2986_v45  ;;  %v2987_v43 = vadd.f32 %v2923_v22, %v2602_v53  ;;  %v5468_v53 = vld [vmem:[%s6002_s2 + $0x18] sm:$0xff] (!%p4679_p1)   ;;  %v3257_v45 = vpack.c.bf16 (!%p4679_p1), %v3196_v15, %v3195_v42  ;;  %v3071_v19 = vld [vmem:[#allocation2 + $0x40] sm:$0xff] (!%p4679_p1)  ;;  %v3072_v22 = vld [vmem:[#allocation2 + $0x48] sm:$0xff] (!%p4679_p1) }
 0x48c   : > { %v3085_v15 = vld [vmem:[#allocation2 + $0xb0] sm:$0xff] (!%p4679_p1) }
 0x48d   : > { %3052 = vst.msk [vmem:[#allocation2 + $0x1c8] sm:$0xff] %vm2994_vm2, %v2987_v43  ;;  %v3197_v43 = vmul.f32 (!%p4679_p1), %v3133_v48, %v3069_v24  ;;  %v3264_v24 = vpack.c.bf16 (!%p4679_p1), %v3210_v35, %v3209_v5  ;;  %v3086_v48 = vld [vmem:[#allocation2 + $0xb8] sm:$0xff] (!%p4679_p1)  ;;  %v3225_v5 = vmul.f32 (!%p4679_p1), %v3161_v57, %v3097_v10  ;;  %v3226_v35 = vmul.f32 (!%p4679_p1), %v3162_v14, %v3098_v7  ;;  %v5490_v7 = vld [vmem:[%s6002_s2 + $0xc8] sm:$0xff] (!%p4679_p1)   ;;  %v3113_v57 = vld [vmem:[#allocation2 + $0x190] sm:$0xff] (!%p4679_p1) }
 0x48e   : > { %v3177_v14 = vld [vmem:[%s6007_s14 + $0x190] sm:$0xff] (!%p4679_p1) }
 0x48f   : > { %v2790_v30 = vpop.permute.xlu0 %2789 }
 0x490   : > { %v2924_v27 = vsel %vm2865_vm1, %v7223_v11, %v2790_v30  ;;  %v3135_v30 = vld [vmem:[%s6007_s14 + $0x40] sm:$0xff] (!%p4679_p1)  ;;  %v3136_v11 = vld [vmem:[%s6007_s14 + $0x48] sm:$0xff] (!%p4679_p1) }
 0x491   : > { %v2988_v51 = vadd.f32 %v2924_v27, %v2603_v62  ;;  %v2792_v3 = vpop.permute.xlu1 %2791  ;;  %v3198_v62 = vmul.f32 (!%p4679_p1), %v3134_v17, %v3070_v16  ;;  %v3199_v27 = vmul.f32 (!%p4679_p1), %v3135_v30, %v3071_v19  ;;  %v5476_v16 = vld [vmem:[%s6002_s2 + $0x58] sm:$0xff] (!%p4679_p1)   ;;  %v3149_v17 = vld [vmem:[%s6007_s14 + $0xb0] sm:$0xff] (!%p4679_p1)  ;;  %v3088_v19 = vld [vmem:[#allocation2 + $0xc8] sm:$0xff] (!%p4679_p1) }
 0x492   : > { %v2925_v47 = vsel %vm2865_vm1, %v6557_v46, %v2792_v3  ;;  %v2607_v46 = vld [vmem:[#allocation2 + $0x1f0] sm:$0xff]  ;;  %v5470_v3 = vld [vmem:[%s6002_s2 + $0x28] sm:$0xff] (!%p4679_p1)   ;;  %v3213_v30 = vmul.f32 (!%p4679_p1), %v3149_v17, %v3085_v15  ;;  %v3272_v15 = vpack.c.bf16 (!%p4679_p1), %v3226_v35, %v3225_v5  ;;  %v3241_v5 = vmul.f32 (!%p4679_p1), %v3177_v14, %v3113_v57 }
 0x493   : > { %3053 = vst.msk [vmem:[#allocation2 + $0x1d0] sm:$0xff] %vm2994_vm2, %v2988_v51  ;;  %v2989_v9 = vadd.f32 %v2925_v47, %v2604_v13  ;;  %v3200_v13 = vmul.f32 (!%p4679_p1), %v3136_v11, %v3072_v22  ;;  %v3258_v51 = vpack.c.bf16 (!%p4679_p1), %v3198_v62, %v3197_v43  ;;  %v3073_v47 = vld [vmem:[#allocation2 + $0x50] sm:$0xff] (!%p4679_p1)  ;;  %v3151_v22 = vld [vmem:[%s6007_s14 + $0xc0] sm:$0xff] (!%p4679_p1)  ;;  %v3152_v43 = vld [vmem:[%s6007_s14 + $0xc8] sm:$0xff] (!%p4679_p1) }
 0x494   : > { %v5477_v62 = vld [vmem:[%s6002_s2 + $0x60] sm:$0xff] (!%p4679_p1)  }
 0x495   : > { %3054 = vst.msk [vmem:[#allocation2 + $0x1d8] sm:$0xff] %vm2994_vm2, %v2989_v9  ;;  %v3074_v9 = vld [vmem:[#allocation2 + $0x58] sm:$0xff] (!%p4679_p1) }
 0x497   : > { %v2794_v31 = vpop.permute.xlu0 %2793 }
 0x498   : > { %v2926_v2 = vsel %vm2865_vm1, %v6564_v50, %v2794_v31  ;;  %v3259_v31 = vpack.c.bf16 (!%p4679_p1), %v3200_v13, %v3199_v27  ;;  %v3216_v13 = vmul.f32 (!%p4679_p1), %v3152_v43, %v3088_v19  ;;  %v3104_v19 = vld [vmem:[#allocation2 + $0x148] sm:$0xff] (!%p4679_p1) }
 0x499   : > { %v2990_v1 = vadd.f32 %v2926_v2, %v2605_v37  ;;  %v2796_v40 = vpop.permute.xlu1 %2795  ;;  %v3137_v37 = vld [vmem:[%s6007_s14 + $0x50] sm:$0xff] (!%p4679_p1)  ;;  %v3138_v2 = vld [vmem:[%s6007_s14 + $0x58] sm:$0xff] (!%p4679_p1)  ;;  %v3168_v43 = vld [vmem:[%s6007_s14 + $0x148] sm:$0xff] (!%p4679_p1) }
 0x49a   : > { %v2927_v25 = vsel %vm2865_vm1, %v6569_v18, %v2796_v40  ;;  %v5459_v18 = vld [vmem:[%s7177_s5] sm:$0xff] (!%p4679_p1)  }
 0x49b   : > { %3055 = vst.msk [vmem:[#allocation2 + $0x1e0] sm:$0xff] %vm2994_vm2, %v2990_v1  ;;  %v2991_v41 = vadd.f32 %v2927_v25, %v2606_v39  ;;  %4929 = vmatprep.subr.bf16.mxu0 (!%p4679_p1), %v5459_v18  ;;  %v3075_v39 = vld [vmem:[#allocation2 + $0x60] sm:$0xff] (!%p4679_p1)  ;;  %v3076_v1 = vld [vmem:[#allocation2 + $0x68] sm:$0xff] (!%p4679_p1) }
 0x49c   : > { %4930 = vmatpush3.bf16.msra.mxu0 (!%p4679_p1), %v5459_v18  ;;  %v3139_v40 = vld [vmem:[%s6007_s14 + $0x60] sm:$0xff] (!%p4679_p1)  ;;  %v3140_v25 = vld [vmem:[%s6007_s14 + $0x68] sm:$0xff] (!%p4679_p1) }
 0x49d   : > { %3056 = vst.msk [vmem:[#allocation2 + $0x1e8] sm:$0xff] %vm2994_vm2, %v2991_v41  ;;  %v5471_v41 = vld [vmem:[%s6002_s2 + $0x30] sm:$0xff] (!%p4679_p1)  }
 0x49f   : > { %v2798_v52 = vpop.permute.xlu0 %2797  ;;  %3062 = sbr.rel (%p4679_p1) target bundleno = 1537 (0x601), region = 87 }
 0x4a0   : > { %v2928_v54 = vsel %vm2865_vm1, %v6576_v6, %v2798_v52  ;;  %v5460_v6 = vld [vmem:[%s7177_s5 + $0x8] sm:$0xff] (!%p4679_p1)   ;;  %v3202_v52 = vmul.f32 (!%p4679_p1), %v3138_v2, %v3074_v9  ;;  %v3090_v9 = vld [vmem:[#allocation2 + $0xd8] sm:$0xff] (!%p4679_p1) }
 0x4a1   : > { %v2992_v4 = vadd.f32 %v2928_v54, %v2607_v46  ;;  %v2800_v28 = vpop.permute.xlu1 %2799  ;;  %4931 = vmatprep.subr.bf16.mxu0 (!%p4679_p1), %v5460_v6  ;;  %v3201_v46 = vmul.f32 (!%p4679_p1), %v3137_v37, %v3073_v47  ;;  %v3203_v54 = vmul.f32 (!%p4679_p1), %v3139_v40, %v3075_v39  ;;  %v3089_v47 = vld [vmem:[#allocation2 + $0xd0] sm:$0xff] (!%p4679_p1)  ;;  %v3154_v2 = vld [vmem:[%s6007_s14 + $0xd8] sm:$0xff] (!%p4679_p1)  ;;  %v3091_v39 = vld [vmem:[#allocation2 + $0xe0] sm:$0xff] (!%p4679_p1) }
 0x4a2   : > { %v2929_v50 = vsel %vm2865_vm1, %v6581_v60, %v2800_v28  ;;  %v5461_v60 = vld [vmem:[%s7178_s6] sm:$0xff] (!%p4679_p1)   ;;  %4932 = vmatpush3.bf16.msra.mxu0 (!%p4679_p1), %v5460_v6  ;;  %v3141_v6 = vld [vmem:[%s6007_s14 + $0x70] sm:$0xff] (!%p4679_p1) }
 0x4a3   : > { %3057 = vst.msk [vmem:[#allocation2 + $0x1f0] sm:$0xff] %vm2994_vm2, %v2992_v4  ;;  %v2993_v56 = vadd.f32 %v2929_v50, %v2608_v12  ;;  %4861 = vmatprep.subr.bf16.mxu1 (!%p4679_p1), %v5461_v60  ;;  %4933 = vmatprep.subr.bf16.mxu0 (!%p4679_p1), %v5462_v26  ;;  %v3204_v12 = vmul.f32 (!%p4679_p1), %v3140_v25, %v3076_v1  ;;  %v3077_v4 = vld [vmem:[#allocation2 + $0x70] sm:$0xff] (!%p4679_p1)  ;;  %v5472_v50 = vld [vmem:[%s6002_s2 + $0x38] sm:$0xff] (!%p4679_p1)   ;;  %v3092_v1 = vld [vmem:[#allocation2 + $0xe8] sm:$0xff] (!%p4679_p1) }
 0x4a4   : > { %4862 = vmatpush3.bf16.msra.mxu1 (!%p4679_p1), %v5461_v60  ;;  %v3260_v28 = vpack.c.bf16 (!%p4679_p1), %v3202_v52, %v3201_v46  ;;  %v3142_v60 = vld [vmem:[%s6007_s14 + $0x78] sm:$0xff] (!%p4679_p1)  ;;  %v3205_v55 = vmul.f32 (!%p4679_p1), %v3141_v6, %v3077_v4  ;;  %v3155_v40 = vld [vmem:[%s6007_s14 + $0xe0] sm:$0xff] (!%p4679_p1)  ;;  %v3156_v25 = vld [vmem:[%s6007_s14 + $0xe8] sm:$0xff] (!%p4679_p1)  ;;  %v3218_v52 = vmul.f32 (!%p4679_p1), %v3154_v2, %v3090_v9 }
 0x4a5   : > { %3058 = vst.msk [vmem:[#allocation2 + $0x1f8] sm:$0xff] %vm2994_vm2, %v2993_v56  ;;  %4863 = vmatprep.subr.bf16.mxu1 (!%p4679_p1), %v5463_v44  ;;  %v3078_v56 = vld [vmem:[#allocation2 + $0x78] sm:$0xff] (!%p4679_p1)  ;;  %v3261_v18 = vpack.c.bf16 (!%p4679_p1), %v3204_v12, %v3203_v54  ;;  %v3219_v54 = vmul.f32 (!%p4679_p1), %v3155_v40, %v3091_v39  ;;  %v3220_v12 = vmul.f32 (!%p4679_p1), %v3156_v25, %v3092_v1  ;;  %v3093_v4 = vld [vmem:[#allocation2 + $0xf0] sm:$0xff] (!%p4679_p1)  ;;  %v3107_v39 = vld [vmem:[#allocation2 + $0x160] sm:$0xff] (!%p4679_p1) }
 0x4a6   : > { %4934 = vmatpush3.bf16.msra.mxu0 %v5462_v26  ;;  %v3079_v26 = vld [vmem:[#allocation2 + $0x80] sm:$0xff]  ;;  %v3206_v29 = vmul.f32 %v3142_v60, %v3078_v56  ;;  %v3158_v6 = vld [vmem:[%s6007_s14 + $0xf8] sm:$0xff]  ;;  %v3108_v1 = vld [vmem:[#allocation2 + $0x168] sm:$0xff] }
 0x4a7   : > { %4935 = vmatprep.subr.bf16.mxu0 %v5465_v23  ;;  %v3207_v63 = vmul.f32 %v3143_v8, %v3079_v26  ;;  %v3269_v60 = vpack.c.bf16 %v3220_v12, %v3219_v54  ;;  %v3095_v26 = vld [vmem:[#allocation2 + $0x100] sm:$0xff]  ;;  %v3106_v9 = vld [vmem:[#allocation2 + $0x158] sm:$0xff]  ;;  %v3172_v25 = vld [vmem:[%s6007_s14 + $0x168] sm:$0xff] }
 0x4a8   : > { %4864 = vmatpush3.bf16.msra.mxu1 %v5463_v44  ;;  %v3080_v44 = vld [vmem:[#allocation2 + $0x88] sm:$0xff]  ;;  %v3262_v61 = vpack.c.bf16 %v3206_v29, %v3205_v55  ;;  %v3159_v8 = vld [vmem:[%s6007_s14 + $0x100] sm:$0xff]  ;;  %v3170_v2 = vld [vmem:[%s6007_s14 + $0x158] sm:$0xff]  ;;  %v3236_v12 = vmul.f32 %v3172_v25, %v3108_v1 }
 0x4a9   : > { %v3171_v40 = vld [vmem:[%s6007_s14 + $0x160] sm:$0xff]  ;;  %v3124_v1 = vld [vmem:[#allocation2 + $0x1e8] sm:$0xff] }
 0x4aa   : > { %4936 = vmatpush3.bf16.msra.mxu0 %v5465_v23  ;;  %v3144_v23 = vld [vmem:[%s6007_s14 + $0x88] sm:$0xff]  ;;  %v3235_v54 = vmul.f32 %v3171_v40, %v3107_v39  ;;  %v3123_v39 = vld [vmem:[#allocation2 + $0x1e0] sm:$0xff] }
 0x4ab   : > { %4866 = vmatmul.mubr.msk.bf16.vlgmr.msra.gmra.mrb[0].mxu1 %vm2865_vm1, %v5466_v58  ;;  %v5473_v58 = vld [vmem:[%s6002_s2 + $0x40] sm:$0xff]   ;;  %v3208_v21 = vmul.f32 %v3144_v23, %v3080_v44  ;;  %v3096_v44 = vld [vmem:[#allocation2 + $0x108] sm:$0xff] }
 0x4ac   : > { %4869 = vmatprep.mubr.msk.bf16.mxu1 %vm2865_vm1, %v5467_v32  ;;  %v3084_v32 = vld [vmem:[#allocation2 + $0xa8] sm:$0xff]  ;;  %v3187_v40 = vld [vmem:[%s6007_s14 + $0x1e0] sm:$0xff] }
 0x4ad   : > { %4938 = vmatmul.mubr.msk.bf16.vlgmr.msra.gmra.mrb[0].mxu0 %vm2994_vm2, %v3256_v36  ;;  %v3263_v20 = vpack.c.bf16 %v3208_v21, %v3207_v63  ;;  %v3211_v36 = vmul.f32 %v3147_v0, %v3083_v34  ;;  %v3212_v42 = vmul.f32 %v3148_v33, %v3084_v32  ;;  %v3160_v23 = vld [vmem:[%s6007_s14 + $0x108] sm:$0xff]  ;;  %v3223_v63 = vmul.f32 %v3159_v8, %v3095_v26  ;;  %v3099_v34 = vld [vmem:[#allocation2 + $0x120] sm:$0xff] }
 0x4ae   : > { %4941 = vmatprep.mubr.msk.bf16.mxu0 %vm2994_vm2, %v3257_v45  ;;  %v3224_v21 = vmul.f32 %v3160_v23, %v3096_v44  ;;  %v3163_v0 = vld [vmem:[%s6007_s14 + $0x120] sm:$0xff]  ;;  %v3164_v33 = vld [vmem:[%s6007_s14 + $0x128] sm:$0xff] }
 0x4af   : > { %v3265_v45 = vpack.c.bf16 %v3212_v42, %v3211_v36  ;;  %v3227_v36 = vmul.f32 %v3163_v0, %v3099_v34  ;;  %v3111_v26 = vld [vmem:[#allocation2 + $0x180] sm:$0xff]  ;;  %v3112_v44 = vld [vmem:[#allocation2 + $0x188] sm:$0xff]  ;;  %v3178_v34 = vld [vmem:[%s6007_s14 + $0x198] sm:$0xff] }
 0x4b0   : > { %v3271_v32 = vpack.c.bf16 %v3224_v21, %v3223_v63  ;;  %v3175_v8 = vld [vmem:[%s6007_s14 + $0x180] sm:$0xff]  ;;  %v3176_v23 = vld [vmem:[%s6007_s14 + $0x188] sm:$0xff] }
 0x4b1   : > { %v3239_v63 = vmul.f32 %v3175_v8, %v3111_v26  ;;  %v3240_v21 = vmul.f32 %v3176_v23, %v3112_v44  ;;  %v3179_v0 = vld [vmem:[%s6007_s14 + $0x1a0] sm:$0xff]  ;;  %v3188_v25 = vld [vmem:[%s6007_s14 + $0x1e8] sm:$0xff] }
 0x4b3   : > { %4870 = vmatmul.mubr.msk.bf16.gmra.mrb[4].mxu1 %vm2865_vm1, %v5468_v53  ;;  %v3150_v53 = vld [vmem:[%s6007_s14 + $0xb8] sm:$0xff] }
 0x4b4   : > { %4873 = vmatprep.mubr.msk.bf16.mxu1 %vm2865_vm1, %v5469_v59  ;;  %v3087_v59 = vld [vmem:[#allocation2 + $0xc0] sm:$0xff]  ;;  %v3214_v11 = vmul.f32 %v3150_v53, %v3086_v48  ;;  %v3102_v48 = vld [vmem:[#allocation2 + $0x138] sm:$0xff]  ;;  %v3165_v53 = vld [vmem:[%s6007_s14 + $0x130] sm:$0xff] }
 0x4b5   : > { %4942 = vmatmul.mubr.msk.bf16.gmra.mrb[4].mxu0 %vm2994_vm2, %v3258_v51  ;;  %v3215_v27 = vmul.f32 %v3151_v22, %v3087_v59  ;;  %v3103_v59 = vld [vmem:[#allocation2 + $0x140] sm:$0xff] }
 0x4b6   : > { %4945 = vmatprep.mubr.msk.bf16.mxu0 %vm2994_vm2, %v3259_v31  ;;  %v3266_v51 = vpack.c.bf16 %v3214_v11, %v3213_v30  ;;  %v3153_v31 = vld [vmem:[%s6007_s14 + $0xd0] sm:$0xff]  ;;  %v3167_v22 = vld [vmem:[%s6007_s14 + $0x140] sm:$0xff] }
 0x4b7   : > { %v3267_v37 = vpack.c.bf16 %v3216_v13, %v3215_v27  ;;  %v3217_v46 = vmul.f32 %v3153_v31, %v3089_v47  ;;  %v3231_v27 = vmul.f32 %v3167_v22, %v3103_v59  ;;  %v3232_v13 = vmul.f32 %v3168_v43, %v3104_v19  ;;  %v3105_v47 = vld [vmem:[#allocation2 + $0x150] sm:$0xff]  ;;  %v3119_v59 = vld [vmem:[#allocation2 + $0x1c0] sm:$0xff]  ;;  %v3120_v19 = vld [vmem:[#allocation2 + $0x1c8] sm:$0xff] }
 0x4b8   : > { %v3169_v31 = vld [vmem:[%s6007_s14 + $0x150] sm:$0xff]  ;;  %v3183_v22 = vld [vmem:[%s6007_s14 + $0x1c0] sm:$0xff]  ;;  %v3184_v43 = vld [vmem:[%s6007_s14 + $0x1c8] sm:$0xff] }
 0x4b9   : > { %v3268_v56 = vpack.c.bf16 %v3218_v52, %v3217_v46  ;;  %v3233_v46 = vmul.f32 %v3169_v31, %v3105_v47  ;;  %v3234_v52 = vmul.f32 %v3170_v2, %v3106_v9  ;;  %v3121_v47 = vld [vmem:[#allocation2 + $0x1d0] sm:$0xff]  ;;  %v3122_v9 = vld [vmem:[#allocation2 + $0x1d8] sm:$0xff] }
 0x4ba   : > { %v3185_v31 = vld [vmem:[%s6007_s14 + $0x1d0] sm:$0xff]  ;;  %v3186_v2 = vld [vmem:[%s6007_s14 + $0x1d8] sm:$0xff] }
 0x4bb   : > { %4874 = vmatmul.mubr.msk.bf16.gmra.mrb[8].mxu1 %vm2865_vm1, %v5470_v3  ;;  %v5478_v3 = vld [vmem:[%s6002_s2 + $0x68] sm:$0xff]  }
 0x4bc   : > { %4877 = vmatprep.mubr.msk.bf16.mxu1 %vm2865_vm1, %v5471_v41  ;;  %v5479_v41 = vld [vmem:[%s6002_s2 + $0x70] sm:$0xff]  }
 0x4bd   : > { %4946 = vmatmul.mubr.msk.bf16.gmra.mrb[8].mxu0 %vm2994_vm2, %v3260_v28  ;;  %v3094_v28 = vld [vmem:[#allocation2 + $0xf8] sm:$0xff] }
 0x4be   : > { %4949 = vmatprep.mubr.msk.bf16.mxu0 %vm2994_vm2, %v3261_v18  ;;  %v5480_v18 = vld [vmem:[%s6002_s2 + $0x78] sm:$0xff]   ;;  %v3222_v29 = vmul.f32 %v3158_v6, %v3094_v28  ;;  %v3173_v6 = vld [vmem:[%s6007_s14 + $0x170] sm:$0xff] }
 0x4bf   : > { %v5488_v28 = vld [vmem:[%s6002_s2 + $0xb8] sm:$0xff]  }
 0x4c3   : > { %4878 = vmatmul.mubr.msk.bf16.gmra.mrb[12].mxu1 %vm2865_vm1, %v5472_v50  ;;  %v3157_v50 = vld [vmem:[%s6007_s14 + $0xf0] sm:$0xff] }
 0x4c4   : > { %4881 = vmatprep.mubr.msk.bf16.mxu1 %vm2865_vm1, %v5473_v58  ;;  %v5481_v58 = vld [vmem:[%s6002_s2 + $0x80] sm:$0xff]   ;;  %v3221_v55 = vmul.f32 %v3157_v50, %v3093_v4  ;;  %v3276_v4 = vpack.c.bf16 %v3234_v52, %v3233_v46  ;;  %v3109_v50 = vld [vmem:[#allocation2 + $0x170] sm:$0xff]  ;;  %v3249_v46 = vmul.f32 %v3185_v31, %v3121_v47  ;;  %v3250_v52 = vmul.f32 %v3186_v2, %v3122_v9 }
 0x4c5   : > { %4950 = vmatmul.mubr.msk.bf16.gmra.mrb[12].mxu0 %vm2994_vm2, %v3262_v61 }
 0x4c6   : > { %4953 = vmatprep.mubr.msk.bf16.mxu0 %vm2994_vm2, %v3263_v20  ;;  %v3270_v61 = vpack.c.bf16 %v3222_v29, %v3221_v55  ;;  %v3100_v20 = vld [vmem:[#allocation2 + $0x128] sm:$0xff]  ;;  %v3237_v55 = vmul.f32 %v3173_v6, %v3109_v50  ;;  %v3190_v6 = vld [vmem:[%s6007_s14 + $0x1f8] sm:$0xff] }
 0x4c7   : > { %v3228_v42 = vmul.f32 %v3164_v33, %v3100_v20  ;;  %v3115_v20 = vld [vmem:[#allocation2 + $0x1a0] sm:$0xff]  ;;  %v3180_v33 = vld [vmem:[%s6007_s14 + $0x1a8] sm:$0xff] }
 0x4c9   : > { %v3273_v17 = vpack.c.bf16 %v3228_v42, %v3227_v36  ;;  %v3243_v36 = vmul.f32 %v3179_v0, %v3115_v20 }
 0x4cb   : > { %4882 = vmatmul.mubr.msk.bf16.gmra.mrb[16].mxu1 %vm2865_vm1, %v5474_v49  ;;  %v5482_v49 = vld [vmem:[%s6002_s2 + $0x88] sm:$0xff]  }
 0x4cc   : > { %4885 = vmatprep.mubr.msk.bf16.mxu1 %vm2865_vm1, %v5475_v38  ;;  %v5483_v38 = vld [vmem:[%s6002_s2 + $0x90] sm:$0xff]  }
 0x4cd   : > { %4954 = vmatmul.mubr.msk.bf16.gmra.mrb[16].mxu0 %vm2994_vm2, %v3264_v24  ;;  %v5484_v24 = vld [vmem:[%s6002_s2 + $0x98] sm:$0xff]  }
 0x4ce   : > { %4957 = vmatprep.mubr.msk.bf16.mxu0 %vm2994_vm2, %v3265_v45  ;;  %v3166_v45 = vld [vmem:[%s6007_s14 + $0x138] sm:$0xff] }
 0x4cf   : > { %v3230_v11 = vmul.f32 %v3166_v45, %v3102_v48  ;;  %v3118_v48 = vld [vmem:[#allocation2 + $0x1b8] sm:$0xff] }
 0x4d0   : > { %v3182_v45 = vld [vmem:[%s6007_s14 + $0x1b8] sm:$0xff] }
 0x4d3   : > { %4886 = vmatmul.mubr.msk.bf16.gmra.mrb[20].mxu1 %vm2865_vm1, %v5476_v16  ;;  %v3101_v16 = vld [vmem:[#allocation2 + $0x130] sm:$0xff] }
 0x4d4   : > { %4889 = vmatprep.mubr.msk.bf16.mxu1 %vm2865_vm1, %v5477_v62  ;;  %v5485_v62 = vld [vmem:[%s6002_s2 + $0xa0] sm:$0xff]   ;;  %v3229_v30 = vmul.f32 %v3165_v53, %v3101_v16  ;;  %v3117_v16 = vld [vmem:[#allocation2 + $0x1b0] sm:$0xff] }
 0x4d5   : > { %4958 = vmatmul.mubr.msk.bf16.gmra.mrb[20].mxu0 %vm2994_vm2, %v3266_v51  ;;  %v3181_v53 = vld [vmem:[%s6007_s14 + $0x1b0] sm:$0xff] }
 0x4d6   : > { %4961 = vmatprep.mubr.msk.bf16.mxu0 %vm2994_vm2, %v3267_v37  ;;  %v3274_v51 = vpack.c.bf16 %v3230_v11, %v3229_v30  ;;  %v3275_v37 = vpack.c.bf16 %v3232_v13, %v3231_v27  ;;  %v3245_v30 = vmul.f32 %v3181_v53, %v3117_v16  ;;  %v3246_v11 = vmul.f32 %v3182_v45, %v3118_v48 }
 0x4d7   : > { %v3247_v27 = vmul.f32 %v3183_v22, %v3119_v59  ;;  %v3248_v13 = vmul.f32 %v3184_v43, %v3120_v19 }
 0x4db   : > { %4890 = vmatmul.mubr.msk.bf16.gmra.mrb[24].mxu1 %vm2865_vm1, %v5478_v3  ;;  %v5486_v3 = vld [vmem:[%s6002_s2 + $0xa8] sm:$0xff]  }
 0x4dc   : > { %4893 = vmatprep.mubr.msk.bf16.mxu1 %vm2865_vm1, %v5479_v41  ;;  %v5487_v41 = vld [vmem:[%s6002_s2 + $0xb0] sm:$0xff]  }
 0x4dd   : > { %4962 = vmatmul.mubr.msk.bf16.gmra.mrb[24].mxu0 %vm2994_vm2, %v3268_v56  ;;  %v3110_v56 = vld [vmem:[#allocation2 + $0x178] sm:$0xff] }
 0x4de   : > { %4965 = vmatprep.mubr.msk.bf16.mxu0 %vm2994_vm2, %v3269_v60  ;;  %v3174_v60 = vld [vmem:[%s6007_s14 + $0x178] sm:$0xff] }
 0x4df   : > { %v3238_v29 = vmul.f32 %v3174_v60, %v3110_v56  ;;  %v3126_v56 = vld [vmem:[#allocation2 + $0x1f8] sm:$0xff] }
 0x4e0   : > { %v5496_v60 = vld [vmem:[%s6002_s2 + $0xf8] sm:$0xff]   ;;  %v3254_v44 = vmul.f32 %v3190_v6, %v3126_v56 }
 0x4e1   : > { %v3278_v10 = vpack.c.bf16 %v3238_v29, %v3237_v55 }
 0x4e3   : > { %4894 = vmatmul.mubr.msk.bf16.gmra.mrb[28].mxu1 %vm2865_vm1, %v5480_v18  ;;  %v3277_v18 = vpack.c.bf16 %v3236_v12, %v3235_v54  ;;  %v3251_v54 = vmul.f32 %v3187_v40, %v3123_v39  ;;  %v3252_v12 = vmul.f32 %v3188_v25, %v3124_v1 }
 0x4e4   : > { %4897 = vmatprep.mubr.msk.bf16.mxu1 %vm2865_vm1, %v5481_v58  ;;  %v5489_v58 = vld [vmem:[%s6002_s2 + $0xc0] sm:$0xff]  }
 0x4e5   : > { %4966 = vmatmul.mubr.msk.bf16.gmra.mrb[28].mxu0 %vm2994_vm2, %v3270_v61  ;;  %v3114_v61 = vld [vmem:[#allocation2 + $0x198] sm:$0xff]  ;;  %v3285_v50 = vpack.c.bf16 %v3252_v12, %v3251_v54 }
 0x4e6   : > { %4969 = vmatprep.mubr.msk.bf16.mxu0 %vm2994_vm2, %v3271_v32  ;;  %v3116_v32 = vld [vmem:[#allocation2 + $0x1a8] sm:$0xff]  ;;  %v3242_v35 = vmul.f32 %v3178_v34, %v3114_v61 }
 0x4e7   : > { %v3244_v42 = vmul.f32 %v3180_v33, %v3116_v32 }
 0x4eb   : > { %4898 = vmatmul.mubr.msk.bf16.gmra.mrb[32].mxu1 %vm2865_vm1, %v5482_v49  ;;  %v3279_v49 = vpack.c.bf16 %v3240_v21, %v3239_v63  ;;  %v6970_v21 = vld [vmem:[%s7224_s25] ss:$0 sm:$0xff] }
 0x4ec   : > { %4901 = vmatprep.mubr.msk.bf16.mxu1 %vm2865_vm1, %v5483_v38  ;;  %v5491_v38 = vld [vmem:[%s6002_s2 + $0xd0] sm:$0xff]  }
 0x4ed   : > { %4970 = vmatmul.mubr.msk.bf16.gmra.mrb[32].mxu0 %vm2994_vm2, %v3272_v15  ;;  %v3280_v15 = vpack.c.bf16 %v3242_v35, %v3241_v5 }
 0x4ee   : > { %4973 = vmatprep.mubr.msk.bf16.mxu0 %vm2994_vm2, %v3273_v17  ;;  %v3281_v17 = vpack.c.bf16 %v3244_v42, %v3243_v36 }
 0x4f3   : > { %4902 = vmatmul.mubr.msk.bf16.gmra.mrb[36].mxu1 %vm2865_vm1, %v5484_v24  ;;  %v5492_v24 = vld [vmem:[%s6002_s2 + $0xd8] sm:$0xff]  }
 0x4f4   : > { %4905 = vmatprep.mubr.msk.bf16.mxu1 %vm2865_vm1, %v5485_v62  ;;  %v5493_v62 = vld [vmem:[%s6002_s2 + $0xe0] sm:$0xff]  }
 0x4f5   : > { %4974 = vmatmul.mubr.msk.bf16.gmra.mrb[36].mxu0 %vm2994_vm2, %v3274_v51  ;;  %v3282_v51 = vpack.c.bf16 %v3246_v11, %v3245_v30 }
 0x4f6   : > { %4977 = vmatprep.mubr.msk.bf16.mxu0 %vm2994_vm2, %v3275_v37  ;;  %v3283_v37 = vpack.c.bf16 %v3248_v13, %v3247_v27 }
 0x4fb   : > { %4906 = vmatmul.mubr.msk.bf16.gmra.mrb[40].mxu1 %vm2865_vm1, %v5486_v3  ;;  %v5494_v3 = vld [vmem:[%s6002_s2 + $0xe8] sm:$0xff]  }
 0x4fc   : > { %4909 = vmatprep.mubr.msk.bf16.mxu1 %vm2865_vm1, %v5487_v41  ;;  %v5495_v41 = vld [vmem:[%s6002_s2 + $0xf0] sm:$0xff]  }
 0x4fd   : > { %4978 = vmatmul.mubr.msk.bf16.gmra.mrb[40].mxu0 %vm2994_vm2, %v3276_v4  ;;  %v3284_v4 = vpack.c.bf16 %v3250_v52, %v3249_v46 }
 0x4fe   : > { %4981 = vmatprep.mubr.msk.bf16.mxu0 %vm2994_vm2, %v3277_v18  ;;  %v3189_v18 = vld [vmem:[%s6007_s14 + $0x1f0] sm:$0xff] }
 0x503   : > { %4910 = vmatmul.mubr.msk.bf16.gmra.mrb[44].mxu1 %vm2865_vm1, %v5488_v28  ;;  %v3125_v28 = vld [vmem:[#allocation2 + $0x1f0] sm:$0xff] }
 0x504   : > { %4913 = vmatprep.mubr.msk.bf16.mxu1 %vm2865_vm1, %v5489_v58  ;;  %v3253_v26 = vmul.f32 %v3189_v18, %v3125_v28 }
 0x505   : > { %4982 = vmatmul.mubr.msk.bf16.gmra.mrb[44].mxu0 %vm2994_vm2, %v3278_v10 }
 0x506   : > { %4985 = vmatprep.mubr.msk.bf16.mxu0 %vm2994_vm2, %v3279_v49  ;;  %v3286_v8 = vpack.c.bf16 %v3254_v44, %v3253_v26 }
 0x50b   : > { %4914 = vmatmul.mubr.msk.bf16.gmra.mrb[48].mxu1 %vm2865_vm1, %v5490_v7 }
 0x50c   : > { %4917 = vmatprep.mubr.msk.bf16.mxu1 %vm2865_vm1, %v5491_v38 }
 0x50d   : > { %4986 = vmatmul.mubr.msk.bf16.gmra.mrb[48].mxu0 %vm2994_vm2, %v3280_v15 }
 0x50e   : > { %4989 = vmatprep.mubr.msk.bf16.mxu0 %vm2994_vm2, %v3281_v17 }
 0x513   : > { %4918 = vmatmul.mubr.msk.bf16.gmra.mrb[52].mxu1 %vm2865_vm1, %v5492_v24 }
 0x514   : > { %4921 = vmatprep.mubr.msk.bf16.mxu1 %vm2865_vm1, %v5493_v62 }
 0x515   : > { %4990 = vmatmul.mubr.msk.bf16.gmra.mrb[52].mxu0 %vm2994_vm2, %v3282_v51 }
 0x516   : > { %4993 = vmatprep.mubr.msk.bf16.mxu0 %vm2994_vm2, %v3283_v37 }
 0x51b   : > { %4922 = vmatmul.mubr.msk.bf16.gmra.mrb[56].mxu1 %vm2865_vm1, %v5494_v3 }
 0x51c   : > { %4925 = vmatprep.mubr.msk.bf16.mxu1 %vm2865_vm1, %v5495_v41 }
 0x51d   : > { %4994 = vmatmul.mubr.msk.bf16.gmra.mrb[56].mxu0 %vm2994_vm2, %v3284_v4 }
 0x51e   : > { %4997 = vmatprep.mubr.msk.bf16.mxu0 %vm2994_vm2, %v3285_v50 }
 0x523   : > { %4926 = vmatmul.mubr.msk.bf16.gmra.mrb[60].mxu1 %vm2865_vm1, %v5496_v60 }
 0x525   : > { %4998 = vmatmul.mubr.msk.bf16.gmra.mrb[60].mxu0 %vm2994_vm2, %v3286_v8 }
 0x57e   : > { %v4867_v23 = vpop.f32.mrb[0].mxu1 }
 0x57f   : > { %v3665_v58 = vpop.f32.mrb[1].mxu1 }
 0x580   : > { %v4868_v55 = vpop.f32.mrb[2].mxu1  ;;  %v4939_v63 = vpop.f32.mrb[0].mxu0 }
 0x581   : > { %v3668_v29 = vpop.f32.mrb[3].mxu1  ;;  %v4083_v10 = vadd.f32 %v4939_v63, %v4867_v23  ;;  %v4074_v7 = vpop.f32.mrb[1].mxu0 }
 0x582   : > { %v4075_v57 = vadd.f32 %v4074_v7, %v3665_v58  ;;  %v4940_v61 = vpop.f32.mrb[2].mxu0 }
 0x583   : > { %v4338_v14 = vadd.f32 %v6970_v21, %v4083_v10  ;;  %v4086_v34 = vadd.f32 %v4940_v61, %v4868_v55  ;;  %v4077_v20 = vpop.f32.mrb[3].mxu0 }
 0x584   : > { %v4336_v0 = vadd.f32 %v6970_v21, %v4075_v57  ;;  %v4078_v33 = vadd.f32 %v4077_v20, %v3668_v29 }
 0x585   : > { %4402 = vst [vmem:[%s6009_s10 + $0x10] sm:$0xff] %v4338_v14  ;;  %v4339_v5 = vadd.f32 %v6970_v21, %v4086_v34 }
 0x586   : > { %v4871_v49 = vpop.f32.mrb[4].mxu1  ;;  %4400 = vst [vmem:[%s6009_s10] sm:$0xff] %v4336_v0  ;;  %v4337_v36 = vadd.f32 %v6970_v21, %v4078_v33 }
 0x587   : > { %v3681_v32 = vpop.f32.mrb[5].mxu1  ;;  %4403 = vst [vmem:[%s6009_s10 + $0x18] sm:$0xff] %v4339_v5 }
 0x588   : > { %v4872_v38 = vpop.f32.mrb[6].mxu1  ;;  %4401 = vst [vmem:[%s6009_s10 + $0x8] sm:$0xff] %v4337_v36  ;;  %v4943_v42 = vpop.f32.mrb[4].mxu0 }
 0x589   : > { %v3684_v35 = vpop.f32.mrb[7].mxu1  ;;  %v4099_v15 = vadd.f32 %v4943_v42, %v4871_v49  ;;  %v4090_v24 = vpop.f32.mrb[5].mxu0 }
 0x58a   : > { %v4091_v16 = vadd.f32 %v4090_v24, %v3681_v32  ;;  %v4944_v48 = vpop.f32.mrb[6].mxu0 }
 0x58b   : > { %v4342_v53 = vadd.f32 %v6970_v21, %v4099_v15  ;;  %v4102_v45 = vadd.f32 %v4944_v48, %v4872_v38  ;;  %v4093_v59 = vpop.f32.mrb[7].mxu0 }
 0x58c   : > { %v4340_v22 = vadd.f32 %v6970_v21, %v4091_v16  ;;  %v4094_v43 = vadd.f32 %v4093_v59, %v3684_v35 }
 0x58d   : > { %4406 = vst [vmem:[%s6009_s10 + $0x30] sm:$0xff] %v4342_v53  ;;  %v4343_v30 = vadd.f32 %v6970_v21, %v4102_v45 }
 0x58e   : > { %v4875_v17 = vpop.f32.mrb[8].mxu1  ;;  %4404 = vst [vmem:[%s6009_s10 + $0x20] sm:$0xff] %v4340_v22  ;;  %v4341_v27 = vadd.f32 %v6970_v21, %v4094_v43 }
 0x58f   : > { %v3697_v19 = vpop.f32.mrb[9].mxu1  ;;  %4407 = vst [vmem:[%s6009_s10 + $0x38] sm:$0xff] %v4343_v30 }
 0x590   : > { %v4876_v62 = vpop.f32.mrb[10].mxu1  ;;  %4405 = vst [vmem:[%s6009_s10 + $0x28] sm:$0xff] %v4341_v27  ;;  %v4947_v13 = vpop.f32.mrb[8].mxu0 }
 0x591   : > { %v3700_v11 = vpop.f32.mrb[11].mxu1  ;;  %v4115_v51 = vadd.f32 %v4947_v13, %v4875_v17  ;;  %v4106_v3 = vpop.f32.mrb[9].mxu0 }
 0x592   : > { %v4107_v47 = vadd.f32 %v4106_v3, %v3697_v19  ;;  %v4948_v9 = vpop.f32.mrb[10].mxu0 }
 0x593   : > { %v4346_v31 = vadd.f32 %v6970_v21, %v4115_v51  ;;  %v4118_v2 = vadd.f32 %v4948_v9, %v4876_v62  ;;  %v4109_v39 = vpop.f32.mrb[11].mxu0 }
 0x594   : > { %v4344_v40 = vadd.f32 %v6970_v21, %v4107_v47  ;;  %v4110_v25 = vadd.f32 %v4109_v39, %v3700_v11 }
 0x595   : > { %4410 = vst [vmem:[%s6009_s10 + $0x50] sm:$0xff] %v4346_v31  ;;  %v4347_v46 = vadd.f32 %v6970_v21, %v4118_v2 }
 0x596   : > { %v4879_v37 = vpop.f32.mrb[12].mxu1  ;;  %4408 = vst [vmem:[%s6009_s10 + $0x40] sm:$0xff] %v4344_v40  ;;  %v4345_v54 = vadd.f32 %v6970_v21, %v4110_v25 }
 0x597   : > { %v3713_v1 = vpop.f32.mrb[13].mxu1  ;;  %4411 = vst [vmem:[%s6009_s10 + $0x58] sm:$0xff] %v4347_v46 }
 0x598   : > { %v4880_v41 = vpop.f32.mrb[14].mxu1  ;;  %4409 = vst [vmem:[%s6009_s10 + $0x48] sm:$0xff] %v4345_v54  ;;  %v4951_v12 = vpop.f32.mrb[12].mxu0 }
 0x599   : > { %v3716_v52 = vpop.f32.mrb[15].mxu1  ;;  %v4131_v4 = vadd.f32 %v4951_v12, %v4879_v37  ;;  %v4122_v28 = vpop.f32.mrb[13].mxu0 }
 0x59a   : > { %v4123_v50 = vadd.f32 %v4122_v28, %v3713_v1  ;;  %v4952_v56 = vpop.f32.mrb[14].mxu0 }
 0x59b   : > { %v4350_v6 = vadd.f32 %v6970_v21, %v4131_v4  ;;  %v4134_v60 = vadd.f32 %v4952_v56, %v4880_v41  ;;  %v4125_v26 = vpop.f32.mrb[15].mxu0 }
 0x59c   : > { %v4348_v8 = vadd.f32 %v6970_v21, %v4123_v50  ;;  %v4126_v23 = vadd.f32 %v4125_v26, %v3716_v52 }
 0x59d   : > { %4414 = vst [vmem:[%s6009_s10 + $0x70] sm:$0xff] %v4350_v6  ;;  %v4351_v55 = vadd.f32 %v6970_v21, %v4134_v60 }
 0x59e   : > { %v4883_v18 = vpop.f32.mrb[16].mxu1  ;;  %4412 = vst [vmem:[%s6009_s10 + $0x60] sm:$0xff] %v4348_v8  ;;  %v4349_v63 = vadd.f32 %v6970_v21, %v4126_v23 }
 0x59f   : > { %v3729_v44 = vpop.f32.mrb[17].mxu1  ;;  %4415 = vst [vmem:[%s6009_s10 + $0x78] sm:$0xff] %v4351_v55 }
 0x5a0   : > { %v4884_v58 = vpop.f32.mrb[18].mxu1  ;;  %4413 = vst [vmem:[%s6009_s10 + $0x68] sm:$0xff] %v4349_v63  ;;  %v4955_v10 = vpop.f32.mrb[16].mxu0 }
 0x5a1   : > { %v3732_v29 = vpop.f32.mrb[19].mxu1  ;;  %v4147_v7 = vadd.f32 %v4955_v10, %v4883_v18  ;;  %v4138_v57 = vpop.f32.mrb[17].mxu0 }
 0x5a2   : > { %v4139_v61 = vadd.f32 %v4138_v57, %v3729_v44  ;;  %v4956_v49 = vpop.f32.mrb[18].mxu0 }
 0x5a3   : > { %v4354_v34 = vadd.f32 %v6970_v21, %v4147_v7  ;;  %v4150_v20 = vadd.f32 %v4956_v49, %v4884_v58  ;;  %v4141_v32 = vpop.f32.mrb[19].mxu0 }
 0x5a4   : > { %v4352_v33 = vadd.f32 %v6970_v21, %v4139_v61  ;;  %v4142_v38 = vadd.f32 %v4141_v32, %v3732_v29 }
 0x5a5   : > { %4418 = vst [vmem:[%s6009_s10 + $0x90] sm:$0xff] %v4354_v34  ;;  %v4355_v35 = vadd.f32 %v6970_v21, %v4150_v20 }
 0x5a6   : > { %v4887_v14 = vpop.f32.mrb[20].mxu1  ;;  %4416 = vst [vmem:[%s6009_s10 + $0x80] sm:$0xff] %v4352_v33  ;;  %v4353_v42 = vadd.f32 %v6970_v21, %v4142_v38 }
 0x5a7   : > { %v3745_v0 = vpop.f32.mrb[21].mxu1  ;;  %4419 = vst [vmem:[%s6009_s10 + $0x98] sm:$0xff] %v4355_v35 }
 0x5a8   : > { %v4888_v5 = vpop.f32.mrb[22].mxu1  ;;  %4417 = vst [vmem:[%s6009_s10 + $0x88] sm:$0xff] %v4353_v42  ;;  %v4959_v15 = vpop.f32.mrb[20].mxu0 }
 0x5a9   : > { %v3748_v36 = vpop.f32.mrb[23].mxu1  ;;  %v4163_v24 = vadd.f32 %v4959_v15, %v4887_v14  ;;  %v4154_v16 = vpop.f32.mrb[21].mxu0 }
 0x5aa   : > { %v4155_v48 = vadd.f32 %v4154_v16, %v3745_v0  ;;  %v4960_v17 = vpop.f32.mrb[22].mxu0 }
 0x5ab   : > { %v4358_v45 = vadd.f32 %v6970_v21, %v4163_v24  ;;  %v4166_v59 = vadd.f32 %v4960_v17, %v4888_v5  ;;  %v4157_v19 = vpop.f32.mrb[23].mxu0 }
 0x5ac   : > { %v4356_v43 = vadd.f32 %v6970_v21, %v4155_v48  ;;  %v4158_v62 = vadd.f32 %v4157_v19, %v3748_v36 }
 0x5ad   : > { %4422 = vst [vmem:[%s6009_s10 + $0xb0] sm:$0xff] %v4358_v45  ;;  %v4359_v11 = vadd.f32 %v6970_v21, %v4166_v59 }
 0x5ae   : > { %v4891_v53 = vpop.f32.mrb[24].mxu1  ;;  %4420 = vst [vmem:[%s6009_s10 + $0xa0] sm:$0xff] %v4356_v43  ;;  %v4357_v13 = vadd.f32 %v6970_v21, %v4158_v62 }
 0x5af   : > { %v3761_v22 = vpop.f32.mrb[25].mxu1  ;;  %4423 = vst [vmem:[%s6009_s10 + $0xb8] sm:$0xff] %v4359_v11 }
 0x5b0   : > { %v4892_v30 = vpop.f32.mrb[26].mxu1  ;;  %4421 = vst [vmem:[%s6009_s10 + $0xa8] sm:$0xff] %v4357_v13  ;;  %v4963_v51 = vpop.f32.mrb[24].mxu0 }
 0x5b1   : > { %v3764_v27 = vpop.f32.mrb[27].mxu1  ;;  %v4179_v3 = vadd.f32 %v4963_v51, %v4891_v53  ;;  %v4170_v47 = vpop.f32.mrb[25].mxu0 }
 0x5b2   : > { %v4171_v9 = vadd.f32 %v4170_v47, %v3761_v22  ;;  %v4964_v37 = vpop.f32.mrb[26].mxu0 }
 0x5b3   : > { %v4362_v2 = vadd.f32 %v6970_v21, %v4179_v3  ;;  %v4182_v39 = vadd.f32 %v4964_v37, %v4892_v30  ;;  %v4173_v1 = vpop.f32.mrb[27].mxu0 }
 0x5b4   : > { %v4360_v25 = vadd.f32 %v6970_v21, %v4171_v9  ;;  %v4174_v41 = vadd.f32 %v4173_v1, %v3764_v27 }
 0x5b5   : > { %4426 = vst [vmem:[%s6009_s10 + $0xd0] sm:$0xff] %v4362_v2  ;;  %v4363_v52 = vadd.f32 %v6970_v21, %v4182_v39 }
 0x5b6   : > { %v4895_v31 = vpop.f32.mrb[28].mxu1  ;;  %4424 = vst [vmem:[%s6009_s10 + $0xc0] sm:$0xff] %v4360_v25  ;;  %v4361_v12 = vadd.f32 %v6970_v21, %v4174_v41 }
 0x5b7   : > { %v3777_v40 = vpop.f32.mrb[29].mxu1  ;;  %4427 = vst [vmem:[%s6009_s10 + $0xd8] sm:$0xff] %v4363_v52 }
 0x5b8   : > { %v4896_v46 = vpop.f32.mrb[30].mxu1  ;;  %4425 = vst [vmem:[%s6009_s10 + $0xc8] sm:$0xff] %v4361_v12  ;;  %v4967_v4 = vpop.f32.mrb[28].mxu0 }
 0x5b9   : > { %v3780_v54 = vpop.f32.mrb[31].mxu1  ;;  %v4195_v28 = vadd.f32 %v4967_v4, %v4895_v31  ;;  %v4186_v50 = vpop.f32.mrb[29].mxu0 }
 0x5ba   : > { %v4187_v56 = vadd.f32 %v4186_v50, %v3777_v40  ;;  %v4968_v18 = vpop.f32.mrb[30].mxu0 }
 0x5bb   : > { %v4366_v60 = vadd.f32 %v6970_v21, %v4195_v28  ;;  %v4198_v26 = vadd.f32 %v4968_v18, %v4896_v46  ;;  %v4189_v44 = vpop.f32.mrb[31].mxu0 }
 0x5bc   : > { %v4364_v23 = vadd.f32 %v6970_v21, %v4187_v56  ;;  %v4190_v58 = vadd.f32 %v4189_v44, %v3780_v54 }
 0x5bd   : > { %4430 = vst [vmem:[%s6009_s10 + $0xf0] sm:$0xff] %v4366_v60  ;;  %v4367_v29 = vadd.f32 %v6970_v21, %v4198_v26 }
 0x5be   : > { %v4899_v6 = vpop.f32.mrb[32].mxu1  ;;  %4428 = vst [vmem:[%s6009_s10 + $0xe0] sm:$0xff] %v4364_v23  ;;  %v4365_v10 = vadd.f32 %v6970_v21, %v4190_v58 }
 0x5bf   : > { %v3793_v8 = vpop.f32.mrb[33].mxu1  ;;  %4431 = vst [vmem:[%s6009_s10 + $0xf8] sm:$0xff] %v4367_v29 }
 0x5c0   : > { %v4900_v55 = vpop.f32.mrb[34].mxu1  ;;  %4429 = vst [vmem:[%s6009_s10 + $0xe8] sm:$0xff] %v4365_v10  ;;  %v4971_v7 = vpop.f32.mrb[32].mxu0 }
 0x5c1   : > { %v3796_v63 = vpop.f32.mrb[35].mxu1  ;;  %v4211_v57 = vadd.f32 %v4971_v7, %v4899_v6  ;;  %v4202_v61 = vpop.f32.mrb[33].mxu0 }
 0x5c2   : > { %v4203_v49 = vadd.f32 %v4202_v61, %v3793_v8  ;;  %v4972_v14 = vpop.f32.mrb[34].mxu0 }
 0x5c3   : > { %v4370_v20 = vadd.f32 %v6970_v21, %v4211_v57  ;;  %v4214_v32 = vadd.f32 %v4972_v14, %v4900_v55  ;;  %v4205_v0 = vpop.f32.mrb[35].mxu0 }
 0x5c4   : > { %v4368_v38 = vadd.f32 %v6970_v21, %v4203_v49  ;;  %v4206_v5 = vadd.f32 %v4205_v0, %v3796_v63 }
 0x5c5   : > { %4434 = vst [vmem:[%s6009_s10 + $0x110] sm:$0xff] %v4370_v20  ;;  %v4371_v36 = vadd.f32 %v6970_v21, %v4214_v32 }
 0x5c6   : > { %v4903_v34 = vpop.f32.mrb[36].mxu1  ;;  %4432 = vst [vmem:[%s6009_s10 + $0x100] sm:$0xff] %v4368_v38  ;;  %v4369_v15 = vadd.f32 %v6970_v21, %v4206_v5 }
 0x5c7   : > { %v3809_v33 = vpop.f32.mrb[37].mxu1  ;;  %4435 = vst [vmem:[%s6009_s10 + $0x118] sm:$0xff] %v4371_v36 }
 0x5c8   : > { %v4904_v35 = vpop.f32.mrb[38].mxu1  ;;  %4433 = vst [vmem:[%s6009_s10 + $0x108] sm:$0xff] %v4369_v15  ;;  %v4975_v24 = vpop.f32.mrb[36].mxu0 }
 0x5c9   : > { %v3812_v42 = vpop.f32.mrb[39].mxu1  ;;  %v4227_v16 = vadd.f32 %v4975_v24, %v4903_v34  ;;  %v4218_v48 = vpop.f32.mrb[37].mxu0 }
 0x5ca   : > { %v4219_v17 = vadd.f32 %v4218_v48, %v3809_v33  ;;  %v4976_v53 = vpop.f32.mrb[38].mxu0 }
 0x5cb   : > { %v4374_v59 = vadd.f32 %v6970_v21, %v4227_v16  ;;  %v4230_v19 = vadd.f32 %v4976_v53, %v4904_v35  ;;  %v4221_v22 = vpop.f32.mrb[39].mxu0 }
 0x5cc   : > { %v4372_v62 = vadd.f32 %v6970_v21, %v4219_v17  ;;  %v4222_v30 = vadd.f32 %v4221_v22, %v3812_v42 }
 0x5cd   : > { %4438 = vst [vmem:[%s6009_s10 + $0x130] sm:$0xff] %v4374_v59  ;;  %v4375_v27 = vadd.f32 %v6970_v21, %v4230_v19 }
 0x5ce   : > { %v4907_v45 = vpop.f32.mrb[40].mxu1  ;;  %4436 = vst [vmem:[%s6009_s10 + $0x120] sm:$0xff] %v4372_v62  ;;  %v4373_v51 = vadd.f32 %v6970_v21, %v4222_v30 }
 0x5cf   : > { %v3825_v43 = vpop.f32.mrb[41].mxu1  ;;  %4439 = vst [vmem:[%s6009_s10 + $0x138] sm:$0xff] %v4375_v27 }
 0x5d0   : > { %v4908_v11 = vpop.f32.mrb[42].mxu1  ;;  %4437 = vst [vmem:[%s6009_s10 + $0x128] sm:$0xff] %v4373_v51  ;;  %v4979_v3 = vpop.f32.mrb[40].mxu0 }
 0x5d1   : > { %v3828_v13 = vpop.f32.mrb[43].mxu1  ;;  %v4243_v47 = vadd.f32 %v4979_v3, %v4907_v45  ;;  %v4234_v9 = vpop.f32.mrb[41].mxu0 }
 0x5d2   : > { %v4235_v37 = vadd.f32 %v4234_v9, %v3825_v43  ;;  %v4980_v31 = vpop.f32.mrb[42].mxu0 }
 0x5d3   : > { %v4378_v39 = vadd.f32 %v6970_v21, %v4243_v47  ;;  %v4246_v1 = vadd.f32 %v4980_v31, %v4908_v11  ;;  %v4237_v40 = vpop.f32.mrb[43].mxu0 }
 0x5d4   : > { %v4376_v41 = vadd.f32 %v6970_v21, %v4235_v37  ;;  %v4238_v46 = vadd.f32 %v4237_v40, %v3828_v13 }
 0x5d5   : > { %4442 = vst [vmem:[%s6009_s10 + $0x150] sm:$0xff] %v4378_v39  ;;  %v4379_v54 = vadd.f32 %v6970_v21, %v4246_v1 }
 0x5d6   : > { %v4911_v2 = vpop.f32.mrb[44].mxu1  ;;  %4440 = vst [vmem:[%s6009_s10 + $0x140] sm:$0xff] %v4376_v41  ;;  %v4377_v4 = vadd.f32 %v6970_v21, %v4238_v46 }
 0x5d7   : > { %v3841_v25 = vpop.f32.mrb[45].mxu1  ;;  %4443 = vst [vmem:[%s6009_s10 + $0x158] sm:$0xff] %v4379_v54 }
 0x5d8   : > { %v4912_v52 = vpop.f32.mrb[46].mxu1  ;;  %4441 = vst [vmem:[%s6009_s10 + $0x148] sm:$0xff] %v4377_v4  ;;  %v4983_v28 = vpop.f32.mrb[44].mxu0 }
 0x5d9   : > { %v3844_v12 = vpop.f32.mrb[47].mxu1  ;;  %v4259_v50 = vadd.f32 %v4983_v28, %v4911_v2  ;;  %v4250_v56 = vpop.f32.mrb[45].mxu0 }
 0x5da   : > { %v4251_v18 = vadd.f32 %v4250_v56, %v3841_v25  ;;  %v4984_v6 = vpop.f32.mrb[46].mxu0 }
 0x5db   : > { %v4382_v26 = vadd.f32 %v6970_v21, %v4259_v50  ;;  %v4262_v44 = vadd.f32 %v4984_v6, %v4912_v52  ;;  %v4253_v8 = vpop.f32.mrb[47].mxu0 }
 0x5dc   : > { %v4380_v58 = vadd.f32 %v6970_v21, %v4251_v18  ;;  %v4254_v55 = vadd.f32 %v4253_v8, %v3844_v12 }
 0x5dd   : > { %4446 = vst [vmem:[%s6009_s10 + $0x170] sm:$0xff] %v4382_v26  ;;  %v4383_v63 = vadd.f32 %v6970_v21, %v4262_v44 }
 0x5de   : > { %v4915_v60 = vpop.f32.mrb[48].mxu1  ;;  %4444 = vst [vmem:[%s6009_s10 + $0x160] sm:$0xff] %v4380_v58  ;;  %v4381_v7 = vadd.f32 %v6970_v21, %v4254_v55 }
 0x5df   : > { %v3857_v23 = vpop.f32.mrb[49].mxu1  ;;  %4447 = vst [vmem:[%s6009_s10 + $0x178] sm:$0xff] %v4383_v63 }
 0x5e0   : > { %v4916_v29 = vpop.f32.mrb[50].mxu1  ;;  %4445 = vst [vmem:[%s6009_s10 + $0x168] sm:$0xff] %v4381_v7  ;;  %v4987_v57 = vpop.f32.mrb[48].mxu0 }
 0x5e1   : > { %v3860_v10 = vpop.f32.mrb[51].mxu1  ;;  %v4275_v61 = vadd.f32 %v4987_v57, %v4915_v60  ;;  %v4266_v49 = vpop.f32.mrb[49].mxu0 }
 0x5e2   : > { %v4267_v14 = vadd.f32 %v4266_v49, %v3857_v23  ;;  %v4988_v34 = vpop.f32.mrb[50].mxu0 }
 0x5e3   : > { %v4386_v32 = vadd.f32 %v6970_v21, %v4275_v61  ;;  %v4278_v0 = vadd.f32 %v4988_v34, %v4916_v29  ;;  %v4269_v33 = vpop.f32.mrb[51].mxu0 }
 0x5e4   : > { %v4384_v5 = vadd.f32 %v6970_v21, %v4267_v14  ;;  %v4270_v35 = vadd.f32 %v4269_v33, %v3860_v10 }
 0x5e5   : > { %4450 = vst [vmem:[%s6009_s10 + $0x190] sm:$0xff] %v4386_v32  ;;  %v4387_v42 = vadd.f32 %v6970_v21, %v4278_v0 }
 0x5e6   : > { %v4919_v20 = vpop.f32.mrb[52].mxu1  ;;  %4448 = vst [vmem:[%s6009_s10 + $0x180] sm:$0xff] %v4384_v5  ;;  %v4385_v24 = vadd.f32 %v6970_v21, %v4270_v35 }
 0x5e7   : > { %v3873_v38 = vpop.f32.mrb[53].mxu1  ;;  %4451 = vst [vmem:[%s6009_s10 + $0x198] sm:$0xff] %v4387_v42 }
 0x5e8   : > { %v4920_v36 = vpop.f32.mrb[54].mxu1  ;;  %4449 = vst [vmem:[%s6009_s10 + $0x188] sm:$0xff] %v4385_v24  ;;  %v4991_v16 = vpop.f32.mrb[52].mxu0 }
 0x5e9   : > { %v3876_v15 = vpop.f32.mrb[55].mxu1  ;;  %v4291_v48 = vadd.f32 %v4991_v16, %v4919_v20  ;;  %v4282_v17 = vpop.f32.mrb[53].mxu0 }
 0x5ea   : > { %v4283_v53 = vadd.f32 %v4282_v17, %v3873_v38  ;;  %v4992_v45 = vpop.f32.mrb[54].mxu0 }
 0x5eb   : > { %v4390_v19 = vadd.f32 %v6970_v21, %v4291_v48  ;;  %v4294_v22 = vadd.f32 %v4992_v45, %v4920_v36  ;;  %v4285_v43 = vpop.f32.mrb[55].mxu0 }
 0x5ec   : > { %v4388_v30 = vadd.f32 %v6970_v21, %v4283_v53  ;;  %v4286_v11 = vadd.f32 %v4285_v43, %v3876_v15 }
 0x5ed   : > { %4454 = vst [vmem:[%s6009_s10 + $0x1b0] sm:$0xff] %v4390_v19  ;;  %v4391_v13 = vadd.f32 %v6970_v21, %v4294_v22 }
 0x5ee   : > { %v4923_v59 = vpop.f32.mrb[56].mxu1  ;;  %4452 = vst [vmem:[%s6009_s10 + $0x1a0] sm:$0xff] %v4388_v30  ;;  %v4389_v3 = vadd.f32 %v6970_v21, %v4286_v11 }
 0x5ef   : > { %v3889_v62 = vpop.f32.mrb[57].mxu1  ;;  %4455 = vst [vmem:[%s6009_s10 + $0x1b8] sm:$0xff] %v4391_v13 }
 0x5f0   : > { %v4924_v27 = vpop.f32.mrb[58].mxu1  ;;  %4453 = vst [vmem:[%s6009_s10 + $0x1a8] sm:$0xff] %v4389_v3  ;;  %v4995_v47 = vpop.f32.mrb[56].mxu0 }
 0x5f1   : > { %v3892_v51 = vpop.f32.mrb[59].mxu1  ;;  %v4307_v9 = vadd.f32 %v4995_v47, %v4923_v59  ;;  %v4298_v37 = vpop.f32.mrb[57].mxu0 }
 0x5f2   : > { %v4299_v31 = vadd.f32 %v4298_v37, %v3889_v62  ;;  %v4996_v2 = vpop.f32.mrb[58].mxu0 }
 0x5f3   : > { %v4394_v1 = vadd.f32 %v6970_v21, %v4307_v9  ;;  %v4310_v40 = vadd.f32 %v4996_v2, %v4924_v27  ;;  %v4301_v25 = vpop.f32.mrb[59].mxu0 }
 0x5f4   : > { %v4392_v46 = vadd.f32 %v6970_v21, %v4299_v31  ;;  %v4302_v52 = vadd.f32 %v4301_v25, %v3892_v51 }
 0x5f5   : > { %4458 = vst [vmem:[%s6009_s10 + $0x1d0] sm:$0xff] %v4394_v1  ;;  %v4395_v12 = vadd.f32 %v6970_v21, %v4310_v40 }
 0x5f6   : > { %v4927_v39 = vpop.f32.mrb[60].mxu1  ;;  %4456 = vst [vmem:[%s6009_s10 + $0x1c0] sm:$0xff] %v4392_v46  ;;  %v4393_v28 = vadd.f32 %v6970_v21, %v4302_v52 }
 0x5f7   : > { %v3905_v41 = vpop.f32.mrb[61].mxu1  ;;  %4459 = vst [vmem:[%s6009_s10 + $0x1d8] sm:$0xff] %v4395_v12 }
 0x5f8   : > { %v4928_v54 = vpop.f32.mrb[62].mxu1  ;;  %4457 = vst [vmem:[%s6009_s10 + $0x1c8] sm:$0xff] %v4393_v28  ;;  %v4999_v50 = vpop.f32.mrb[60].mxu0 }
 0x5f9   : > { %v3908_v4 = vpop.f32.mrb[63].mxu1  ;;  %v4323_v56 = vadd.f32 %v4999_v50, %v4927_v39  ;;  %v4314_v18 = vpop.f32.mrb[61].mxu0 }
 0x5fa   : > { %v4315_v6 = vadd.f32 %v4314_v18, %v3905_v41  ;;  %v5000_v60 = vpop.f32.mrb[62].mxu0 }
 0x5fb   : > { %v4398_v26 = vadd.f32 %v6970_v21, %v4323_v56  ;;  %v4326_v44 = vadd.f32 %v5000_v60, %v4928_v54  ;;  %v4317_v8 = vpop.f32.mrb[63].mxu0 }
 0x5fc   : > { %v4396_v23 = vadd.f32 %v6970_v21, %v4315_v6  ;;  %v4318_v58 = vadd.f32 %v4317_v8, %v3908_v4 }
 0x5fd   : > { %4462 = vst [vmem:[%s6009_s10 + $0x1f0] sm:$0xff] %v4398_v26  ;;  %v4399_v55 = vadd.f32 %v6970_v21, %v4326_v44 }
 0x5fe   : > { %4460 = vst [vmem:[%s6009_s10 + $0x1e0] sm:$0xff] %v4396_v23  ;;  %v4397_v29 = vadd.f32 %v6970_v21, %v4318_v58 }
 0x5ff   : > { %4463 = vst [vmem:[%s6009_s10 + $0x1f8] sm:$0xff] %v4399_v55 }
 0x600   : > { %4461 = vst [vmem:[%s6009_s10 + $0x1e8] sm:$0xff] %v4397_v29 }
 0x601 PF: > { %s4790_s2 = sshll.u32 %s5635_s12, 13  ;;  %s7225_s29 = sld [smem:[#allocation29_spill]] }
 0x602   : > { %s4478_s8 = sshll.u32 %s6009_s10, 4  ;;  %s7227_s16 = sand.u32 1, %s5611_s28   ;;  %s7107_s8 = int_to_ptr.vmem [resolvable:$true] %s4478_s8 }
 0x603   : > { %s7111_s30 = scalar_lea.sflag [#allocation6], %s7227_s16  ;;  %s5525_s19 = scalar_lea.vmem %s7107_s8, 8192 }
 0x604   : > { %p5526_p13 = scmp.ne.s32.totalorder %s7107_s8, %s5525_s19  ;;  %p7228_p0 = scmp.ne.s32.totalorder %s7202_s18, 0 }
 0x605   : > { %s5657_s12 = smov [#allocation7]  }
 0x606   : > { %p5527_p2 = pnand %p5526_p13, %p7228_p0  ;;  %s5529_s11 = sshll.u32 %s5657_s12, 4  ;;  %s5530_s11 = int_to_ptr.vmem [resolvable:$false] %s5529_s11 }
 0x607   : > { %s7226_s22 = smov %s7225_s29  ;;  %s7104_s17 = scalar_lea.hbm %s7225_s29, %s4790_s2 }
 0x608   : > { %p5528_p4 = pneg %p5527_p2  ;;  %s5531_s13 = scalar_lea.vmem %s5530_s11, 16384 }
 0x609   : > { %p5532_p5 = scmp.lt.s32.totalorder %s7107_s8, %s5530_s11  ;;  %p5533_p8 = scmp.lt.s32.totalorder %s5531_s13, %s5525_s19 }
 0x60b   : > { %p5534_p9 = por %p5533_p8, %p5532_p5 }
 0x60d   : > { %p5535_p6 = pnand %p5534_p9, %p5528_p4 }
 0x60f   : > { %5538 = shalt.err (!%p5535_p6)
}
 0x610   : > { %s5539_s10 = scalar_lea.hbm %s7104_s17, 8192  ;;  %s5543_s23 = scalar_lea.hbm %s7226_s22, 16384 }
 0x611   : > { %p5540_p10 = scmp.ne.s32.totalorder %s7104_s17, %s5539_s10  ;;  %p5544_p12 = scmp.lt.u32.totalorder %s7104_s17, %s7226_s22 }
 0x612   : > { %p5545_p7 = scmp.lt.u32.totalorder %s5543_s23, %s5539_s10  ;;  %p5547_p13 = scmp.lt.u32.totalorder %s5539_s10, %s7104_s17 }
 0x613   : > { %p5541_p11 = pnand %p5540_p10, %p7228_p0 }
 0x614   : > { %p5546_p1 = por %p5545_p7, %p5544_p12 }
 0x615   : > { %p5542_p3 = pneg %p5541_p11 }
 0x616   : > { %p5548_p2 = por %p5547_p13, %p5546_p1 }
 0x618   : > { %p5549_p4 = pnand %p5548_p2, %p5542_p3 }
 0x61a   : > { %5552 = shalt.err (!%p5549_p4)
}
 0x61b   : > { %s5658_s25 = smov 128   ;;  %s5659_s2 = smov 8  }
 0x61c   : > { %5323 = dma.vmem_to_hbm [thread:$0]  (%p7228_p0), %s7107_s8, 8192, %s7104_s17, %s7111_s30, %s5658_s25, %s5658_s25, %s5659_s2  }
 0x61d PF: > { %p5329_p5 = scmp.ge.s32.totalorder %s5647_s15, 2  ;;  %s4493_s3 = sand.u32 1, %s5607_s27  }
 0x61e   : > { %p7229_p8 = scmp.ne.s32.totalorder %s7205_s7, 0  ;;  %s4494_s26 = scalar_lea.sflag [#allocation6], %s4493_s3 }
 0x620   : > { %p5326_p9 = pnand %p5329_p5, %p7229_p8 }
 0x622   : > { %5602 = dma.done.wait (!%p5326_p9), %s4494_s26, 8192  }
 0x623   : > { %5604 = vsyncadd (!%p5326_p9), %s4494_s26, 4294959104  ;;  %s24_s15 = sadd.s32 1, %s5647_s15   ;;  %s7230_s29 = sld [smem:[#allocation10_spill]] }
 0x624   : > { %p21_p6 = scmp.ge.s32.totalorder %s24_s15, 6   ;;  %s7231_s16 = sld [smem:[#allocation16_spill]] }
 0x625   : > { %s7232_s18 = sld [smem:[#allocation11_spill]]  ;;  %s7233_s10 = sld [smem:[#allocation17_spill]] }
 0x626   : > { %s7234_s11 = sld [smem:[#allocation12_spill]]  ;;  %s7235_s12 = sld [smem:[#allocation13_spill]] }
 0x627   : > { %s7236_s13 = sld [smem:[#allocation14_spill]]  ;;  %s7237_s14 = sld [smem:[#allocation15_spill]] }
 0x628   : > { %s7238_s27 = smov %s5611_s28  ;;  %s7241_s30 = smov %s5623_s9 }
 0x629   : > { %s7239_s28 = smov %s7230_s29  ;;  %23 = sbr.rel (!%p21_p6) target bundleno = 14 (0xe), region = 145 }
 0x62a   : > { %s7240_s29 = smov %s7231_s16 }
 0x62b   : > { %s7242_s9 = smov %s7232_s18 }
 0x630   :  { %4499 = vsyncpa [#allocation5], 1 }
 0x631   :  { %4501 = vsyncpa [#allocation5 + $0x1], 1 }
 0x632   :  { %4502 = vsyncpa [#allocation6], 1 }
 0x633   :  { %4504 = vsyncpa [#allocation6 + $0x1], 1 }

</bundles_post_ra>
